<compile_context>
chip_gen: v7x
topology: tpu7x:2x2x1
jax: 0.10.0
libtpu: 0.0.40
codegen_flags: <defaults>
</compile_context>

<pallas_src>
import functools

import jax
import jax.numpy as jnp
import numpy as np
from jax.experimental import pallas as pl
from jax.experimental.pallas import tpu as pltpu

EPS = 1e-5
LANE = 128


def _round_up(x, m):
    return ((x + m - 1) // m) * m


# ---------------------------------------------------------------------------
# Kernel 1: fused (previous-BN affine) -> zero-pad -> conv3x3 (single K=9*Cin
# matmul) -> +bias -> ReLU -> activation + per-image partial BN statistics.
# ---------------------------------------------------------------------------
def conv_block_kernel(x_ref, a_ref, c_ref, w_ref, b_ref,
                      h_ref, stats_ref, xpad_ref, *, mxu_dtype):
    _, H, W, Ci = x_ref.shape
    Co = h_ref.shape[-1]

    # Zero only the 1-pixel halo ring of the padded scratch; the interior is
    # fully overwritten below (no full-buffer memset).
    xpad_ref[0:1, :, :] = jnp.zeros((1, W + 2, Ci), jnp.float32)
    xpad_ref[H + 1:H + 2, :, :] = jnp.zeros((1, W + 2, Ci), jnp.float32)
    xpad_ref[:, 0:1, :] = jnp.zeros((H + 2, 1, Ci), jnp.float32)
    xpad_ref[:, W + 1:W + 2, :] = jnp.zeros((H + 2, 1, Ci), jnp.float32)

    # Fused per-channel affine of the previous BatchNorm (identity for the
    # first block), written straight into the interior of the padded scratch.
    a = a_ref[...].reshape(1, 1, Ci)
    c = c_ref[...].reshape(1, 1, Ci)
    xpad_ref[1:H + 1, 1:W + 1, :] = x_ref[...].reshape(H, W, Ci) * a + c

    # In-kernel im2col: (H*W, 9*Ci) patches => the whole 3x3 conv is a single
    # MXU contraction with K = 9*Ci (Ci is already a multiple of 128, so the
    # per-tap windows are lane-dense).
    xpad = xpad_ref[...]
    cols = []
    for ky in range(3):
        for kx in range(3):
            cols.append(xpad[ky:ky + H, kx:kx + W, :].reshape(H * W, Ci))
    patches = jnp.concatenate(cols, axis=-1)                    # (H*W, 9*Ci)

    acc = jnp.dot(patches.astype(mxu_dtype), w_ref[...].astype(mxu_dtype),
                  preferred_element_type=jnp.float32)           # (H*W, Co)
    h = jnp.maximum(acc + b_ref[...], 0.0)                      # bias + ReLU

    # Per-image partial BN statistics over the lane-dense (H*W, Co) slab;
    # reduced across the batch in the wrapper (exact batch-global stats).
    s = jnp.sum(h, axis=0, keepdims=True)
    ssq = jnp.sum(h * h, axis=0, keepdims=True)
    stats_ref[...] = jnp.concatenate(
        [s, ssq, jnp.zeros((6, Co), jnp.float32)], axis=0).reshape(1, 8, Co)

    h_ref[...] = h.reshape(1, H, W, Co)


# ---------------------------------------------------------------------------
# Kernel 2: final per-channel affine (the second BatchNorm), lane-dense.
# ---------------------------------------------------------------------------
def affine_kernel(x_ref, a_ref, c_ref, o_ref):
    C = x_ref.shape[-1]
    a = a_ref[...].reshape(1, 1, 1, C)
    c = c_ref[...].reshape(1, 1, 1, C)
    o_ref[...] = x_ref[...] * a + c


# ---------------------------------------------------------------------------
# pallas_call wrappers
# ---------------------------------------------------------------------------
def _conv_block(x, a_row, c_row, wcol, b_row, Cop, mxu_dtype):
    N, H, W, Cip = x.shape
    kernel = functools.partial(conv_block_kernel, mxu_dtype=mxu_dtype)
    return pl.pallas_call(
        kernel,
        out_shape=(jax.ShapeDtypeStruct((N, H, W, Cop), jnp.float32),
                   jax.ShapeDtypeStruct((N, 8, Cop), jnp.float32)),
        grid=(N,),
        in_specs=[
            pl.BlockSpec((1, H, W, Cip), lambda n: (n, 0, 0, 0)),
            pl.BlockSpec((1, Cip), lambda n: (0, 0)),
            pl.BlockSpec((1, Cip), lambda n: (0, 0)),
            pl.BlockSpec((9 * Cip, Cop), lambda n: (0, 0)),
            pl.BlockSpec((1, Cop), lambda n: (0, 0)),
        ],
        out_specs=(
            pl.BlockSpec((1, H, W, Cop), lambda n: (n, 0, 0, 0)),
            pl.BlockSpec((1, 8, Cop), lambda n: (n, 0, 0)),
        ),
        scratch_shapes=[pltpu.VMEM((H + 2, W + 2, Cip), jnp.float32)],
        compiler_params=pltpu.CompilerParams(
            dimension_semantics=("parallel",),
            vmem_limit_bytes=48 * 1024 * 1024),
    )(x, a_row, c_row, wcol, b_row)


def _apply_affine(x, a_row, c_row):
    N, H, W, C = x.shape
    return pl.pallas_call(
        affine_kernel,
        out_shape=jax.ShapeDtypeStruct((N, H, W, C), jnp.float32),
        grid=(N,),
        in_specs=[
            pl.BlockSpec((1, H, W, C), lambda n: (n, 0, 0, 0)),
            pl.BlockSpec((1, C), lambda n: (0, 0)),
            pl.BlockSpec((1, C), lambda n: (0, 0)),
        ],
        out_specs=pl.BlockSpec((1, H, W, C), lambda n: (n, 0, 0, 0)),
        compiler_params=pltpu.CompilerParams(
            dimension_semantics=("parallel",)),
    )(x, a_row, c_row)


def _bn_affine_coeffs(stats, g_row, be_row, count):
    """stats: (N, 8, C) with row 0 = per-image sum, row 1 = per-image sum(x^2).
    Returns (a, c) such that BN(x) = a*x + c (training-mode batch stats)."""
    s = jnp.sum(stats[:, 0, :], axis=0)
    ssq = jnp.sum(stats[:, 1, :], axis=0)
    mean = s / count
    var = jnp.maximum(ssq / count - mean * mean, 0.0)   # clamp rounding noise
    a = g_row[0] * jax.lax.rsqrt(var + EPS)
    c = be_row[0] - mean * a
    return a.reshape(1, -1), c.reshape(1, -1)


@functools.partial(jax.jit, static_argnames=("mxu_dtype",))
def double_conv_forward_nhwc(x_nhwc, w1, b1, g1, be1, w2, b2, g2, be2,
                             mxu_dtype=jnp.float32):
    """x_nhwc: (N, H, W, Cin). w*: (3, 3, Cin_or_Cout, Cout) HWIO.
    b/g/be: (1, Cout). Returns (N, H, W, Cout) float32."""
    N, H, W, Cin = x_nhwc.shape
    Cout = w1.shape[-1]
    Cip = _round_up(Cin, LANE)      # lane-dense channel padding
    Cop = _round_up(Cout, LANE)

    x = jnp.pad(x_nhwc.astype(jnp.float32),
                ((0, 0), (0, 0), (0, 0), (0, Cip - Cin)))

    def pad_row(v, Cp):
        v = v.reshape(1, -1).astype(jnp.float32)
        return jnp.pad(v, ((0, 0), (0, Cp - v.shape[-1])))

    # weights reshaped to (9*Cin_p, Cout_p) to match the in-kernel im2col order
    w1p = jnp.pad(w1.astype(jnp.float32),
                  ((0, 0), (0, 0), (0, Cip - Cin), (0, Cop - Cout))
                  ).reshape(9 * Cip, Cop)
    w2p = jnp.pad(w2.astype(jnp.float32),
                  ((0, 0), (0, 0), (0, Cop - Cout), (0, Cop - Cout))
                  ).reshape(9 * Cop, Cop)
    b1p, g1p, be1p = pad_row(b1, Cop), pad_row(g1, Cop), pad_row(be1, Cop)
    b2p, g2p, be2p = pad_row(b2, Cop), pad_row(g2, Cop), pad_row(be2, Cop)

    count = N * H * W

    # block 1: conv -> ReLU (+ partial stats); its BN is folded into block 2.
    ident_a = jnp.ones((1, Cip), jnp.float32)
    ident_c = jnp.zeros((1, Cip), jnp.float32)
    h1, st1 = _conv_block(x, ident_a, ident_c, w1p, b1p, Cop, mxu_dtype)
    a1, c1 = _bn_affine_coeffs(st1, g1p, be1p, count)

    # block 2: (fused BN1 affine) -> conv -> ReLU (+ partial stats)
    h2, st2 = _conv_block(h1, a1, c1, w2p, b2p, Cop, mxu_dtype)
    a2, c2 = _bn_affine_coeffs(st2, g2p, be2p, count)

    # final BN2 as a lane-dense affine kernel, then drop channel padding.
    out = _apply_affine(h2, a2, c2)
    return out[..., :Cout]


def double_conv_forward(x_nchw, w1, b1, g1, be1, w2, b2, g2, be2,
                        mxu_dtype=jnp.float32):
    """PyTorch-layout boundary: (N, Cin, H, W) -> (N, Cout, H, W).
    Callers that already have NHWC should use double_conv_forward_nhwc and
    skip both transposes."""
    x = jnp.transpose(x_nchw, (0, 2, 3, 1))
    out = double_conv_forward_nhwc(x, w1, b1, g1, be1, w2, b2, g2, be2,
                                   mxu_dtype=mxu_dtype)
    return jnp.transpose(out, (0, 3, 1, 2))


# ---------------------------------------------------------------------------
# Pure-JAX reference (lax conv) with identical training-mode BN semantics.
# ---------------------------------------------------------------------------
def reference_forward(x_nchw, w1, b1, g1, be1, w2, b2, g2, be2):
    x = jnp.transpose(x_nchw, (0, 2, 3, 1)).astype(jnp.float32)

    def conv(x, w, b):
        y = jax.lax.conv_general_dilated(
            x, w, window_strides=(1, 1), padding="SAME",
            dimension_numbers=("NHWC", "HWIO", "NHWC"))
        return y + b.reshape(1, 1, 1, -1)

    def relu_bn(h, g, be):
        h = jnp.maximum(h, 0.0)
        mean = jnp.mean(h, axis=(0, 1, 2), keepdims=True)
        var = jnp.mean((h - mean) ** 2, axis=(0, 1, 2), keepdims=True)
        return (h - mean) * jax.lax.rsqrt(var + EPS) * g.reshape(1, 1, 1, -1) \
               + be.reshape(1, 1, 1, -1)

    h = relu_bn(conv(x, w1, b1), g1, be1)
    h = relu_bn(conv(h, w2, b2), g2, be2)
    return jnp.transpose(h, (0, 3, 1, 2))


def init_params(key, in_ch, out_ch):
    ks = jax.random.split(key, 8)
    # PyTorch Conv2d weight is (out, in, kh, kw); stored here as HWIO.
    w1 = 0.2 * jax.random.normal(ks[0], (3, 3, in_ch, out_ch), jnp.float32)
    b1 = 0.1 * jax.random.normal(ks[1], (1, out_ch), jnp.float32)
    g1 = 1.0 + 0.1 * jax.random.normal(ks[2], (1, out_ch), jnp.float32)
    be1 = 0.1 * jax.random.normal(ks[3], (1, out_ch), jnp.float32)
    w2 = 0.2 * jax.random.normal(ks[4], (3, 3, out_ch, out_ch), jnp.float32)
    b2 = 0.1 * jax.random.normal(ks[5], (1, out_ch), jnp.float32)
    g2 = 1.0 + 0.1 * jax.random.normal(ks[6], (1, out_ch), jnp.float32)
    be2 = 0.1 * jax.random.normal(ks[7], (1, out_ch), jnp.float32)
    return w1, b1, g1, be1, w2, b2, g2, be2


if __name__ == "__main__":
    key = jax.random.PRNGKey(0)
    k_x, k_p = jax.random.split(key)

    N, Cin, Cout, H, W = 2, 4, 8, 16, 16
    x = jax.random.normal(k_x, (N, Cin, H, W), jnp.float32)
    params = init_params(k_p, Cin, Cout)

    out = double_conv_forward(x, *params)   # f32 MXU operands (exact parity);
    out = jax.block_until_ready(out)        # pass mxu_dtype=jnp.bfloat16 on v6e/v7x
    assert out.shape == (N, Cout, H, W), out.shape

    ref = jax.block_until_ready(reference_forward(x, *params))
    np.testing.assert_allclose(np.asarray(out), np.asarray(ref),
                               rtol=1e-3, atol=1e-3)

    print("KERNEL_OK")
</pallas_src>

<mosaic_0001>
module attributes {stable_mosaic.version = 11 : i64} {
  func.func @affine_kernel(%arg0: i32, %arg1: memref<1x16x16x128xf32, #tpu.memory_space<vmem>>, %arg2: memref<1x128xf32, #tpu.memory_space<vmem>>, %arg3: memref<1x128xf32, #tpu.memory_space<vmem>>, %arg4: memref<1x16x16x128xf32, #tpu.memory_space<vmem>>) attributes {dimension_semantics = [#tpu.dimension_semantics<parallel>], iteration_bounds = array<i64: 2>, scalar_prefetch = 0 : i64, scratch_operands = 0 : i64, tpu.core_type = #tpu.core_type<tc>, window_params = [{transform_indices = @transform_0, window_bounds = array<i64: 1, 16, 16, 128>}, {pipeline_mode = #tpu.pipeline_mode<synchronous>, transform_indices = @transform_1, window_bounds = array<i64: 1, 128>}, {pipeline_mode = #tpu.pipeline_mode<synchronous>, transform_indices = @transform_2, window_bounds = array<i64: 1, 128>}, {transform_indices = @transform_3, window_bounds = array<i64: 1, 16, 16, 128>}]} {
    %c0 = arith.constant 0 : index
    %c0_0 = arith.constant 0 : index
    %0 = vector.load %arg2[%c0, %c0_0] : memref<1x128xf32, #tpu.memory_space<vmem>>, vector<1x128xf32>
    %1 = vector.shape_cast %0 : vector<1x128xf32> to vector<1x1x1x128xf32>
    %c0_1 = arith.constant 0 : index
    %c0_2 = arith.constant 0 : index
    %2 = vector.load %arg3[%c0_1, %c0_2] : memref<1x128xf32, #tpu.memory_space<vmem>>, vector<1x128xf32>
    %3 = vector.shape_cast %2 : vector<1x128xf32> to vector<1x1x1x128xf32>
    %c0_3 = arith.constant 0 : index
    %c0_4 = arith.constant 0 : index
    %c0_5 = arith.constant 0 : index
    %c0_6 = arith.constant 0 : index
    %4 = vector.load %arg1[%c0_3, %c0_4, %c0_5, %c0_6] : memref<1x16x16x128xf32, #tpu.memory_space<vmem>>, vector<1x16x16x128xf32>
    %5 = vector.broadcast %1 : vector<1x1x1x128xf32> to vector<1x16x16x128xf32>
    %6 = arith.mulf %4, %5 : vector<1x16x16x128xf32>
    %7 = vector.broadcast %3 : vector<1x1x1x128xf32> to vector<1x16x16x128xf32>
    %8 = arith.addf %6, %7 : vector<1x16x16x128xf32>
    %c0_7 = arith.constant 0 : index
    %c0_8 = arith.constant 0 : index
    %c0_9 = arith.constant 0 : index
    %c0_10 = arith.constant 0 : index
    %9 = vector.load %arg4[%c0_7, %c0_8, %c0_9, %c0_10] : memref<1x16x16x128xf32, #tpu.memory_space<vmem>>, vector<1x16x16x128xf32>
    tpu.vector_store %arg4[%c0_7, %c0_8, %c0_9, %c0_10], %8 {strides = array<i32>} : memref<1x16x16x128xf32, #tpu.memory_space<vmem>>, vector<1x16x16x128xf32>,
    return
  }
  func.func @transform_0(%arg0: i32) -> (i32, i32, i32, i32) {
    %c0_i32 = arith.constant 0 : i32
    %c0_i32_0 = arith.constant 0 : i32
    %c0_i32_1 = arith.constant 0 : i32
    %c0_i32_2 = arith.constant 0 : i32
    return %arg0, %c0_i32, %c0_i32_0, %c0_i32_1 : i32, i32, i32, i32
  }
  func.func @transform_1(%arg0: i32) -> (i32, i32) {
    %c0_i32 = arith.constant 0 : i32
    %c0_i32_0 = arith.constant 0 : i32
    %c0_i32_1 = arith.constant 0 : i32
    return %c0_i32, %c0_i32_0 : i32, i32
  }
  func.func @transform_2(%arg0: i32) -> (i32, i32) {
    %c0_i32 = arith.constant 0 : i32
    %c0_i32_0 = arith.constant 0 : i32
    %c0_i32_1 = arith.constant 0 : i32
    return %c0_i32, %c0_i32_0 : i32, i32
  }
  func.func @transform_3(%arg0: i32) -> (i32, i32, i32, i32) {
    %c0_i32 = arith.constant 0 : i32
    %c0_i32_0 = arith.constant 0 : i32
    %c0_i32_1 = arith.constant 0 : i32
    %c0_i32_2 = arith.constant 0 : i32
    return %arg0, %c0_i32, %c0_i32_0, %c0_i32_1 : i32, i32, i32, i32
  }
}

module attributes {stable_mosaic.version = 11 : i64} {
  func.func @conv_block_kernel(%arg0: i32, %arg1: memref<1x16x16x128xf32, #tpu.memory_space<vmem>>, %arg2: memref<1x128xf32, #tpu.memory_space<vmem>>, %arg3: memref<1x128xf32, #tpu.memory_space<vmem>>, %arg4: memref<1152x128xf32, #tpu.memory_space<vmem>>, %arg5: memref<1x128xf32, #tpu.memory_space<vmem>>, %arg6: memref<1x16x16x128xf32, #tpu.memory_space<vmem>>, %arg7: memref<1x8x128xf32, #tpu.memory_space<vmem>>, %arg8: memref<18x18x128xf32, #tpu.memory_space<vmem>>) attributes {dimension_semantics = [#tpu.dimension_semantics<parallel>], iteration_bounds = array<i64: 2>, scalar_prefetch = 0 : i64, scratch_operands = 1 : i64, tpu.core_type = #tpu.core_type<tc>, window_params = [{transform_indices = @transform_0, window_bounds = array<i64: 1, 16, 16, 128>}, {pipeline_mode = #tpu.pipeline_mode<synchronous>, transform_indices = @transform_1, window_bounds = array<i64: 1, 128>}, {pipeline_mode = #tpu.pipeline_mode<synchronous>, transform_indices = @transform_2, window_bounds = array<i64: 1, 128>}, {pipeline_mode = #tpu.pipeline_mode<synchronous>, transform_indices = @transform_3, window_bounds = array<i64: 1152, 128>}, {pipeline_mode = #tpu.pipeline_mode<synchronous>, transform_indices = @transform_4, window_bounds = array<i64: 1, 128>}, {transform_indices = @transform_5, window_bounds = array<i64: 1, 16, 16, 128>}, {transform_indices = @transform_6, window_bounds = array<i64: 1, 8, 128>}]} {
    %cst = arith.constant 0.000000e+00 : f32
    %0 = vector.broadcast %cst : f32 to vector<1x18x128xf32>
    %c0 = arith.constant 0 : index
    %c0_0 = arith.constant 0 : index
    %c0_1 = arith.constant 0 : index
    %1 = vector.load %arg8[%c0, %c0_0, %c0_1] : memref<18x18x128xf32, #tpu.memory_space<vmem>>, vector<1x18x128xf32>
    tpu.vector_store %arg8[%c0, %c0_0, %c0_1], %0 {strides = array<i32>} : memref<18x18x128xf32, #tpu.memory_space<vmem>>, vector<1x18x128xf32>,
    %cst_2 = arith.constant 0.000000e+00 : f32
    %2 = vector.broadcast %cst_2 : f32 to vector<1x18x128xf32>
    %c17 = arith.constant 17 : index
    %c0_3 = arith.constant 0 : index
    %c0_4 = arith.constant 0 : index
    %3 = vector.load %arg8[%c17, %c0_3, %c0_4] : memref<18x18x128xf32, #tpu.memory_space<vmem>>, vector<1x18x128xf32>
    tpu.vector_store %arg8[%c17, %c0_3, %c0_4], %2 {strides = array<i32>} : memref<18x18x128xf32, #tpu.memory_space<vmem>>, vector<1x18x128xf32>,
    %cst_5 = arith.constant 0.000000e+00 : f32
    %4 = vector.broadcast %cst_5 : f32 to vector<18x1x128xf32>
    %c0_6 = arith.constant 0 : index
    %c0_7 = arith.constant 0 : index
    %c0_8 = arith.constant 0 : index
    %5 = vector.load %arg8[%c0_6, %c0_7, %c0_8] : memref<18x18x128xf32, #tpu.memory_space<vmem>>, vector<18x1x128xf32>
    tpu.vector_store %arg8[%c0_6, %c0_7, %c0_8], %4 {strides = array<i32>} : memref<18x18x128xf32, #tpu.memory_space<vmem>>, vector<18x1x128xf32>,
    %cst_9 = arith.constant 0.000000e+00 : f32
    %6 = vector.broadcast %cst_9 : f32 to vector<18x1x128xf32>
    %c0_10 = arith.constant 0 : index
    %c17_11 = arith.constant 17 : index
    %c0_12 = arith.constant 0 : index
    %7 = vector.load %arg8[%c0_10, %c17_11, %c0_12] : memref<18x18x128xf32, #tpu.memory_space<vmem>>, vector<18x1x128xf32>
    tpu.vector_store %arg8[%c0_10, %c17_11, %c0_12], %6 {strides = array<i32>} : memref<18x18x128xf32, #tpu.memory_space<vmem>>, vector<18x1x128xf32>,
    %c0_13 = arith.constant 0 : index
    %c0_14 = arith.constant 0 : index
    %8 = vector.load %arg2[%c0_13, %c0_14] : memref<1x128xf32, #tpu.memory_space<vmem>>, vector<1x128xf32>
    %9 = vector.shape_cast %8 : vector<1x128xf32> to vector<1x1x128xf32>
    %c0_15 = arith.constant 0 : index
    %c0_16 = arith.constant 0 : index
    %10 = vector.load %arg3[%c0_15, %c0_16] : memref<1x128xf32, #tpu.memory_space<vmem>>, vector<1x128xf32>
    %11 = vector.shape_cast %10 : vector<1x128xf32> to vector<1x1x128xf32>
    %c0_17 = arith.constant 0 : index
    %c0_18 = arith.constant 0 : index
    %c0_19 = arith.constant 0 : index
    %c0_20 = arith.constant 0 : index
    %12 = vector.load %arg1[%c0_17, %c0_18, %c0_19, %c0_20] : memref<1x16x16x128xf32, #tpu.memory_space<vmem>>, vector<1x16x16x128xf32>
    %13 = vector.shape_cast %12 : vector<1x16x16x128xf32> to vector<16x16x128xf32>
    %14 = vector.broadcast %9 : vector<1x1x128xf32> to vector<16x16x128xf32>
    %15 = arith.mulf %13, %14 : vector<16x16x128xf32>
    %16 = vector.broadcast %11 : vector<1x1x128xf32> to vector<16x16x128xf32>
    %17 = arith.addf %15, %16 : vector<16x16x128xf32>
    %c1 = arith.constant 1 : index
    %c1_21 = arith.constant 1 : index
    %c0_22 = arith.constant 0 : index
    %18 = vector.load %arg8[%c1, %c1_21, %c0_22] : memref<18x18x128xf32, #tpu.memory_space<vmem>>, vector<16x16x128xf32>
    tpu.vector_store %arg8[%c1, %c1_21, %c0_22], %17 {strides = array<i32>} : memref<18x18x128xf32, #tpu.memory_space<vmem>>, vector<16x16x128xf32>,
    %c0_23 = arith.constant 0 : index
    %c0_24 = arith.constant 0 : index
    %c0_25 = arith.constant 0 : index
    %19 = vector.load %arg8[%c0_23, %c0_24, %c0_25] : memref<18x18x128xf32, #tpu.memory_space<vmem>>, vector<18x18x128xf32>
    %20 = vector.extract_strided_slice %19 {offsets = [0, 0, 0], sizes = [16, 16, 128], strides = [1, 1, 1]} : vector<18x18x128xf32> to vector<16x16x128xf32>
    %21 = vector.shape_cast %20 : vector<16x16x128xf32> to vector<256x128xf32>
    %22 = vector.extract_strided_slice %19 {offsets = [0, 1, 0], sizes = [16, 16, 128], strides = [1, 1, 1]} : vector<18x18x128xf32> to vector<16x16x128xf32>
    %23 = vector.shape_cast %22 : vector<16x16x128xf32> to vector<256x128xf32>
    %24 = vector.extract_strided_slice %19 {offsets = [0, 2, 0], sizes = [16, 16, 128], strides = [1, 1, 1]} : vector<18x18x128xf32> to vector<16x16x128xf32>
    %25 = vector.shape_cast %24 : vector<16x16x128xf32> to vector<256x128xf32>
    %26 = vector.extract_strided_slice %19 {offsets = [1, 0, 0], sizes = [16, 16, 128], strides = [1, 1, 1]} : vector<18x18x128xf32> to vector<16x16x128xf32>
    %27 = vector.shape_cast %26 : vector<16x16x128xf32> to vector<256x128xf32>
    %28 = vector.extract_strided_slice %19 {offsets = [1, 1, 0], sizes = [16, 16, 128], strides = [1, 1, 1]} : vector<18x18x128xf32> to vector<16x16x128xf32>
    %29 = vector.shape_cast %28 : vector<16x16x128xf32> to vector<256x128xf32>
    %30 = vector.extract_strided_slice %19 {offsets = [1, 2, 0], sizes = [16, 16, 128], strides = [1, 1, 1]} : vector<18x18x128xf32> to vector<16x16x128xf32>
    %31 = vector.shape_cast %30 : vector<16x16x128xf32> to vector<256x128xf32>
    %32 = vector.extract_strided_slice %19 {offsets = [2, 0, 0], sizes = [16, 16, 128], strides = [1, 1, 1]} : vector<18x18x128xf32> to vector<16x16x128xf32>
    %33 = vector.shape_cast %32 : vector<16x16x128xf32> to vector<256x128xf32>
    %34 = vector.extract_strided_slice %19 {offsets = [2, 1, 0], sizes = [16, 16, 128], strides = [1, 1, 1]} : vector<18x18x128xf32> to vector<16x16x128xf32>
    %35 = vector.shape_cast %34 : vector<16x16x128xf32> to vector<256x128xf32>
    %36 = vector.extract_strided_slice %19 {offsets = [2, 2, 0], sizes = [16, 16, 128], strides = [1, 1, 1]} : vector<18x18x128xf32> to vector<16x16x128xf32>
    %37 = vector.shape_cast %36 : vector<16x16x128xf32> to vector<256x128xf32>
    %38 = tpu.concatenate %21, %23, %25, %27, %29, %31, %33, %35, %37 in 1 : vector<256x128xf32>, vector<256x128xf32>, vector<256x128xf32>, vector<256x128xf32>, vector<256x128xf32>, vector<256x128xf32>, vector<256x128xf32>, vector<256x128xf32>, vector<256x128xf32> -> vector<256x1152xf32>
    %c0_26 = arith.constant 0 : index
    %c0_27 = arith.constant 0 : index
    %39 = vector.load %arg4[%c0_26, %c0_27] : memref<1152x128xf32, #tpu.memory_space<vmem>>, vector<1152x128xf32>
    %cst_28 = arith.constant dense<0.000000e+00> : vector<256x128xf32>
    %40 = tpu.matmul %38, %39, %cst_28 {dimension_numbers = #tpu.dot_dimension_numbers<[1], [0], [0], [1], [0, 0, 1, 1], [], []>} : vector<256x1152xf32>, vector<1152x128xf32>, vector<256x128xf32> -> vector<256x128xf32>
    %c0_29 = arith.constant 0 : index
    %c0_30 = arith.constant 0 : index
    %41 = vector.load %arg5[%c0_29, %c0_30] : memref<1x128xf32, #tpu.memory_space<vmem>>, vector<1x128xf32>
    %42 = vector.broadcast %41 : vector<1x128xf32> to vector<256x128xf32>
    %43 = arith.addf %40, %42 : vector<256x128xf32>
    %cst_31 = arith.constant 0.000000e+00 : f32
    %44 = vector.broadcast %cst_31 : f32 to vector<256x128xf32>
    %45 = arith.maximumf %43, %44 : vector<256x128xf32>
    %cst_32 = arith.constant dense<0.000000e+00> : vector<128xf32>
    %46 = vector.multi_reduction <add>, %45, %cst_32 [0] : vector<256x128xf32> to vector<128xf32>
    %47 = vector.shape_cast %46 : vector<128xf32> to vector<1x128xf32>
    %48 = arith.mulf %45, %45 : vector<256x128xf32>
    %cst_33 = arith.constant dense<0.000000e+00> : vector<128xf32>
    %49 = vector.multi_reduction <add>, %48, %cst_33 [0] : vector<256x128xf32> to vector<128xf32>
    %50 = vector.shape_cast %49 : vector<128xf32> to vector<1x128xf32>
    %cst_34 = arith.constant 0.000000e+00 : f32
    %51 = vector.broadcast %cst_34 : f32 to vector<6x128xf32>
    %52 = tpu.concatenate %47, %50, %51 in 0 : vector<1x128xf32>, vector<1x128xf32>, vector<6x128xf32> -> vector<8x128xf32>
    %53 = vector.shape_cast %52 : vector<8x128xf32> to vector<1x8x128xf32>
    %c0_35 = arith.constant 0 : index
    %c0_36 = arith.constant 0 : index
    %c0_37 = arith.constant 0 : index
    %54 = vector.load %arg7[%c0_35, %c0_36, %c0_37] : memref<1x8x128xf32, #tpu.memory_space<vmem>>, vector<1x8x128xf32>
    tpu.vector_store %arg7[%c0_35, %c0_36, %c0_37], %53 {strides = array<i32>} : memref<1x8x128xf32, #tpu.memory_space<vmem>>, vector<1x8x128xf32>,
    %55 = vector.shape_cast %45 : vector<256x128xf32> to vector<1x16x16x128xf32>
    %c0_38 = arith.constant 0 : index
    %c0_39 = arith.constant 0 : index
    %c0_40 = arith.constant 0 : index
    %c0_41 = arith.constant 0 : index
    %56 = vector.load %arg6[%c0_38, %c0_39, %c0_40, %c0_41] : memref<1x16x16x128xf32, #tpu.memory_space<vmem>>, vector<1x16x16x128xf32>
    tpu.vector_store %arg6[%c0_38, %c0_39, %c0_40, %c0_41], %55 {strides = array<i32>} : memref<1x16x16x128xf32, #tpu.memory_space<vmem>>, vector<1x16x16x128xf32>,
    return
  }
  func.func @transform_0(%arg0: i32) -> (i32, i32, i32, i32) {
    %c0_i32 = arith.constant 0 : i32
    %c0_i32_0 = arith.constant 0 : i32
    %c0_i32_1 = arith.constant 0 : i32
    %c0_i32_2 = arith.constant 0 : i32
    return %arg0, %c0_i32, %c0_i32_0, %c0_i32_1 : i32, i32, i32, i32
  }
  func.func @transform_1(%arg0: i32) -> (i32, i32) {
    %c0_i32 = arith.constant 0 : i32
    %c0_i32_0 = arith.constant 0 : i32
    %c0_i32_1 = arith.constant 0 : i32
    return %c0_i32, %c0_i32_0 : i32, i32
  }
  func.func @transform_2(%arg0: i32) -> (i32, i32) {
    %c0_i32 = arith.constant 0 : i32
    %c0_i32_0 = arith.constant 0 : i32
    %c0_i32_1 = arith.constant 0 : i32
    return %c0_i32, %c0_i32_0 : i32, i32
  }
  func.func @transform_3(%arg0: i32) -> (i32, i32) {
    %c0_i32 = arith.constant 0 : i32
    %c0_i32_0 = arith.constant 0 : i32
    %c0_i32_1 = arith.constant 0 : i32
    return %c0_i32, %c0_i32_0 : i32, i32
  }
  func.func @transform_4(%arg0: i32) -> (i32, i32) {
    %c0_i32 = arith.constant 0 : i32
    %c0_i32_0 = arith.constant 0 : i32
    %c0_i32_1 = arith.constant 0 : i32
    return %c0_i32, %c0_i32_0 : i32, i32
  }
  func.func @transform_5(%arg0: i32) -> (i32, i32, i32, i32) {
    %c0_i32 = arith.constant 0 : i32
    %c0_i32_0 = arith.constant 0 : i32
    %c0_i32_1 = arith.constant 0 : i32
    %c0_i32_2 = arith.constant 0 : i32
    return %arg0, %c0_i32, %c0_i32_0, %c0_i32_1 : i32, i32, i32, i32
  }
  func.func @transform_6(%arg0: i32) -> (i32, i32, i32) {
    %c0_i32 = arith.constant 0 : i32
    %c0_i32_0 = arith.constant 0 : i32
    %c0_i32_1 = arith.constant 0 : i32
    return %arg0, %c0_i32, %c0_i32_0 : i32, i32, i32
  }
}

</mosaic_0001>

<bundles_post_ra>
// kernel: double_conv_forward_nhwc.5
= control target key start
LH: loop header
LB: loop body
LE: loop exit
PB: predicated region body
PF: predicated region fallthrough
CT: control target
= control target key end

     0   :  { %s419_s12 = smov 0   ;;  %s578_s0 = inlined_call_operand.vmem [shape: f32[2,16,16,128], index: 0, kind: input, shape index: {}]   ;;  %s579_s1 = inlined_call_operand.vmem [shape: f32[1,128], index: 1, kind: input, shape index: {}]   ;;  %s580_s2 = inlined_call_operand.vmem [shape: f32[1,128], index: 2, kind: input, shape index: {}]   ;;  %s581_s3 = inlined_call_operand.vmem [shape: f32[2,16,16,128], index: 3, kind: output, shape index: {}]  }
   0x1 LB: > { %s368_s13 = sadd.s32 4294967295, %s397_s12   ;;  %p372_p0 = scmp.ge.s32.totalorder %s397_s12, 1  ;;  %s397_s12 = sphi %s419_s12, %s13_s12  }
   0x2   : > { %p137_p1 = scmp.lt.s32.totalorder %s397_s12, 3 }
   0x4   : > { %p138_p2 = pnand %p372_p0, %p137_p1 }
   0x5   : > { %p161_p3 = scmp.lt.s32.totalorder (!%p138_p2), %s368_s13, 1  ;;  %v430_v0 = vld [vmem:[%s579_s1] ss:$0 sm:$0xff] (!%p138_p2) }
   0x6   : > { %141 = sbr.rel (%p138_p2) target bundleno = 40 (0x28), region = 32  ;;  %v440_v1 = vld [vmem:[%s580_s2] ss:$0 sm:$0xff] (!%p138_p2) }
   0xd   : > { %s583_s13 = smov (!%p161_p3, %s368_s13), 1 }
   0xe   : > { %s381_s14 = sshll.u32 %s583_s13, 8 }
   0xf   : > { %s435_s19 = scalar_lea.vmem %s578_s0, %s381_s14  ;;  %s454_s24 = scalar_lea.vmem %s581_s3, %s381_s14 }
  0x10   : > { %v173_v2 = vld [vmem:[%s435_s19] sm:$0xff]  ;;  %v174_v3 = vld [vmem:[%s435_s19 + $0x8] sm:$0xff]  ;;  %v175_v4 = vld [vmem:[%s435_s19 + $0x10] sm:$0xff] }
  0x11   : > { %v211_v5 = vmul.f32 %v430_v0, %v173_v2  ;;  %v212_v6 = vmul.f32 %v430_v0, %v174_v3  ;;  %v213_v7 = vmul.f32 %v430_v0, %v175_v4  ;;  %v176_v8 = vld [vmem:[%s435_s19 + $0x18] sm:$0xff]  ;;  %v177_v9 = vld [vmem:[%s435_s19 + $0x20] sm:$0xff]  ;;  %v178_v10 = vld [vmem:[%s435_s19 + $0x28] sm:$0xff] }
  0x12   : > { %v214_v11 = vmul.f32 %v430_v0, %v176_v8  ;;  %v215_v12 = vmul.f32 %v430_v0, %v177_v9  ;;  %v216_v13 = vmul.f32 %v430_v0, %v178_v10  ;;  %v179_v14 = vld [vmem:[%s435_s19 + $0x30] sm:$0xff]  ;;  %v180_v15 = vld [vmem:[%s435_s19 + $0x38] sm:$0xff]  ;;  %v181_v16 = vld [vmem:[%s435_s19 + $0x40] sm:$0xff] }
  0x13   : > { %v249_v17 = vadd.f32 %v440_v1, %v211_v5  ;;  %v250_v18 = vadd.f32 %v440_v1, %v212_v6  ;;  %v251_v19 = vadd.f32 %v440_v1, %v213_v7  ;;  %v217_v20 = vmul.f32 %v430_v0, %v179_v14  ;;  %v182_v21 = vld [vmem:[%s435_s19 + $0x48] sm:$0xff]  ;;  %v183_v22 = vld [vmem:[%s435_s19 + $0x50] sm:$0xff]  ;;  %v184_v23 = vld [vmem:[%s435_s19 + $0x58] sm:$0xff] }
  0x14   : > { %v252_v24 = vadd.f32 %v440_v1, %v214_v11  ;;  %v253_v25 = vadd.f32 %v440_v1, %v215_v12  ;;  %v254_v26 = vadd.f32 %v440_v1, %v216_v13  ;;  %v218_v27 = vmul.f32 %v430_v0, %v180_v15  ;;  %v185_v28 = vld [vmem:[%s435_s19 + $0x60] sm:$0xff]  ;;  %v186_v29 = vld [vmem:[%s435_s19 + $0x68] sm:$0xff]  ;;  %v187_v30 = vld [vmem:[%s435_s19 + $0x70] sm:$0xff] }
  0x15   : > { %281 = vst [vmem:[%s454_s24] sm:$0xff] %v249_v17  ;;  %282 = vst [vmem:[%s454_s24 + $0x8] sm:$0xff] %v250_v18  ;;  %v255_v31 = vadd.f32 %v440_v1, %v217_v20  ;;  %v219_v32 = vmul.f32 %v430_v0, %v181_v16  ;;  %v220_v33 = vmul.f32 %v430_v0, %v182_v21  ;;  %v188_v35 = vld [vmem:[%s435_s19 + $0x78] sm:$0xff]  ;;  %v189_v40 = vld [vmem:[%s435_s19 + $0x80] sm:$0xff] }
  0x16   : > { %283 = vst [vmem:[%s454_s24 + $0x10] sm:$0xff] %v251_v19  ;;  %v221_v34 = vmul.f32 %v430_v0, %v183_v22  ;;  %284 = vst [vmem:[%s454_s24 + $0x18] sm:$0xff] %v252_v24  ;;  %v256_v36 = vadd.f32 %v440_v1, %v218_v27  ;;  %v222_v37 = vmul.f32 %v430_v0, %v184_v23  ;;  %v190_v41 = vld [vmem:[%s435_s19 + $0x88] sm:$0xff]  ;;  %v191_v42 = vld [vmem:[%s435_s19 + $0x90] sm:$0xff] }
  0x17   : > { %285 = vst [vmem:[%s454_s24 + $0x20] sm:$0xff] %v253_v25  ;;  %286 = vst [vmem:[%s454_s24 + $0x28] sm:$0xff] %v254_v26  ;;  %v223_v38 = vmul.f32 %v430_v0, %v185_v28  ;;  %v224_v39 = vmul.f32 %v430_v0, %v186_v29  ;;  %v257_v43 = vadd.f32 %v440_v1, %v219_v32  ;;  %v192_v47 = vld [vmem:[%s435_s19 + $0x98] sm:$0xff]  ;;  %v193_v48 = vld [vmem:[%s435_s19 + $0xa0] sm:$0xff] }
  0x18   : > { %287 = vst [vmem:[%s454_s24 + $0x30] sm:$0xff] %v255_v31  ;;  %v258_v44 = vadd.f32 %v440_v1, %v220_v33  ;;  %v259_v45 = vadd.f32 %v440_v1, %v221_v34  ;;  %v225_v46 = vmul.f32 %v430_v0, %v187_v30  ;;  %v194_v49 = vld [vmem:[%s435_s19 + $0xa8] sm:$0xff]  ;;  %288 = vst [vmem:[%s454_s24 + $0x38] sm:$0xff] %v256_v36  ;;  %v195_v54 = vld [vmem:[%s435_s19 + $0xb0] sm:$0xff] }
  0x19   : > { %v260_v50 = vadd.f32 %v440_v1, %v222_v37  ;;  %v261_v51 = vadd.f32 %v440_v1, %v223_v38  ;;  %v262_v52 = vadd.f32 %v440_v1, %v224_v39  ;;  %v226_v53 = vmul.f32 %v430_v0, %v188_v35  ;;  %289 = vst [vmem:[%s454_s24 + $0x40] sm:$0xff] %v257_v43  ;;  %v196_v59 = vld [vmem:[%s435_s19 + $0xb8] sm:$0xff]  ;;  %v197_v2 = vld [vmem:[%s435_s19 + $0xc0] sm:$0xff]  ;;  %v198_v3 = vld [vmem:[%s435_s19 + $0xc8] sm:$0xff] }
  0x1a   : > { %290 = vst [vmem:[%s454_s24 + $0x48] sm:$0xff] %v258_v44  ;;  %291 = vst [vmem:[%s454_s24 + $0x50] sm:$0xff] %v259_v45  ;;  %v263_v55 = vadd.f32 %v440_v1, %v225_v46  ;;  %v227_v56 = vmul.f32 %v430_v0, %v189_v40  ;;  %v228_v57 = vmul.f32 %v430_v0, %v190_v41  ;;  %v199_v4 = vld [vmem:[%s435_s19 + $0xd0] sm:$0xff]  ;;  %v200_v9 = vld [vmem:[%s435_s19 + $0xd8] sm:$0xff] }
  0x1b   : > { %v229_v58 = vmul.f32 %v430_v0, %v191_v42  ;;  %292 = vst [vmem:[%s454_s24 + $0x58] sm:$0xff] %v260_v50  ;;  %293 = vst [vmem:[%s454_s24 + $0x60] sm:$0xff] %v261_v51  ;;  %v264_v60 = vadd.f32 %v440_v1, %v226_v53  ;;  %v230_v61 = vmul.f32 %v430_v0, %v192_v47  ;;  %v201_v10 = vld [vmem:[%s435_s19 + $0xe0] sm:$0xff]  ;;  %v202_v11 = vld [vmem:[%s435_s19 + $0xe8] sm:$0xff] }
  0x1c   : > { %294 = vst [vmem:[%s454_s24 + $0x68] sm:$0xff] %v262_v52  ;;  %v231_v62 = vmul.f32 %v430_v0, %v193_v48  ;;  %v232_v63 = vmul.f32 %v430_v0, %v194_v49  ;;  %295 = vst [vmem:[%s454_s24 + $0x70] sm:$0xff] %v263_v55  ;;  %v265_v5 = vadd.f32 %v440_v1, %v227_v56  ;;  %v203_v16 = vld [vmem:[%s435_s19 + $0xf0] sm:$0xff]  ;;  %v204_v21 = vld [vmem:[%s435_s19 + $0xf8] sm:$0xff] }
  0x1d   : > { %v266_v6 = vadd.f32 %v440_v1, %v228_v57  ;;  %v267_v7 = vadd.f32 %v440_v1, %v229_v58  ;;  %v233_v8 = vmul.f32 %v430_v0, %v195_v54  ;;  %296 = vst [vmem:[%s454_s24 + $0x78] sm:$0xff] %v264_v60  ;;  %v268_v12 = vadd.f32 %v440_v1, %v230_v61 }
  0x1e   : > { %v269_v13 = vadd.f32 %v440_v1, %v231_v62  ;;  %v270_v14 = vadd.f32 %v440_v1, %v232_v63  ;;  %v234_v15 = vmul.f32 %v430_v0, %v196_v59  ;;  %297 = vst [vmem:[%s454_s24 + $0x80] sm:$0xff] %v265_v5  ;;  %v235_v18 = vmul.f32 %v430_v0, %v197_v2 }
  0x1f   : > { %298 = vst [vmem:[%s454_s24 + $0x88] sm:$0xff] %v266_v6  ;;  %299 = vst [vmem:[%s454_s24 + $0x90] sm:$0xff] %v267_v7  ;;  %v271_v17 = vadd.f32 %v440_v1, %v233_v8  ;;  %v236_v19 = vmul.f32 %v430_v0, %v198_v3  ;;  %v237_v20 = vmul.f32 %v430_v0, %v199_v4 }
  0x20   : > { %300 = vst [vmem:[%s454_s24 + $0x98] sm:$0xff] %v268_v12  ;;  %301 = vst [vmem:[%s454_s24 + $0xa0] sm:$0xff] %v269_v13  ;;  %v272_v22 = vadd.f32 %v440_v1, %v234_v15  ;;  %v238_v23 = vmul.f32 %v430_v0, %v200_v9  ;;  %v239_v24 = vmul.f32 %v430_v0, %v201_v10 }
  0x21   : > { %302 = vst [vmem:[%s454_s24 + $0xa8] sm:$0xff] %v270_v14  ;;  %v240_v25 = vmul.f32 %v430_v0, %v202_v11  ;;  %303 = vst [vmem:[%s454_s24 + $0xb0] sm:$0xff] %v271_v17  ;;  %v273_v26 = vadd.f32 %v440_v1, %v235_v18  ;;  %v274_v27 = vadd.f32 %v440_v1, %v236_v19 }
  0x22   : > { %v275_v28 = vadd.f32 %v440_v1, %v237_v20  ;;  %v241_v29 = vmul.f32 %v430_v0, %v203_v16  ;;  %304 = vst [vmem:[%s454_s24 + $0xb8] sm:$0xff] %v272_v22  ;;  %v276_v30 = vadd.f32 %v440_v1, %v238_v23  ;;  %v277_v31 = vadd.f32 %v440_v1, %v239_v24 }
  0x23   : > { %v278_v32 = vadd.f32 %v440_v1, %v240_v25  ;;  %v242_v33 = vmul.f32 %v430_v0, %v204_v21  ;;  %305 = vst [vmem:[%s454_s24 + $0xc0] sm:$0xff] %v273_v26  ;;  %306 = vst [vmem:[%s454_s24 + $0xc8] sm:$0xff] %v274_v27 }
  0x24   : > { %307 = vst [vmem:[%s454_s24 + $0xd0] sm:$0xff] %v275_v28  ;;  %v279_v34 = vadd.f32 %v440_v1, %v241_v29  ;;  %308 = vst [vmem:[%s454_s24 + $0xd8] sm:$0xff] %v276_v30 }
  0x25   : > { %309 = vst [vmem:[%s454_s24 + $0xe0] sm:$0xff] %v277_v31  ;;  %310 = vst [vmem:[%s454_s24 + $0xe8] sm:$0xff] %v278_v32  ;;  %v280_v35 = vadd.f32 %v440_v1, %v242_v33 }
  0x26   : > { %311 = vst [vmem:[%s454_s24 + $0xf0] sm:$0xff] %v279_v34 }
  0x27   : > { %312 = vst [vmem:[%s454_s24 + $0xf8] sm:$0xff] %v280_v35 }
  0x28 PF: > { %s13_s12 = sadd.s32 1, %s397_s12  }
  0x29   : > { %p10_p4 = scmp.ge.s32.totalorder %s13_s12, 4  }
  0x2b   :  { %12 = sbr.rel (!%p10_p4) target bundleno = 1 (0x1), region = 62 }

// kernel: double_conv_forward_nhwc.3
= control target key start
LH: loop header
LB: loop body
LE: loop exit
PB: predicated region body
PF: predicated region fallthrough
CT: control target
= control target key end

     0   :  { %s2981_s21 = smov 0   ;;  %s4812_s0 = inlined_call_operand.vmem [shape: f32[2,16,16,128], index: 0, kind: input, shape index: {}]   ;;  %s4813_s1 = inlined_call_operand.vmem [shape: f32[1,128], index: 1, kind: input, shape index: {}]   ;;  %s4814_s2 = inlined_call_operand.vmem [shape: f32[1,128], index: 2, kind: input, shape index: {}]   ;;  %s4815_s3 = inlined_call_operand.vmem [shape: f32[1152,128], index: 3, kind: input, shape index: {}]   ;;  %s4816_s4 = inlined_call_operand.vmem [shape: f32[1,128], index: 4, kind: input, shape index: {}]   ;;  %s4817_s5 = inlined_call_operand.vmem [shape: f32[2,16,16,128], index: 5, kind: output, shape index: {0}]   ;;  %s4818_s6 = inlined_call_operand.vmem [shape: f32[2,8,128], index: 6, kind: output, shape index: {1}]  }
   0x1 LB: > { %s2348_s22 = sadd.s32 4294967295, %s2942_s21   ;;  %p2352_p0 = scmp.ge.s32.totalorder %s2942_s21, 1  ;;  %s2942_s21 = sphi %s2981_s21, %s17_s21  }
   0x2   : > { %p215_p1 = scmp.lt.s32.totalorder %s2942_s21, 3 }
   0x4   : > { %p216_p2 = pnand %p2352_p0, %p215_p1 }
   0x6   : > { %219 = sbr.rel (%p216_p2) target bundleno = 649 (0x289), region = 40 }
   0xd   : > { %v811_v0 = vld [vmem:[%s4815_s3] sm:$0xff]  ;;  %v812_v1 = vld [vmem:[%s4815_s3 + $0x8] sm:$0xff]  ;;  %v4819_v3 = vmov 0.0|0.0   ;;  %v813_v6 = vld [vmem:[%s4815_s3 + $0x10] sm:$0xff]  ;;  %v2945_v8 = vmov 0.0   ;;  %p249_p3 = scmp.lt.s32.totalorder %s2348_s22, 1 }
   0xe   : > { %v843_v2 = vld [vmem:[%s4815_s3 + $0x100] sm:$0xff]  ;;  %2493 = vmatprep.subr.bf16.mxu1 %v4819_v3  ;;  %2541 = vmatprep.subr.bf16.mxu0 %v4819_v3  ;;  %v2494_v4 = vpack.c.bf16 %v812_v1, %v811_v0  ;;  %v844_v5 = vld [vmem:[%s4815_s3 + $0x108] sm:$0xff]  ;;  %v814_v7 = vld [vmem:[%s4815_s3 + $0x18] sm:$0xff]  ;;  %263 = vst [vmem:[#allocation2] sm:$0xff] %v2945_v8  ;;  %v3137_v41 = vrot.slane %v2945_v8, 1  ;;  %vm551_vm0 = vcmask 1046528  }
   0xf   : > { %264 = vst [vmem:[#allocation2 + $0x8] sm:$0xff] %v2945_v8  ;;  %265 = vst [vmem:[#allocation2 + $0x10] sm:$0x3] %v2945_v8  ;;  %v2542_v9 = vpack.c.bf16 %v844_v5, %v843_v2  ;;  %v845_v10 = vld [vmem:[%s4815_s3 + $0x110] sm:$0xff]  ;;  %v846_v11 = vld [vmem:[%s4815_s3 + $0x118] sm:$0xff]  ;;  %v2497_v12 = vpack.c.bf16 %v814_v7, %v813_v6  ;;  %s4977_s22 = smov (!%p249_p3, %s2348_s22), 1 }
  0x10   : > { %267 = vst [vmem:[#allocation2 + $0x198] sm:$0xff] %v2945_v8  ;;  %269 = vst [vmem:[#allocation2 + $0x1a8] sm:$0x3] %v2945_v8  ;;  %2495 = vmatpush1.bf16.msra.mxu1 %v2494_v4  ;;  %v2545_v13 = vpack.c.bf16 %v846_v11, %v845_v10  ;;  %v815_v14 = vld [vmem:[%s4815_s3 + $0x20] sm:$0xff]  ;;  %v816_v15 = vld [vmem:[%s4815_s3 + $0x28] sm:$0xff]  ;;  %s2363_s23 = sshll.u32 %s4977_s22, 8 }
  0x11   : > { %271 = vst [vmem:[#allocation2 + $0x18] sm:$0x1] %v2945_v8  ;;  %272 = vst [vmem:[#allocation2 + $0x30] sm:$0x1] %v2945_v8  ;;  %2543 = vmatpush1.bf16.msra.mxu0 %v2542_v9  ;;  %2496 = vmatprep.subr.bf16.mxu1 %v4819_v3  ;;  %v847_v16 = vld [vmem:[%s4815_s3 + $0x120] sm:$0xff]  ;;  %v848_v17 = vld [vmem:[%s4815_s3 + $0x128] sm:$0xff]  ;;  %v2500_v18 = vpack.c.bf16 %v816_v15, %v815_v14  ;;  %s3124_s30 = scalar_lea.vmem %s4812_s0, %s2363_s23  ;;  %s4562_s9 = scalar_lea.vmem %s4817_s5, %s2363_s23 }
  0x12   : > { %273 = vst [vmem:[#allocation2 + $0x48] sm:$0x1] %v2945_v8  ;;  %274 = vst [vmem:[#allocation2 + $0x60] sm:$0x1] %v2945_v8  ;;  %2544 = vmatprep.subr.bf16.mxu0 %v4819_v3  ;;  %v2548_v19 = vpack.c.bf16 %v848_v17, %v847_v16  ;;  %v817_v20 = vld [vmem:[%s4815_s3 + $0x30] sm:$0xff]  ;;  %v818_v21 = vld [vmem:[%s4815_s3 + $0x38] sm:$0xff] }
  0x13   : > { %275 = vst [vmem:[#allocation2 + $0x78] sm:$0x1] %v2945_v8  ;;  %276 = vst [vmem:[#allocation2 + $0x90] sm:$0x1] %v2945_v8  ;;  %v849_v22 = vld [vmem:[%s4815_s3 + $0x130] sm:$0xff]  ;;  %v850_v23 = vld [vmem:[%s4815_s3 + $0x138] sm:$0xff]  ;;  %v2503_v24 = vpack.c.bf16 %v818_v21, %v817_v20 }
  0x14   : > { %277 = vst [vmem:[#allocation2 + $0xa8] sm:$0x1] %v2945_v8  ;;  %278 = vst [vmem:[#allocation2 + $0xc0] sm:$0x1] %v2945_v8  ;;  %2498 = vmatpush1.bf16.msra.mxu1 %v2497_v12  ;;  %v2551_v25 = vpack.c.bf16 %v850_v23, %v849_v22  ;;  %v819_v26 = vld [vmem:[%s4815_s3 + $0x40] sm:$0xff]  ;;  %v820_v27 = vld [vmem:[%s4815_s3 + $0x48] sm:$0xff] }
  0x15   : > { %279 = vst [vmem:[#allocation2 + $0xd8] sm:$0x1] %v2945_v8  ;;  %280 = vst [vmem:[#allocation2 + $0xf0] sm:$0x1] %v2945_v8  ;;  %2546 = vmatpush1.bf16.msra.mxu0 %v2545_v13  ;;  %2499 = vmatprep.subr.bf16.mxu1 %v4819_v3  ;;  %v851_v28 = vld [vmem:[%s4815_s3 + $0x140] sm:$0xff]  ;;  %v852_v29 = vld [vmem:[%s4815_s3 + $0x148] sm:$0xff]  ;;  %v2506_v30 = vpack.c.bf16 %v820_v27, %v819_v26 }
  0x16   : > { %281 = vst [vmem:[#allocation2 + $0x108] sm:$0x1] %v2945_v8  ;;  %282 = vst [vmem:[#allocation2 + $0x120] sm:$0x1] %v2945_v8  ;;  %2547 = vmatprep.subr.bf16.mxu0 %v4819_v3  ;;  %v2554_v31 = vpack.c.bf16 %v852_v29, %v851_v28  ;;  %v821_v32 = vld [vmem:[%s4815_s3 + $0x50] sm:$0xff]  ;;  %v822_v33 = vld [vmem:[%s4815_s3 + $0x58] sm:$0xff] }
  0x17   : > { %283 = vst [vmem:[#allocation2 + $0x138] sm:$0x1] %v2945_v8  ;;  %284 = vst [vmem:[#allocation2 + $0x150] sm:$0x1] %v2945_v8  ;;  %v853_v34 = vld [vmem:[%s4815_s3 + $0x150] sm:$0xff]  ;;  %v854_v35 = vld [vmem:[%s4815_s3 + $0x158] sm:$0xff]  ;;  %v2509_v36 = vpack.c.bf16 %v822_v33, %v821_v32 }
  0x18   : > { %285 = vst [vmem:[#allocation2 + $0x168] sm:$0x1] %v2945_v8  ;;  %286 = vst [vmem:[#allocation2 + $0x180] sm:$0x1] %v2945_v8  ;;  %2501 = vmatpush1.bf16.msra.mxu1 %v2500_v18  ;;  %v2557_v37 = vpack.c.bf16 %v854_v35, %v853_v34  ;;  %v823_v38 = vld [vmem:[%s4815_s3 + $0x60] sm:$0xff]  ;;  %v824_v39 = vld [vmem:[%s4815_s3 + $0x68] sm:$0xff] }
  0x19   : > { %289 = vst [vmem:[#allocation2 + $0x29] sm:$0x1] %v2945_v8  ;;  %290 = vst [vmem:[#allocation2 + $0x41] sm:$0x1] %v2945_v8  ;;  %2549 = vmatpush1.bf16.msra.mxu0 %v2548_v19  ;;  %2502 = vmatprep.subr.bf16.mxu1 %v4819_v3  ;;  %v855_v40 = vld [vmem:[%s4815_s3 + $0x160] sm:$0xff]  ;;  %v856_v42 = vld [vmem:[%s4815_s3 + $0x168] sm:$0xff]  ;;  %v2512_v48 = vpack.c.bf16 %v824_v39, %v823_v38 }
  0x1a   : > { %291 = vst [vmem:[#allocation2 + $0x59] sm:$0x1] %v2945_v8  ;;  %292 = vst [vmem:[#allocation2 + $0x71] sm:$0x1] %v2945_v8  ;;  %2550 = vmatprep.subr.bf16.mxu0 %v4819_v3  ;;  %v3148_v44 = vld [vmem:[%s4813_s1] ss:$0 sm:$0xff]  ;;  %v2560_v53 = vpack.c.bf16 %v856_v42, %v855_v40 }
  0x1b   : > { %293 = vst [vmem:[#allocation2 + $0x89] sm:$0x1] %v2945_v8  ;;  %294 = vst [vmem:[#allocation2 + $0xa1] sm:$0x1] %v2945_v8  ;;  %v3154_v46 = vld [vmem:[%s4814_s2] ss:$0 sm:$0xff] }
  0x1c   : > { %295 = vst [vmem:[#allocation2 + $0xb9] sm:$0x1] %v2945_v8  ;;  %296 = vst [vmem:[#allocation2 + $0xd1] sm:$0x1] %v2945_v8  ;;  %2504 = vmatpush1.bf16.msra.mxu1 %v2503_v24  ;;  %v308_v47 = vld [vmem:[%s3124_s30] sm:$0xff]  ;;  %v825_v49 = vld [vmem:[%s4815_s3 + $0x70] sm:$0xff] }
  0x1d   : > { %297 = vst [vmem:[#allocation2 + $0xe9] sm:$0x1] %v2945_v8  ;;  %298 = vst [vmem:[#allocation2 + $0x101] sm:$0x1] %v2945_v8  ;;  %2552 = vmatpush1.bf16.msra.mxu0 %v2551_v25  ;;  %2505 = vmatprep.subr.bf16.mxu1 %v4819_v3  ;;  %v826_v50 = vld [vmem:[%s4815_s3 + $0x78] sm:$0xff]  ;;  %v346_v51 = vmul.f32 %v3148_v44, %v308_v47  ;;  %v309_v52 = vld [vmem:[%s3124_s30 + $0x8] sm:$0xff] }
  0x1e   : > { %299 = vst [vmem:[#allocation2 + $0x119] sm:$0x1] %v2945_v8  ;;  %300 = vst [vmem:[#allocation2 + $0x131] sm:$0x1] %v2945_v8  ;;  %2553 = vmatprep.subr.bf16.mxu0 %v4819_v3  ;;  %v857_v54 = vld [vmem:[%s4815_s3 + $0x170] sm:$0xff]  ;;  %v858_v55 = vld [vmem:[%s4815_s3 + $0x178] sm:$0xff]  ;;  %v347_v59 = vmul.f32 %v3148_v44, %v309_v52  ;;  %v2515_v4 = vpack.c.bf16 %v826_v50, %v825_v49 }
  0x1f   : > { %301 = vst [vmem:[#allocation2 + $0x149] sm:$0x1] %v2945_v8  ;;  %302 = vst [vmem:[#allocation2 + $0x161] sm:$0x1] %v2945_v8  ;;  %v310_v57 = vld [vmem:[%s3124_s30 + $0x10] sm:$0xff]  ;;  %v384_v58 = vadd.f32 %v3154_v46, %v346_v51  ;;  %v311_v61 = vld [vmem:[%s3124_s30 + $0x18] sm:$0xff]  ;;  %v2563_v5 = vpack.c.bf16 %v858_v55, %v857_v54 }
  0x20   : > { %303 = vst [vmem:[#allocation2 + $0x179] sm:$0x1] %v2945_v8  ;;  %304 = vst [vmem:[#allocation2 + $0x191] sm:$0x1] %v2945_v8  ;;  %2507 = vmatpush1.bf16.msra.mxu1 %v2506_v30  ;;  %v348_v60 = vmul.f32 %v3148_v44, %v310_v57  ;;  %v312_v62 = vld [vmem:[%s3124_s30 + $0x20] sm:$0xff]  ;;  %v349_v63 = vmul.f32 %v3148_v44, %v311_v61  ;;  %v313_v1 = vld [vmem:[%s3124_s30 + $0x28] sm:$0xff]  ;;  %v385_v9 = vadd.f32 %v3154_v46, %v347_v59 }
  0x21   : > { %270 = vst [vmem:[#allocation2] sm:$0x1] %v2945_v8  ;;  %287 = vst [vmem:[#allocation2 + $0x198] sm:$0x1] %v2945_v8  ;;  %2555 = vmatpush1.bf16.msra.mxu0 %v2554_v31  ;;  %2508 = vmatprep.subr.bf16.mxu1 %v4819_v3  ;;  %v350_v0 = vmul.f32 %v3148_v44, %v312_v62  ;;  %v314_v2 = vld [vmem:[%s3124_s30 + $0x30] sm:$0xff]  ;;  %v827_v6 = vld [vmem:[%s4815_s3 + $0x80] sm:$0xff]  ;;  %v351_v16 = vmul.f32 %v3148_v44, %v313_v1 }
  0x22   : > { %288 = vst [vmem:[#allocation2 + $0x11] sm:$0x1] %v2945_v8  ;;  %305 = vst [vmem:[#allocation2 + $0x1a9] sm:$0x1] %v2945_v8  ;;  %2556 = vmatprep.subr.bf16.mxu0 %v4819_v3  ;;  %v828_v7 = vld [vmem:[%s4815_s3 + $0x88] sm:$0xff]  ;;  %v386_v10 = vadd.f32 %v3154_v46, %v348_v60  ;;  %v315_v11 = vld [vmem:[%s3124_s30 + $0x38] sm:$0xff]  ;;  %v387_v14 = vadd.f32 %v3154_v46, %v349_v63  ;;  %v352_v18 = vmul.f32 %v3148_v44, %v314_v2 }
  0x23   : > { %417 = vst [vmem:[#allocation2 + $0x19] sm:$0xff] %v384_v58  ;;  %v859_v12 = vld [vmem:[%s4815_s3 + $0x180] sm:$0xff]  ;;  %v860_v13 = vld [vmem:[%s4815_s3 + $0x188] sm:$0xff]  ;;  %v388_v15 = vadd.f32 %v3154_v46, %v350_v0  ;;  %418 = vst [vmem:[#allocation2 + $0x21] sm:$0xff] %v385_v9  ;;  %v353_v19 = vmul.f32 %v3148_v44, %v315_v11  ;;  %v2518_v23 = vpack.c.bf16 %v828_v7, %v827_v6  ;;  %vm664_vm1 = vcmask 1045504   ;;  %s2357_s23 = sshll.u32 %s4977_s22, 3 }
  0x24   : > { %2510 = vmatpush1.bf16.msra.mxu1 %v2509_v36  ;;  %v316_v17 = vld [vmem:[%s3124_s30 + $0x40] sm:$0xff]  ;;  %419 = vst [vmem:[#allocation2 + $0x31] sm:$0xff] %v386_v10  ;;  %v317_v21 = vld [vmem:[%s3124_s30 + $0x48] sm:$0xff]  ;;  %v318_v22 = vld [vmem:[%s3124_s30 + $0x50] sm:$0xff]  ;;  %v389_v24 = vadd.f32 %v3154_v46, %v351_v16  ;;  %v2566_v29 = vpack.c.bf16 %v860_v13, %v859_v12  ;;  %v390_v31 = vadd.f32 %v3154_v46, %v352_v18  ;;  %vm2225_vm2 = vcmask 1040384   ;;  %s262_s12 = scalar_lea.vmem %s4818_s6, %s2357_s23 }
  0x25   : > { %2558 = vmatpush1.bf16.msra.mxu0 %v2557_v37  ;;  %2511 = vmatprep.subr.bf16.mxu1 %v4819_v3  ;;  %v354_v20 = vmul.f32 %v3148_v44, %v316_v17  ;;  %420 = vst [vmem:[#allocation2 + $0x39] sm:$0xff] %v387_v14  ;;  %421 = vst [vmem:[#allocation2 + $0x49] sm:$0xff] %v388_v15  ;;  %v355_v25 = vmul.f32 %v3148_v44, %v317_v21  ;;  %v319_v27 = vld [vmem:[%s3124_s30 + $0x58] sm:$0xff]  ;;  %v320_v28 = vld [vmem:[%s3124_s30 + $0x60] sm:$0xff]  ;;  %vm2227_vm3 = vcmask 1041408  }
  0x26   : > { %2559 = vmatprep.subr.bf16.mxu0 %v4819_v3  ;;  %v356_v26 = vmul.f32 %v3148_v44, %v318_v22  ;;  %v829_v30 = vld [vmem:[%s4815_s3 + $0x90] sm:$0xff]  ;;  %v391_v32 = vadd.f32 %v3154_v46, %v353_v19  ;;  %v830_v34 = vld [vmem:[%s4815_s3 + $0x98] sm:$0xff]  ;;  %422 = vst [vmem:[#allocation2 + $0x51] sm:$0xff] %v389_v24  ;;  %v357_v37 = vmul.f32 %v3148_v44, %v319_v27  ;;  %v321_v38 = vld [vmem:[%s3124_s30 + $0x68] sm:$0xff] }
  0x27   : > { %v392_v33 = vadd.f32 %v3154_v46, %v354_v20  ;;  %v393_v35 = vadd.f32 %v3154_v46, %v355_v25  ;;  %v322_v39 = vld [vmem:[%s3124_s30 + $0x70] sm:$0xff]  ;;  %v862_v42 = vld [vmem:[%s4815_s3 + $0x198] sm:$0xff]  ;;  %423 = vst [vmem:[#allocation2 + $0x61] sm:$0xff] %v390_v31  ;;  %v359_v47 = vmul.f32 %v3148_v44, %v321_v38  ;;  %v2521_v51 = vpack.c.bf16 %v830_v34, %v829_v30  ;;  %v831_v55 = vld [vmem:[%s4815_s3 + $0xa0] sm:$0xff] }
  0x28   : > { %v3143_v43 = vld [vmem:[#allocation2] sm:$0xff]  ;;  %2513 = vmatpush1.bf16.msra.mxu1 %v2512_v48  ;;  %v394_v36 = vadd.f32 %v3154_v46, %v356_v26  ;;  %v861_v40 = vld [vmem:[%s4815_s3 + $0x190] sm:$0xff]  ;;  %424 = vst [vmem:[#allocation2 + $0x69] sm:$0xff] %v391_v32  ;;  %v395_v49 = vadd.f32 %v3154_v46, %v357_v37  ;;  %v360_v50 = vmul.f32 %v3148_v44, %v322_v39  ;;  %v864_v59 = vld [vmem:[%s4815_s3 + $0x1a8] sm:$0xff] }
  0x29   : > { %v552_v45 = vrot.slane %v3143_v43, 1  ;;  %2561 = vmatpush1.bf16.msra.mxu0 %v2560_v53  ;;  %2514 = vmatprep.subr.bf16.mxu1 %v4819_v3  ;;  %425 = vst [vmem:[#allocation2 + $0x79] sm:$0xff] %v392_v33  ;;  %426 = vst [vmem:[#allocation2 + $0x81] sm:$0xff] %v393_v35  ;;  %v397_v53 = vadd.f32 %v3154_v46, %v359_v47  ;;  %v2569_v54 = vpack.c.bf16 %v862_v42, %v861_v40  ;;  %v863_v58 = vld [vmem:[%s4815_s3 + $0x1a0] sm:$0xff]  ;;  %v833_v62 = vld [vmem:[%s4815_s3 + $0xb0] sm:$0xff] }
  0x2a   : > { %2562 = vmatprep.subr.bf16.mxu0 %v4819_v3  ;;  %v3240_v48 = vld [vmem:[#allocation2 + $0x18] sm:$0xff]  ;;  %427 = vst [vmem:[#allocation2 + $0x91] sm:$0xff] %v394_v36  ;;  %428 = vst [vmem:[#allocation2 + $0x99] sm:$0xff] %v395_v49  ;;  %v398_v57 = vadd.f32 %v3154_v46, %v360_v50  ;;  %v2572_v61 = vpack.c.bf16 %v864_v59, %v863_v58  ;;  %v865_v0 = vld [vmem:[%s4815_s3 + $0x1b0] sm:$0xff] }
  0x2b   : > { %v554_v56 = vsel %vm551_vm0, %v552_v45, %v3137_v41  ;;  %v358_v45 = vmul.f32 %v3148_v44, %v320_v28  ;;  %1251 = vmatprep.mubr.f32.mxu0 %v3240_v48  ;;  %430 = vst [vmem:[#allocation2 + $0xb1] sm:$0xff] %v397_v53  ;;  %v834_v63 = vld [vmem:[%s4815_s3 + $0xb8] sm:$0xff]  ;;  %v836_v6 = vld [vmem:[%s4815_s3 + $0xc8] sm:$0xff]  ;;  %v867_v7 = vld [vmem:[%s4815_s3 + $0x1c0] sm:$0xff]  ;;  %v665_v53 = vrot.slane %v3143_v43, 2 }
  0x2c   : > { %1026 = vmatprep.mubr.f32.mxu1 %v554_v56  ;;  %2516 = vmatpush1.bf16.msra.mxu1 %v2515_v4  ;;  %v832_v56 = vld [vmem:[%s4815_s3 + $0xa8] sm:$0xff]  ;;  %431 = vst [vmem:[#allocation2 + $0xc1] sm:$0xff] %v398_v57  ;;  %v866_v1 = vld [vmem:[%s4815_s3 + $0x1b8] sm:$0xff]  ;;  %v2527_v2 = vpack.c.bf16 %v834_v63, %v833_v62  ;;  %v837_v13 = vld [vmem:[%s4815_s3 + $0xd0] sm:$0xff] }
  0x2d   : > { %2564 = vmatpush1.bf16.msra.mxu0 %v2563_v5  ;;  %2517 = vmatprep.subr.bf16.mxu1 %v4819_v3  ;;  %v396_v52 = vadd.f32 %v3154_v46, %v358_v45  ;;  %v2524_v60 = vpack.c.bf16 %v832_v56, %v831_v55  ;;  %v2575_v4 = vpack.c.bf16 %v866_v1, %v865_v0  ;;  %v835_v5 = vld [vmem:[%s4815_s3 + $0xc0] sm:$0xff]  ;;  %v868_v9 = vld [vmem:[%s4815_s3 + $0x1c8] sm:$0xff]  ;;  %v323_v10 = vld [vmem:[%s3124_s30 + $0x78] sm:$0xff] }
  0x2e   : > { %2565 = vmatprep.subr.bf16.mxu0 %v4819_v3  ;;  %v2530_v11 = vpack.c.bf16 %v836_v6, %v835_v5  ;;  %v2578_v12 = vpack.c.bf16 %v868_v9, %v867_v7  ;;  %v838_v14 = vld [vmem:[%s4815_s3 + $0xd8] sm:$0xff]  ;;  %v361_v15 = vmul.f32 %v3148_v44, %v323_v10  ;;  %v869_v16 = vld [vmem:[%s4815_s3 + $0x1d0] sm:$0xff]  ;;  %v839_v19 = vld [vmem:[%s4815_s3 + $0xe0] sm:$0xff] }
  0x2f   : > { %429 = vst [vmem:[#allocation2 + $0xa9] sm:$0xff] %v396_v52  ;;  %v870_v17 = vld [vmem:[%s4815_s3 + $0x1d8] sm:$0xff]  ;;  %v2533_v18 = vpack.c.bf16 %v838_v14, %v837_v13  ;;  %v324_v20 = vld [vmem:[%s3124_s30 + $0x80] sm:$0xff]  ;;  %v840_v22 = vld [vmem:[%s4815_s3 + $0xe8] sm:$0xff] }
  0x30   : > { %2519 = vmatpush1.bf16.msra.mxu1 %v2518_v23  ;;  %v2581_v21 = vpack.c.bf16 %v870_v17, %v869_v16  ;;  %v399_v23 = vadd.f32 %v3154_v46, %v361_v15  ;;  %v325_v24 = vld [vmem:[%s3124_s30 + $0x88] sm:$0xff]  ;;  %v326_v25 = vld [vmem:[%s3124_s30 + $0x90] sm:$0xff]  ;;  %v871_v26 = vld [vmem:[%s4815_s3 + $0x1e0] sm:$0xff]  ;;  %v362_v28 = vmul.f32 %v3148_v44, %v324_v20  ;;  %v2536_v31 = vpack.c.bf16 %v840_v22, %v839_v19 }
  0x31   : > { %2567 = vmatpush1.bf16.msra.mxu0 %v2566_v29  ;;  %2520 = vmatprep.subr.bf16.mxu1 %v4819_v3  ;;  %v872_v27 = vld [vmem:[%s4815_s3 + $0x1e8] sm:$0xff]  ;;  %v327_v29 = vld [vmem:[%s3124_s30 + $0x98] sm:$0xff]  ;;  %v328_v30 = vld [vmem:[%s3124_s30 + $0xa0] sm:$0xff]  ;;  %v363_v33 = vmul.f32 %v3148_v44, %v325_v24  ;;  %v364_v34 = vmul.f32 %v3148_v44, %v326_v25  ;;  %v557_v19 = vrot.slane %v3240_v48, 1 }
  0x32   : > { %2568 = vmatprep.subr.bf16.mxu0 %v4819_v3  ;;  %432 = vst [vmem:[#allocation2 + $0xc9] sm:$0xff] %v399_v23  ;;  %v841_v32 = vld [vmem:[%s4815_s3 + $0xf0] sm:$0xff]  ;;  %v329_v35 = vld [vmem:[%s3124_s30 + $0xa8] sm:$0xff]  ;;  %v2584_v36 = vpack.c.bf16 %v872_v27, %v871_v26  ;;  %v842_v37 = vld [vmem:[%s4815_s3 + $0xf8] sm:$0xff]  ;;  %v400_v39 = vadd.f32 %v3154_v46, %v362_v28  ;;  %v365_v50 = vmul.f32 %v3148_v44, %v327_v29  ;;  %v670_v29 = vrot.slane %v3240_v48, 2 }
  0x33   : > { %v873_v38 = vld [vmem:[%s4815_s3 + $0x1f0] sm:$0xff]  ;;  %v874_v42 = vld [vmem:[%s4815_s3 + $0x1f8] sm:$0xff]  ;;  %v401_v47 = vadd.f32 %v3154_v46, %v363_v33  ;;  %v402_v49 = vadd.f32 %v3154_v46, %v364_v34  ;;  %v367_v55 = vmul.f32 %v3148_v44, %v329_v35  ;;  %v332_v56 = vld [vmem:[%s3124_s30 + $0xc0] sm:$0xff]  ;;  %v2539_v57 = vpack.c.bf16 %v842_v37, %v841_v32 }
  0x34   : > { %2522 = vmatpush1.bf16.msra.mxu1 %v2521_v51  ;;  %v330_v40 = vld [vmem:[%s3124_s30 + $0xb0] sm:$0xff]  ;;  %v366_v51 = vmul.f32 %v3148_v44, %v328_v30  ;;  %v331_v52 = vld [vmem:[%s3124_s30 + $0xb8] sm:$0xff]  ;;  %433 = vst [vmem:[#allocation2 + $0xd9] sm:$0xff] %v400_v39  ;;  %v403_v58 = vadd.f32 %v3154_v46, %v365_v50  ;;  %v333_v1 = vld [vmem:[%s3124_s30 + $0xc8] sm:$0xff]  ;;  %v370_v7 = vmul.f32 %v3148_v44, %v332_v56 }
  0x35   : > { %2570 = vmatpush1.bf16.msra.mxu0 %v2569_v54  ;;  %2523 = vmatprep.subr.bf16.mxu1 %v4819_v3  ;;  %v3346_v45 = vld [vmem:[#allocation2 + $0x10] sm:$0x3]  ;;  %v666_v54 = vrot.slane %v2945_v8, 2  ;;  %434 = vst [vmem:[#allocation2 + $0xe1] sm:$0xff] %v401_v47  ;;  %435 = vst [vmem:[#allocation2 + $0xf1] sm:$0xff] %v402_v49  ;;  %v405_v63 = vadd.f32 %v3154_v46, %v367_v55  ;;  %v369_v0 = vmul.f32 %v3148_v44, %v331_v52  ;;  %v3372_v5 = vld [vmem:[#allocation2 + $0x20] sm:$0xff] }
  0x36   : > { %2571 = vmatprep.subr.bf16.mxu0 %v4819_v3  ;;  %v404_v59 = vadd.f32 %v3154_v46, %v366_v51  ;;  %v555_v62 = vrot.slane %v3346_v45, 1  ;;  %436 = vst [vmem:[#allocation2 + $0xf9] sm:$0xff] %v403_v58  ;;  %v907_v10 = vld [vmem:[%s4815_s3 + $0x300] sm:$0xff]  ;;  %v668_v13 = vrot.slane %v3346_v45, 2  ;;  %v408_v15 = vadd.f32 %v3154_v46, %v370_v7  ;;  %v878_v22 = vld [vmem:[%s4815_s3 + $0x218] sm:$0xff]  ;;  %v909_v26 = vld [vmem:[%s4815_s3 + $0x310] sm:$0xff] }
  0x37   : > { %v667_v9 = vsel %vm664_vm1, %v665_v53, %v666_v54  ;;  %438 = vst [vmem:[#allocation2 + $0x111] sm:$0xff] %v405_v63  ;;  %v407_v14 = vadd.f32 %v3154_v46, %v369_v0  ;;  %v371_v16 = vmul.f32 %v3148_v44, %v333_v1  ;;  %v558_v20 = vrot.slane %v3372_v5, 1  ;;  %v454_v23 = vld [vmem:[#allocation2 + $0x28] sm:$0x3]  ;;  %v910_v27 = vld [vmem:[%s4815_s3 + $0x318] sm:$0xff]  ;;  %v879_v33 = vld [vmem:[%s4815_s3 + $0x220] sm:$0xff] }
  0x38   : > { %2525 = vmatpush1.bf16.msra.mxu1 %v2524_v60  ;;  %v368_v60 = vmul.f32 %v3148_v44, %v330_v40  ;;  %437 = vst [vmem:[#allocation2 + $0x109] sm:$0xff] %v404_v59  ;;  %441 = vst [vmem:[#allocation2 + $0x139] sm:$0xff] %v408_v15  ;;  %v669_v28 = vsel %vm664_vm1, %v666_v54, %v668_v13  ;;  %v560_v32 = vrot.slane %v454_v23, 1  ;;  %v880_v34 = vld [vmem:[%s4815_s3 + $0x228] sm:$0xff]  ;;  %v3428_v37 = vld [vmem:[#allocation2 + $0x38] sm:$0xff] }
  0x39   : > { %2573 = vmatpush1.bf16.msra.mxu0 %v2572_v61  ;;  %2526 = vmatprep.subr.bf16.mxu1 %v4819_v3  ;;  %v2587_v61 = vpack.c.bf16 %v874_v42, %v873_v38  ;;  %440 = vst [vmem:[#allocation2 + $0x129] sm:$0xff] %v407_v14  ;;  %v3431_v38 = vpack.c.bf16 %v910_v27, %v909_v26  ;;  %v911_v39 = vld [vmem:[%s4815_s3 + $0x320] sm:$0xff]  ;;  %v912_v40 = vld [vmem:[%s4815_s3 + $0x328] sm:$0xff]  ;;  %v673_v42 = vrot.slane %v454_v23, 2  ;;  %v335_v47 = vld [vmem:[%s3124_s30 + $0xd8] sm:$0xff]  ;;  %v563_v51 = vrot.slane %v3428_v37, 1 }
  0x3a   : > { %2574 = vmatprep.subr.bf16.mxu0 %v4819_v3  ;;  %v406_v6 = vadd.f32 %v3154_v46, %v368_v60  ;;  %v2596_v45 = vpack.c.bf16 %v880_v34, %v879_v33  ;;  %v3448_v49 = vsel %vm551_vm0, %v558_v20, %v560_v32  ;;  %v3453_v52 = vld [vmem:[#allocation2 + $0x40] sm:$0x3]  ;;  %v881_v53 = vld [vmem:[%s4815_s3 + $0x230] sm:$0xff]  ;;  %v882_v54 = vld [vmem:[%s4815_s3 + $0x238] sm:$0xff]  ;;  %v3462_v55 = vpack.c.bf16 %v912_v40, %v911_v39 }
  0x3b   : > { %v913_v56 = vld [vmem:[%s4815_s3 + $0x330] sm:$0xff]  ;;  %v373_v58 = vmul.f32 %v3148_v44, %v335_v47  ;;  %v2599_v63 = vpack.c.bf16 %v882_v54, %v881_v53  ;;  %v883_v0 = vld [vmem:[%s4815_s3 + $0x240] sm:$0xff]  ;;  %v884_v1 = vld [vmem:[%s4815_s3 + $0x248] sm:$0xff] }
  0x3c   : > { %2528 = vmatpush1.bf16.msra.mxu1 %v2527_v2  ;;  %v875_v2 = vld [vmem:[%s4815_s3 + $0x200] sm:$0xff]  ;;  %439 = vst [vmem:[#allocation2 + $0x121] sm:$0xff] %v406_v6  ;;  %v3494_v6 = vld [vmem:[#allocation2 + $0x50] sm:$0xff]  ;;  %v2602_v13 = vpack.c.bf16 %v884_v1, %v883_v0  ;;  %v886_v15 = vld [vmem:[%s4815_s3 + $0x258] sm:$0xff] }
  0x3d   : > { %2576 = vmatpush1.bf16.msra.mxu0 %v2575_v4  ;;  %2529 = vmatprep.subr.bf16.mxu1 %v4819_v3  ;;  %v876_v4 = vld [vmem:[%s4815_s3 + $0x208] sm:$0xff]  ;;  %v885_v14 = vld [vmem:[%s4815_s3 + $0x250] sm:$0xff]  ;;  %v3531_v23 = vld [vmem:[#allocation2 + $0x58] sm:$0x3]  ;;  %v681_v32 = vrot.slane %v3494_v6, 2 }
  0x3e   : > { %2577 = vmatprep.subr.bf16.mxu0 %v4819_v3  ;;  %v2590_v17 = vpack.c.bf16 %v876_v4, %v875_v2  ;;  %v336_v2 = vld [vmem:[%s3124_s30 + $0xe0] sm:$0xff]  ;;  %v3492_v4 = vld [vmem:[#allocation2 + $0x48] sm:$0xff]  ;;  %v2605_v27 = vpack.c.bf16 %v886_v15, %v885_v14  ;;  %v570_v39 = vrot.slane %v3531_v23, 1  ;;  %v683_v54 = vrot.slane %v3531_v23, 2  ;;  %v921_v0 = vld [vmem:[%s4815_s3 + $0x370] sm:$0xff] }
  0x3f   : > { %v887_v40 = vld [vmem:[%s4815_s3 + $0x260] sm:$0xff]  ;;  %v3571_v47 = vld [vmem:[#allocation2 + $0x68] sm:$0xff]  ;;  %v922_v1 = vld [vmem:[%s4815_s3 + $0x378] sm:$0xff] }
  0x40   : > { %2531 = vmatpush1.bf16.msra.mxu1 %v2530_v11  ;;  %v908_v11 = vld [vmem:[%s4815_s3 + $0x308] sm:$0xff]  ;;  %v3630_v14 = vld [vmem:[#allocation2 + $0x78] sm:$0xff]  ;;  %v3632_v15 = vld [vmem:[#allocation2 + $0x80] sm:$0xff] }
  0x41   : > { %2579 = vmatpush1.bf16.msra.mxu0 %v2578_v12  ;;  %2532 = vmatprep.subr.bf16.mxu1 %v4819_v3  ;;  %v334_v12 = vld [vmem:[%s3124_s30 + $0xd0] sm:$0xff]  ;;  %v3400_v24 = vpack.c.bf16 %v908_v11, %v907_v10  ;;  %v916_v10 = vld [vmem:[%s4815_s3 + $0x348] sm:$0xff]  ;;  %v411_v11 = vadd.f32 %v3154_v46, %v373_v58  ;;  %v573_v58 = vrot.slane %v3571_v47, 1 }
  0x42   : > { %2580 = vmatprep.subr.bf16.mxu0 %v4819_v3  ;;  %v372_v25 = vmul.f32 %v3148_v44, %v334_v12  ;;  %v337_v12 = vld [vmem:[%s3124_s30 + $0xe8] sm:$0xff] }
  0x43   : > { %444 = vst [vmem:[#allocation2 + $0x159] sm:$0xff] %v411_v11  ;;  %v375_v26 = vmul.f32 %v3148_v44, %v337_v12  ;;  %v920_v53 = vld [vmem:[%s4815_s3 + $0x368] sm:$0xff]  ;;  %v686_v11 = vrot.slane %v3571_v47, 2 }
  0x44   : > { %2534 = vmatpush1.bf16.msra.mxu1 %v2533_v18  ;;  %v556_v18 = vsel %vm551_vm0, %v3137_v41, %v555_v62  ;;  %v409_v41 = vadd.f32 %v3154_v46, %v371_v16  ;;  %v410_v35 = vadd.f32 %v3154_v46, %v372_v25  ;;  %v565_v62 = vrot.slane %v3453_v52, 1 }
  0x45   : > { %2582 = vmatpush1.bf16.msra.mxu0 %v2581_v21  ;;  %2535 = vmatprep.subr.bf16.mxu1 %v4819_v3  ;;  %v877_v21 = vld [vmem:[%s4815_s3 + $0x210] sm:$0xff]  ;;  %v374_v16 = vmul.f32 %v3148_v44, %v336_v2  ;;  %v413_v33 = vadd.f32 %v3154_v46, %v375_v26  ;;  %v3619_v2 = vsel %vm664_vm1, %v681_v32, %v683_v54 }
  0x46   : > { %2583 = vmatprep.subr.bf16.mxu0 %v4819_v3  ;;  %v2593_v30 = vpack.c.bf16 %v878_v22, %v877_v21  ;;  %442 = vst [vmem:[#allocation2 + $0x141] sm:$0xff] %v409_v41  ;;  %443 = vst [vmem:[#allocation2 + $0x151] sm:$0xff] %v410_v35  ;;  %v568_v21 = vrot.slane %v3494_v6, 1  ;;  %v339_v22 = vld [vmem:[%s3124_s30 + $0xf8] sm:$0xff] }
  0x47   : > { %v412_v25 = vadd.f32 %v3154_v46, %v374_v16  ;;  %v377_v34 = vmul.f32 %v3148_v44, %v339_v22  ;;  %446 = vst [vmem:[#allocation2 + $0x171] sm:$0xff] %v413_v33  ;;  %v892_v16 = vld [vmem:[%s4815_s3 + $0x288] sm:$0xff]  ;;  %v577_v22 = vrot.slane %v3630_v14, 1  ;;  %v690_v33 = vrot.slane %v3630_v14, 2 }
  0x48   : > { %2537 = vmatpush1.bf16.msra.mxu1 %v2536_v31  ;;  %v671_v31 = vrot.slane %v3372_v5, 2 }
  0x49   : > { %2585 = vmatpush1.bf16.msra.mxu0 %v2584_v36  ;;  %2538 = vmatprep.subr.bf16.mxu1 %v4819_v3  ;;  %v3425_v36 = vld [vmem:[#allocation2 + $0x30] sm:$0xff]  ;;  %445 = vst [vmem:[#allocation2 + $0x169] sm:$0xff] %v412_v25  ;;  %v578_v25 = vrot.slane %v3632_v15, 1 }
  0x4a   : > { %2586 = vmatprep.subr.bf16.mxu0 %v4819_v3  ;;  %v562_v50 = vrot.slane %v3425_v36, 1  ;;  %v675_v59 = vrot.slane %v3425_v36, 2  ;;  %v3479_v60 = vsel %vm664_vm1, %v671_v31, %v673_v42  ;;  %v888_v42 = vld [vmem:[%s4815_s3 + $0x268] sm:$0xff] }
  0x4c   : > { %2540 = vmatpush1.bf16.msra.mxu1 %v2539_v57  ;;  %v914_v57 = vld [vmem:[%s4815_s3 + $0x338] sm:$0xff] }
  0x4d   : > { %2588 = vmatpush1.bf16.msra.mxu0 %v2587_v61  ;;  %2717 = vmatprep.subr.bf16.mxu1 %v4819_v3  ;;  %v3482_v61 = vsel %vm551_vm0, %v562_v50, %v563_v51  ;;  %v3498_v7 = vpack.c.bf16 %v914_v57, %v913_v56  ;;  %v3594_v56 = vsel %vm551_vm0, %v568_v21, %v570_v39 }
  0x4e   : > { %2589 = vmatprep.subr.bf16.mxu0 %v4819_v3 }
  0x4f   : > { %1027 = vmatmul.mubr.f32.vlgmr.msra.gmra.mrb[0].mxu1 %v3143_v43  ;;  %v3415_v43 = vsel %vm551_vm0, %v557_v19, %v558_v20  ;;  %v678_v19 = vrot.slane %v3453_v52, 2  ;;  %v567_v20 = vrot.slane %v3492_v4, 1  ;;  %v919_v52 = vld [vmem:[%s4815_s3 + $0x360] sm:$0xff] }
  0x50   : > { %1252 = vmatmul.mubr.f32.vlgmr.msra.gmra.mrb[0].mxu0 %v667_v9  ;;  %1031 = vmatprep.mubr.f32.mxu1 %v556_v18  ;;  %v915_v9 = vld [vmem:[%s4815_s3 + $0x340] sm:$0xff]  ;;  %v3525_v18 = vsel %vm551_vm0, %v563_v51, %v565_v62  ;;  %v415_v51 = vadd.f32 %v3154_v46, %v377_v34  ;;  %v463_v62 = vld [vmem:[#allocation2 + $0x70] sm:$0x3]  ;;  %v691_v34 = vrot.slane %v3632_v15, 2 }
  0x51   : > { %2591 = vmatpush1.bf16.msra.mxu0 %v2590_v17  ;;  %1256 = vmatprep.mubr.f32.mxu0 %v3372_v5  ;;  %v338_v17 = vld [vmem:[%s3124_s30 + $0xf0] sm:$0xff]  ;;  %v3535_v41 = vpack.c.bf16 %v916_v10, %v915_v9  ;;  %v575_v12 = vrot.slane %v463_v62, 1 }
  0x52   : > { %2592 = vmatprep.subr.bf16.mxu0 %v4819_v3  ;;  %2733 = vmatpush1.bf16.msra.mxu1 %v3400_v24  ;;  %448 = vst [vmem:[#allocation2 + $0x189] sm:$0xff] %v415_v51  ;;  %v3691_v51 = vld [vmem:[#allocation2 + $0x98] sm:$0xff] }
  0x53   : > { %1032 = vmatmul.mubr.f32.gmra.mrb[2].mxu1 %v2945_v8  ;;  %2718 = vmatprep.subr.bf16.mxu1 %v4819_v3  ;;  %v3445_v8 = vsel %vm664_vm1, %v670_v29, %v671_v31  ;;  %v918_v29 = vld [vmem:[%s4815_s3 + $0x358] sm:$0xff]  ;;  %v680_v31 = vrot.slane %v3492_v4, 2  ;;  %v3657_v23 = vsel %vm551_vm0, %v573_v58, %v575_v12  ;;  %v929_v12 = vld [vmem:[%s4815_s3 + $0x3b0] sm:$0xff] }
  0x54   : > { %1257 = vmatmul.mubr.f32.gmra.mrb[2].mxu0 %v669_v28  ;;  %1036 = vmatprep.mubr.f32.mxu1 %v3415_v43  ;;  %v917_v28 = vld [vmem:[%s4815_s3 + $0x350] sm:$0xff] }
  0x55   : > { %1261 = vmatprep.mubr.f32.mxu0 %v3425_v36  ;;  %2594 = vmatpush1.bf16.msra.mxu0 %v2593_v30  ;;  %v376_v30 = vmul.f32 %v3148_v44, %v338_v17  ;;  %v3575_v50 = vpack.c.bf16 %v918_v29, %v917_v28  ;;  %v3639_v17 = vpack.c.bf16 %v922_v1, %v921_v0  ;;  %v893_v28 = vld [vmem:[%s4815_s3 + $0x290] sm:$0xff]  ;;  %v894_v29 = vld [vmem:[%s4815_s3 + $0x298] sm:$0xff]  ;;  %v469_v1 = vld [vmem:[#allocation2 + $0xa0] sm:$0x3] }
  0x56   : > { %2595 = vmatprep.subr.bf16.mxu0 %v4819_v3  ;;  %2734 = vmatpush1.bf16.msra.mxu1 %v3431_v38 }
  0x57   : > { %1037 = vmatmul.mubr.f32.gmra.mrb[4].mxu1 %v3240_v48  ;;  %2719 = vmatprep.subr.bf16.mxu1 %v4819_v3  ;;  %v676_v48 = vrot.slane %v3428_v37, 2  ;;  %v414_v44 = vadd.f32 %v3154_v46, %v376_v30  ;;  %v2608_v46 = vpack.c.bf16 %v888_v42, %v887_v40  ;;  %v3687_v40 = vsel %vm551_vm0, %v577_v22, %v578_v25  ;;  %v3689_v42 = vld [vmem:[#allocation2 + $0x90] sm:$0xff] }
  0x58   : > { %1262 = vmatmul.mubr.f32.gmra.mrb[4].mxu0 %v3445_v8  ;;  %1041 = vmatprep.mubr.f32.mxu1 %v3448_v49  ;;  %v585_v22 = vrot.slane %v469_v1, 1 }
  0x59   : > { %1266 = vmatprep.mubr.f32.mxu0 %v3428_v37  ;;  %2597 = vmatpush1.bf16.msra.mxu0 %v2596_v45  ;;  %v3556_v35 = vsel %vm664_vm1, %v676_v48, %v678_v19  ;;  %v3569_v45 = vld [vmem:[#allocation2 + $0x60] sm:$0xff]  ;;  %447 = vst [vmem:[#allocation2 + $0x181] sm:$0xff] %v414_v44 }
  0x5a   : > { %2598 = vmatprep.subr.bf16.mxu0 %v4819_v3  ;;  %2735 = vmatpush1.bf16.msra.mxu1 %v3462_v55  ;;  %v572_v57 = vrot.slane %v3569_v45, 1  ;;  %v685_v10 = vrot.slane %v3569_v45, 2  ;;  %v923_v19 = vld [vmem:[%s4815_s3 + $0x380] sm:$0xff] }
  0x5b   : > { %1042 = vmatmul.mubr.f32.gmra.mrb[6].mxu1 %v3372_v5  ;;  %2720 = vmatprep.subr.bf16.mxu1 %v4819_v3  ;;  %v3513_v5 = vsel %vm664_vm1, %v675_v59, %v676_v48  ;;  %v889_v59 = vld [vmem:[%s4815_s3 + $0x270] sm:$0xff]  ;;  %v890_v48 = vld [vmem:[%s4815_s3 + $0x278] sm:$0xff] }
  0x5c   : > { %1267 = vmatmul.mubr.f32.gmra.mrb[6].mxu0 %v3479_v60  ;;  %1046 = vmatprep.mubr.f32.mxu1 %v3482_v61  ;;  %v2611_v9 = vpack.c.bf16 %v890_v48, %v889_v59  ;;  %v582_v48 = vrot.slane %v3689_v42, 1 }
  0x5d   : > { %1271 = vmatprep.mubr.f32.mxu0 %v3492_v4  ;;  %2600 = vmatpush1.bf16.msra.mxu0 %v2599_v63  ;;  %v3606_v63 = vpack.c.bf16 %v920_v53, %v919_v52  ;;  %v895_v52 = vld [vmem:[%s4815_s3 + $0x2a0] sm:$0xff]  ;;  %v896_v53 = vld [vmem:[%s4815_s3 + $0x2a8] sm:$0xff] }
  0x5e   : > { %2601 = vmatprep.subr.bf16.mxu0 %v4819_v3  ;;  %2736 = vmatpush1.bf16.msra.mxu1 %v3498_v7  ;;  %v2620_v0 = vpack.c.bf16 %v896_v53, %v895_v52  ;;  %v472_v53 = vld [vmem:[#allocation2 + $0xb8] sm:$0x3] }
  0x5f   : > { %1047 = vmatmul.mubr.f32.gmra.mrb[8].mxu1 %v3425_v36  ;;  %2721 = vmatprep.subr.bf16.mxu1 %v4819_v3  ;;  %v3559_v36 = vsel %vm551_vm0, %v567_v20, %v568_v21  ;;  %v924_v20 = vld [vmem:[%s4815_s3 + $0x388] sm:$0xff]  ;;  %v688_v21 = vrot.slane %v463_v62, 2  ;;  %v583_v62 = vrot.slane %v3691_v51, 1 }
  0x60   : > { %1272 = vmatmul.mubr.f32.gmra.mrb[8].mxu0 %v3513_v5  ;;  %1051 = vmatprep.mubr.f32.mxu1 %v3525_v18  ;;  %v3668_v30 = vpack.c.bf16 %v924_v20, %v923_v19  ;;  %v695_v19 = vrot.slane %v3689_v42, 2  ;;  %v3750_v20 = vld [vmem:[#allocation2 + $0xa8] sm:$0xff] }
  0x61   : > { %1276 = vmatprep.mubr.f32.mxu0 %v3494_v6  ;;  %2603 = vmatpush1.bf16.msra.mxu0 %v2602_v13  ;;  %v891_v13 = vld [vmem:[%s4815_s3 + $0x280] sm:$0xff]  ;;  %v3684_v39 = vsel %vm664_vm1, %v686_v11, %v688_v21  ;;  %v696_v21 = vrot.slane %v3691_v51, 2 }
  0x62   : > { %2604 = vmatprep.subr.bf16.mxu0 %v4819_v3  ;;  %2737 = vmatpush1.bf16.msra.mxu1 %v3535_v41  ;;  %v2614_v26 = vpack.c.bf16 %v892_v16, %v891_v13  ;;  %4891 = vst [vmem:[#allocation3_spill] sm:$0xff] %v3668_v30  ;;  %v930_v13 = vld [vmem:[%s4815_s3 + $0x3b8] sm:$0xff] }
  0x63   : > { %1052 = vmatmul.mubr.f32.gmra.mrb[10].mxu1 %v3428_v37  ;;  %2722 = vmatprep.subr.bf16.mxu1 %v4819_v3  ;;  %v3591_v37 = vsel %vm664_vm1, %v680_v31, %v681_v32  ;;  %v925_v31 = vld [vmem:[%s4815_s3 + $0x390] sm:$0xff]  ;;  %v926_v32 = vld [vmem:[%s4815_s3 + $0x398] sm:$0xff] }
  0x64   : > { %1277 = vmatmul.mubr.f32.gmra.mrb[10].mxu0 %v3556_v35  ;;  %1056 = vmatprep.mubr.f32.mxu1 %v3559_v36  ;;  %v3701_v54 = vpack.c.bf16 %v926_v32, %v925_v31  ;;  %v931_v31 = vld [vmem:[%s4815_s3 + $0x3c0] sm:$0xff]  ;;  %v932_v32 = vld [vmem:[%s4815_s3 + $0x3c8] sm:$0xff] }
  0x65   : > { %1281 = vmatprep.mubr.f32.mxu0 %v3569_v45  ;;  %2606 = vmatpush1.bf16.msra.mxu0 %v2605_v27  ;;  %v466_v27 = vld [vmem:[#allocation2 + $0x88] sm:$0x3] }
  0x66   : > { %2607 = vmatprep.subr.bf16.mxu0 %v4819_v3  ;;  %2738 = vmatpush1.bf16.msra.mxu1 %v3575_v50  ;;  %v580_v44 = vrot.slane %v466_v27, 1  ;;  %4892 = vst [vmem:[#allocation4_spill] sm:$0xff] %v3701_v54  ;;  %v693_v59 = vrot.slane %v466_v27, 2  ;;  %v899_v27 = vld [vmem:[%s4815_s3 + $0x2c0] sm:$0xff] }
  0x67   : > { %1057 = vmatmul.mubr.f32.gmra.mrb[12].mxu1 %v3492_v4  ;;  %2723 = vmatprep.subr.bf16.mxu1 %v4819_v3  ;;  %v3623_v4 = vsel %vm551_vm0, %v572_v57, %v573_v58  ;;  %v928_v57 = vld [vmem:[%s4815_s3 + $0x3a8] sm:$0xff]  ;;  %v3714_v58 = vsel %vm664_vm1, %v690_v33, %v691_v34  ;;  %v698_v33 = vrot.slane %v469_v1, 2 }
  0x68   : > { %1282 = vmatmul.mubr.f32.gmra.mrb[12].mxu0 %v3591_v37  ;;  %1061 = vmatprep.mubr.f32.mxu1 %v3594_v56  ;;  %v3743_v16 = vsel %vm664_vm1, %v691_v34, %v693_v59  ;;  %v587_v34 = vrot.slane %v3750_v20, 1  ;;  %v3792_v59 = vpack.c.bf16 %v932_v32, %v931_v31  ;;  %v936_v31 = vld [vmem:[%s4815_s3 + $0x3e8] sm:$0xff] }
  0x69   : > { %1286 = vmatprep.mubr.f32.mxu0 %v3571_v47  ;;  %2609 = vmatpush1.bf16.msra.mxu0 %v2608_v46  ;;  %v927_v46 = vld [vmem:[%s4815_s3 + $0x3a0] sm:$0xff]  ;;  %4895 = vst [vmem:[#allocation7_spill] sm:$0xff] %v3743_v16 }
  0x6a   : > { %2610 = vmatprep.subr.bf16.mxu0 %v4819_v3  ;;  %2739 = vmatpush1.bf16.msra.mxu1 %v3606_v63  ;;  %4898 = vst [vmem:[#allocation10_spill] sm:$0xff] %v3792_v59 }
  0x6b   : > { %1062 = vmatmul.mubr.f32.gmra.mrb[14].mxu1 %v3494_v6  ;;  %2724 = vmatprep.subr.bf16.mxu1 %v4819_v3  ;;  %v3654_v6 = vsel %vm664_vm1, %v685_v10, %v686_v11  ;;  %v898_v10 = vld [vmem:[%s4815_s3 + $0x2b8] sm:$0xff]  ;;  %v3730_v11 = vpack.c.bf16 %v928_v57, %v927_v46  ;;  %v901_v46 = vld [vmem:[%s4815_s3 + $0x2d0] sm:$0xff] }
  0x6c   : > { %1287 = vmatmul.mubr.f32.gmra.mrb[14].mxu0 %v3619_v2  ;;  %1066 = vmatprep.mubr.f32.mxu1 %v3623_v4  ;;  %v902_v57 = vld [vmem:[%s4815_s3 + $0x2d8] sm:$0xff] }
  0x6d   : > { %1291 = vmatprep.mubr.f32.mxu0 %v3630_v14  ;;  %2612 = vmatpush1.bf16.msra.mxu0 %v2611_v9  ;;  %v897_v9 = vld [vmem:[%s4815_s3 + $0x2b0] sm:$0xff]  ;;  %4894 = vst [vmem:[#allocation6_spill] sm:$0xff] %v3730_v11 }
  0x6e   : > { %2613 = vmatprep.subr.bf16.mxu0 %v4819_v3  ;;  %2740 = vmatpush1.bf16.msra.mxu1 %v3639_v17 }
  0x6f   : > { %1067 = vmatmul.mubr.f32.gmra.mrb[16].mxu1 %v3569_v45  ;;  %2725 = vmatprep.subr.bf16.mxu1 %v4819_v3  ;;  %v2617_v45 = vpack.c.bf16 %v894_v29, %v893_v28  ;;  %v900_v28 = vld [vmem:[%s4815_s3 + $0x2c8] sm:$0xff]  ;;  %v3763_v29 = vpack.c.bf16 %v930_v13, %v929_v12  ;;  %v3813_v12 = vld [vmem:[#allocation2 + $0xc0] sm:$0xff]  ;;  %v590_v13 = vrot.slane %v472_v53, 1 }
  0x70   : > { %1292 = vmatmul.mubr.f32.gmra.mrb[16].mxu0 %v3654_v6  ;;  %1071 = vmatprep.mubr.f32.mxu1 %v3657_v23  ;;  %v2626_v52 = vpack.c.bf16 %v900_v28, %v899_v27  ;;  %v935_v28 = vld [vmem:[%s4815_s3 + $0x3e0] sm:$0xff] }
  0x71   : > { %1296 = vmatprep.mubr.f32.mxu0 %v3632_v15  ;;  %2615 = vmatpush1.bf16.msra.mxu0 %v2614_v26  ;;  %v3753_v26 = vld [vmem:[#allocation2 + $0xb0] sm:$0xff]  ;;  %4896 = vst [vmem:[#allocation8_spill] sm:$0xff] %v3763_v29 }
  0x72   : > { %2616 = vmatprep.subr.bf16.mxu0 %v4819_v3  ;;  %2741 = vmatpush1.bf16.msra.mxu1 %v3668_v30  ;;  %v701_v1 = vrot.slane %v3753_v26, 2  ;;  %v3977_v30 = vld [vmem:[#allocation2 + $0x128] sm:$0xff] }
  0x73   : > { %1072 = vmatmul.mubr.f32.gmra.mrb[18].mxu1 %v3571_v47  ;;  %2726 = vmatprep.subr.bf16.mxu1 %v4819_v3  ;;  %v3718_v47 = vsel %vm551_vm0, %v578_v25, %v580_v44  ;;  %v2623_v25 = vpack.c.bf16 %v898_v10, %v897_v9  ;;  %v3781_v44 = vsel %vm551_vm0, %v583_v62, %v585_v22  ;;  %v3815_v22 = vld [vmem:[#allocation2 + $0xc8] sm:$0xff] }
  0x74   : > { %1297 = vmatmul.mubr.f32.gmra.mrb[18].mxu0 %v3684_v39  ;;  %1076 = vmatprep.mubr.f32.mxu1 %v3687_v40  ;;  %4893 = vst [vmem:[#allocation5_spill] sm:$0xff] %v3718_v47  ;;  %v3808_v9 = vsel %vm664_vm1, %v696_v21, %v698_v33  ;;  %v703_v33 = vrot.slane %v472_v53, 2  ;;  %v905_v53 = vld [vmem:[%s4815_s3 + $0x2f0] sm:$0xff]  ;;  %4918 = vst [vmem:[#allocation29_spill] sm:$0xff] %v3977_v30 }
  0x75   : > { %1301 = vmatprep.mubr.f32.mxu0 %v3689_v42  ;;  %2618 = vmatpush1.bf16.msra.mxu0 %v2617_v45  ;;  %v588_v45 = vrot.slane %v3753_v26, 1  ;;  %4899 = vst [vmem:[#allocation11_spill] sm:$0xff] %v3808_v9 }
  0x76   : > { %2619 = vmatprep.subr.bf16.mxu0 %v4819_v3  ;;  %2742 = vmatpush1.bf16.msra.mxu1 %v3701_v54 }
  0x77   : > { %1077 = vmatmul.mubr.f32.gmra.mrb[20].mxu1 %v3630_v14  ;;  %2727 = vmatprep.subr.bf16.mxu1 %v4819_v3  ;;  %v3748_v14 = vsel %vm551_vm0, %v582_v48, %v583_v62  ;;  %v933_v48 = vld [vmem:[%s4815_s3 + $0x3d0] sm:$0xff]  ;;  %v934_v62 = vld [vmem:[%s4815_s3 + $0x3d8] sm:$0xff]  ;;  %v3811_v10 = vsel %vm551_vm0, %v587_v34, %v588_v45  ;;  %v3842_v34 = vsel %vm551_vm0, %v588_v45, %v590_v13 }
  0x78   : > { %1302 = vmatmul.mubr.f32.gmra.mrb[20].mxu0 %v3714_v58  ;;  %1081 = vmatprep.mubr.f32.mxu1 %v3718_v47  ;;  %v3825_v27 = vpack.c.bf16 %v934_v62, %v933_v48  ;;  %v475_v48 = vld [vmem:[#allocation2 + $0xd0] sm:$0x3]  ;;  %v906_v45 = vld [vmem:[%s4815_s3 + $0x2f8] sm:$0xff]  ;;  %v3854_v62 = vpack.c.bf16 %v936_v31, %v935_v28  ;;  %v940_v28 = vld [vmem:[%s4815_s3 + $0x408] sm:$0xff] }
  0x79   : > { %1306 = vmatprep.mubr.f32.mxu0 %v3691_v51  ;;  %2621 = vmatpush1.bf16.msra.mxu0 %v2620_v0  ;;  %v700_v0 = vrot.slane %v3750_v20, 2  ;;  %v938_v13 = vld [vmem:[%s4815_s3 + $0x3f8] sm:$0xff]  ;;  %v3975_v47 = vld [vmem:[#allocation2 + $0x120] sm:$0xff] }
  0x7a   : > { %2622 = vmatprep.subr.bf16.mxu0 %v4819_v3  ;;  %2743 = vmatpush1.bf16.msra.mxu1 %v3730_v11  ;;  %4900 = vst [vmem:[#allocation12_spill] sm:$0xff] %v3825_v27  ;;  %4902 = vst [vmem:[#allocation14_spill] sm:$0xff] %v3854_v62  ;;  %v3947_v11 = vld [vmem:[#allocation2 + $0x108] sm:$0xff] }
  0x7b   : > { %1082 = vmatmul.mubr.f32.gmra.mrb[22].mxu1 %v3632_v15  ;;  %2728 = vmatprep.subr.bf16.mxu1 %v4819_v3  ;;  %v3778_v15 = vsel %vm664_vm1, %v695_v19, %v696_v21  ;;  %v2629_v19 = vpack.c.bf16 %v902_v57, %v901_v46  ;;  %v904_v21 = vld [vmem:[%s4815_s3 + $0x2e8] sm:$0xff]  ;;  %v3838_v32 = vsel %vm664_vm1, %v700_v0, %v701_v1  ;;  %v593_v46 = vrot.slane %v3815_v22, 1  ;;  %v937_v0 = vld [vmem:[%s4815_s3 + $0x3f0] sm:$0xff] }
  0x7c   : > { %1307 = vmatmul.mubr.f32.gmra.mrb[22].mxu0 %v3743_v16  ;;  %1086 = vmatprep.mubr.f32.mxu1 %v3748_v14  ;;  %4897 = vst [vmem:[#allocation9_spill] sm:$0xff] %v3778_v15  ;;  %4901 = vst [vmem:[#allocation13_spill] sm:$0xff] %v3838_v32  ;;  %v613_v16 = vrot.slane %v3977_v30, 1 }
  0x7d   : > { %1311 = vmatprep.mubr.f32.mxu0 %v3750_v20  ;;  %2624 = vmatpush1.bf16.msra.mxu0 %v2623_v25  ;;  %v903_v25 = vld [vmem:[%s4815_s3 + $0x2e0] sm:$0xff]  ;;  %4911 = vst [vmem:[#allocation22_spill] sm:$0xff] %v3947_v11  ;;  %4917 = vst [vmem:[#allocation28_spill] sm:$0xff] %v3975_v47 }
  0x7e   : > { %2625 = vmatprep.subr.bf16.mxu0 %v4819_v3  ;;  %2744 = vmatpush1.bf16.msra.mxu1 %v3763_v29  ;;  %v2632_v57 = vpack.c.bf16 %v904_v21, %v903_v25  ;;  %v705_v25 = vrot.slane %v3813_v12, 2  ;;  %v939_v21 = vld [vmem:[%s4815_s3 + $0x400] sm:$0xff]  ;;  %v4904_v29 = vmov 0.0|0.0  }
  0x7f   : > { %1087 = vmatmul.mubr.f32.gmra.mrb[24].mxu1 %v3689_v42  ;;  %2729 = vmatprep.subr.bf16.mxu1 %v4819_v3 }
  0x80   : > { %1312 = vmatmul.mubr.f32.gmra.mrb[24].mxu0 %v3778_v15  ;;  %1091 = vmatprep.mubr.f32.mxu1 %v3781_v44  ;;  %v484_v15 = vld [vmem:[#allocation2 + $0x118] sm:$0x3] }
  0x81   : > { %1316 = vmatprep.mubr.f32.mxu0 %v3753_v26  ;;  %2627 = vmatpush1.bf16.msra.mxu0 %v2626_v52  ;;  %v592_v52 = vrot.slane %v3813_v12, 1 }
  0x82   : > { %2628 = vmatprep.subr.bf16.mxu0 %v4819_v3  ;;  %2745 = vmatpush1.bf16.msra.mxu1 %v3792_v59  ;;  %v3883_v59 = vld [vmem:[#allocation2 + $0xe0] sm:$0xff] }
  0x83   : > { %1092 = vmatmul.mubr.f32.gmra.mrb[26].mxu1 %v3691_v51  ;;  %2730 = vmatprep.subr.bf16.mxu1 %v4819_v3  ;;  %v3878_v31 = vsel %vm551_vm0, %v592_v52, %v593_v46  ;;  %v3891_v52 = vpack.c.bf16 %v940_v28, %v939_v21  ;;  %v478_v21 = vld [vmem:[#allocation2 + $0xe8] sm:$0x3] }
  0x84   : > { %1317 = vmatmul.mubr.f32.gmra.mrb[26].mxu0 %v3808_v9  ;;  %1096 = vmatprep.mubr.f32.mxu1 %v3811_v10  ;;  %v600_v28 = vrot.slane %v478_v21, 1  ;;  %v3949_v9 = vld [vmem:[#allocation2 + $0x110] sm:$0xff] }
  0x85   : > { %1321 = vmatprep.mubr.f32.mxu0 %v3813_v12  ;;  %2630 = vmatpush1.bf16.msra.mxu0 %v2629_v19  ;;  %v3867_v19 = vsel %vm664_vm1, %v701_v1, %v703_v33  ;;  %v2635_v1 = vpack.c.bf16 %v906_v45, %v905_v53  ;;  %v3881_v33 = vld [vmem:[#allocation2 + $0xd8] sm:$0xff]  ;;  %4912 = vst [vmem:[#allocation23_spill] sm:$0xff] %v3949_v9  ;;  %v608_v54 = vrot.slane %v3949_v9, 1 }
  0x86   : > { %2631 = vmatprep.subr.bf16.mxu0 %v4819_v3  ;;  %2746 = vmatpush1.bf16.msra.mxu1 %v3825_v27  ;;  %4903 = vst [vmem:[#allocation15_spill] sm:$0xff] %v3867_v19  ;;  %v595_v27 = vrot.slane %v475_v48, 1 }
  0x87   : > { %1097 = vmatmul.mubr.f32.gmra.mrb[28].mxu1 %v3750_v20  ;;  %2731 = vmatprep.subr.bf16.mxu1 %v4819_v3  ;;  %v706_v3 = vrot.slane %v3815_v22, 2 }
  0x88   : > { %1322 = vmatmul.mubr.f32.gmra.mrb[28].mxu0 %v3838_v32  ;;  %1101 = vmatprep.mubr.f32.mxu1 %v3842_v34  ;;  %v3887_v32 = vpack.c.bf16 %v938_v13, %v937_v0  ;;  %v3900_v45 = vsel %vm551_vm0, %v593_v46, %v595_v27  ;;  %v597_v0 = vrot.slane %v3881_v33, 1  ;;  %v598_v13 = vrot.slane %v3883_v59, 1 }
  0x89   : > { %1326 = vmatprep.mubr.f32.mxu0 %v3815_v22  ;;  %2633 = vmatpush1.bf16.msra.mxu0 %v2632_v57  ;;  %v708_v57 = vrot.slane %v475_v48, 2  ;;  %v3897_v53 = vsel %vm664_vm1, %v705_v25, %v706_v3  ;;  %v710_v48 = vrot.slane %v3881_v33, 2  ;;  %v711_v25 = vrot.slane %v3883_v59, 2 }
  0x8a   : > { %2634 = vmatprep.subr.bf16.mxu0 %v4904_v29  ;;  %2747 = vmatpush1.bf16.msra.mxu1 %v3854_v62  ;;  %4905 = vst [vmem:[#allocation16_spill] sm:$0xff] %v3887_v32  ;;  %4906 = vst [vmem:[#allocation17_spill] sm:$0xff] %v3897_v53  ;;  %v3915_v46 = vsel %vm551_vm0, %v597_v0, %v598_v13  ;;  %v3931_v0 = vsel %vm551_vm0, %v598_v13, %v600_v28 }
  0x8b   : > { %1102 = vmatmul.mubr.f32.gmra.mrb[30].mxu1 %v3753_v26  ;;  %2732 = vmatprep.subr.bf16.mxu1 %v4904_v29  ;;  %v3911_v27 = vsel %vm664_vm1, %v706_v3, %v708_v57  ;;  %v713_v3 = vrot.slane %v478_v21, 2  ;;  %v3928_v57 = vsel %vm664_vm1, %v710_v48, %v711_v25 }
  0x8c   : > { %1327 = vmatmul.mubr.f32.gmra.mrb[30].mxu0 %v3867_v19  ;;  %1106 = vmatprep.mubr.f32.mxu1 %v3878_v31  ;;  %4907 = vst [vmem:[#allocation18_spill] sm:$0xff] %v3911_v27  ;;  %4909 = vst [vmem:[#allocation20_spill] sm:$0xff] %v3928_v57  ;;  %v481_v19 = vld [vmem:[#allocation2 + $0x100] sm:$0x3] }
  0x8d   : > { %1331 = vmatprep.mubr.f32.mxu0 %v3881_v33  ;;  %2636 = vmatpush1.bf16.msra.mxu0 %v2635_v1  ;;  %v3919_v1 = vld [vmem:[#allocation2 + $0xf0] sm:$0xff]  ;;  %v3941_v48 = vsel %vm664_vm1, %v711_v25, %v713_v3  ;;  %v607_v3 = vrot.slane %v3947_v11, 1 }
  0x8e   : > { %2748 = vmatpush1.bf16.msra.mxu1 %v3887_v32  ;;  %2637 = vmatprep.subr.bf16.mxu0 %v4904_v29  ;;  %v3921_v32 = vld [vmem:[#allocation2 + $0xf8] sm:$0xff]  ;;  %v602_v62 = vrot.slane %v3919_v1, 1  ;;  %v715_v21 = vrot.slane %v3919_v1, 2  ;;  %4910 = vst [vmem:[#allocation21_spill] sm:$0xff] %v3941_v48 }
  0x8f   : > { %1107 = vmatmul.mubr.f32.gmra.mrb[32].mxu1 %v3813_v12  ;;  %2686 = vmatprep.subr.bf16.mxu1 %v3891_v52  ;;  %4908 = vst [vmem:[#allocation19_spill] sm:$0xff] %v3921_v32  ;;  %v716_v28 = vrot.slane %v3921_v32, 2 }
  0x90   : > { %1332 = vmatmul.mubr.f32.gmra.mrb[32].mxu0 %v3897_v53  ;;  %1111 = vmatprep.mubr.f32.mxu1 %v3900_v45  ;;  %v603_v53 = vrot.slane %v3921_v32, 1 }
  0x91   : > { %1336 = vmatprep.mubr.f32.mxu0 %v3883_v59  ;;  %v3956_v25 = vsel %vm664_vm1, %v715_v21, %v716_v28 }
  0x92   : > { %v3944_v13 = vsel %vm551_vm0, %v602_v62, %v603_v53  ;;  %4913 = vst [vmem:[#allocation24_spill] sm:$0xff] %v3956_v25 }
  0x93   : > { %1112 = vmatmul.mubr.f32.gmra.mrb[34].mxu1 %v3815_v22 }
  0x94   : > { %1337 = vmatmul.mubr.f32.gmra.mrb[34].mxu0 %v3911_v27  ;;  %1116 = vmatprep.mubr.f32.mxu1 %v3915_v46  ;;  %v605_v27 = vrot.slane %v481_v19, 1 }
  0x95   : > { %1341 = vmatprep.mubr.f32.mxu0 %v3919_v1 }
  0x96   : > { %v3959_v62 = vsel %vm551_vm0, %v603_v53, %v605_v27  ;;  %v3972_v53 = vsel %vm551_vm0, %v607_v3, %v608_v54  ;;  %v721_v27 = vrot.slane %v3949_v9, 2  ;;  %v612_v3 = vrot.slane %v3975_v47, 1 }
  0x97   : > { %1117 = vmatmul.mubr.f32.gmra.mrb[36].mxu1 %v3881_v33  ;;  %4914 = vst [vmem:[#allocation25_spill] sm:$0xff] %v3959_v62  ;;  %4916 = vst [vmem:[#allocation27_spill] sm:$0xff] %v3972_v53 }
  0x98   : > { %1342 = vmatmul.mubr.f32.gmra.mrb[36].mxu0 %v3928_v57  ;;  %1121 = vmatprep.mubr.f32.mxu1 %v3931_v0  ;;  %v718_v57 = vrot.slane %v481_v19, 2  ;;  %v720_v19 = vrot.slane %v3947_v11, 2 }
  0x99   : > { %1346 = vmatprep.mubr.f32.mxu0 %v3921_v32 }
  0x9a   : > { %v3969_v21 = vsel %vm664_vm1, %v716_v28, %v718_v57  ;;  %v3984_v57 = vsel %vm664_vm1, %v720_v19, %v721_v27 }
  0x9b   : > { %1122 = vmatmul.mubr.f32.gmra.mrb[38].mxu1 %v3883_v59  ;;  %4915 = vst [vmem:[#allocation26_spill] sm:$0xff] %v3969_v21  ;;  %4919 = vst [vmem:[#allocation30_spill] sm:$0xff] %v3984_v57 }
  0x9c   : > { %1347 = vmatmul.mubr.f32.gmra.mrb[38].mxu0 %v3941_v48  ;;  %1126 = vmatprep.mubr.f32.mxu1 %v3944_v13  ;;  %v610_v48 = vrot.slane %v484_v15, 1 }
  0x9d   : > { %1351 = vmatprep.mubr.f32.mxu0 %v3947_v11 }
  0x9e   : > { %v3987_v28 = vsel %vm551_vm0, %v608_v54, %v610_v48  ;;  %v4000_v54 = vsel %vm551_vm0, %v612_v3, %v613_v16  ;;  %v726_v48 = vrot.slane %v3977_v30, 2 }
  0x9f   : > { %1127 = vmatmul.mubr.f32.gmra.mrb[40].mxu1 %v3919_v1  ;;  %4920 = vst [vmem:[#allocation31_spill] sm:$0xff] %v3987_v28  ;;  %4922 = vst [vmem:[#allocation33_spill] sm:$0xff] %v4000_v54 }
  0xa0   : > { %1352 = vmatmul.mubr.f32.gmra.mrb[40].mxu0 %v3956_v25  ;;  %1131 = vmatprep.mubr.f32.mxu1 %v3959_v62  ;;  %v723_v25 = vrot.slane %v484_v15, 2  ;;  %v487_v62 = vld [vmem:[#allocation2 + $0x130] sm:$0x3]  ;;  %v725_v15 = vrot.slane %v3975_v47, 2 }
  0xa1   : > { %1356 = vmatprep.mubr.f32.mxu0 %v3949_v9 }
  0xa2   : > { %v3997_v19 = vsel %vm664_vm1, %v721_v27, %v723_v25  ;;  %v4012_v25 = vsel %vm664_vm1, %v725_v15, %v726_v48 }
  0xa3   : > { %1132 = vmatmul.mubr.f32.gmra.mrb[42].mxu1 %v3921_v32  ;;  %4921 = vst [vmem:[#allocation32_spill] sm:$0xff] %v3997_v19  ;;  %4924 = vst [vmem:[#allocation35_spill] sm:$0xff] %v4012_v25  ;;  %v490_v32 = vld [vmem:[#allocation2 + $0x148] sm:$0x3] }
  0xa4   : > { %1357 = vmatmul.mubr.f32.gmra.mrb[42].mxu0 %v3969_v21  ;;  %1136 = vmatprep.mubr.f32.mxu1 %v3972_v53  ;;  %v615_v21 = vrot.slane %v487_v62, 1  ;;  %v4003_v53 = vld [vmem:[#allocation2 + $0x138] sm:$0xff] }
  0xa5   : > { %1361 = vmatprep.mubr.f32.mxu0 %v3975_v47  ;;  %4923 = vst [vmem:[#allocation34_spill] sm:$0xff] %v4003_v53  ;;  %v617_v3 = vrot.slane %v4003_v53, 1 }
  0xa6   : > { %v4015_v27 = vsel %vm551_vm0, %v613_v16, %v615_v21  ;;  %v730_v16 = vrot.slane %v4003_v53, 2 }
  0xa7   : > { %1137 = vmatmul.mubr.f32.gmra.mrb[44].mxu1 %v3947_v11  ;;  %v4005_v11 = vld [vmem:[#allocation2 + $0x140] sm:$0xff]  ;;  %4925 = vst [vmem:[#allocation36_spill] sm:$0xff] %v4015_v27 }
  0xa8   : > { %1362 = vmatmul.mubr.f32.gmra.mrb[44].mxu0 %v3984_v57  ;;  %1141 = vmatprep.mubr.f32.mxu1 %v3987_v28  ;;  %v728_v57 = vrot.slane %v487_v62, 2  ;;  %v618_v28 = vrot.slane %v4005_v11, 1  ;;  %v731_v21 = vrot.slane %v4005_v11, 2 }
  0xa9   : > { %1366 = vmatprep.mubr.f32.mxu0 %v3977_v30 }
  0xaa   : > { %v4023_v62 = vsel %vm664_vm1, %v726_v48, %v728_v57  ;;  %v4027_v15 = vsel %vm551_vm0, %v617_v3, %v618_v28  ;;  %v733_v57 = vrot.slane %v490_v32, 2  ;;  %v4040_v48 = vsel %vm664_vm1, %v730_v16, %v731_v21 }
  0xab   : > { %1142 = vmatmul.mubr.f32.gmra.mrb[46].mxu1 %v3949_v9  ;;  %4926 = vst [vmem:[#allocation37_spill] sm:$0xff] %v4023_v62  ;;  %4927 = vst [vmem:[#allocation38_spill] sm:$0xff] %v4027_v15  ;;  %v493_v9 = vld [vmem:[#allocation2 + $0x160] sm:$0x3] }
  0xac   : > { %1367 = vmatmul.mubr.f32.gmra.mrb[46].mxu0 %v3997_v19  ;;  %1146 = vmatprep.mubr.f32.mxu1 %v4000_v54  ;;  %v620_v19 = vrot.slane %v490_v32, 1  ;;  %v4031_v54 = vld [vmem:[#allocation2 + $0x150] sm:$0xff]  ;;  %4928 = vst [vmem:[#allocation39_spill] sm:$0xff] %v4040_v48  ;;  %v4051_v32 = vsel %vm664_vm1, %v731_v21, %v733_v57  ;;  %v738_v21 = vrot.slane %v493_v9, 2 }
  0xad   : > { %1371 = vmatprep.mubr.f32.mxu0 %v4003_v53  ;;  %4930 = vst [vmem:[#allocation41_spill] sm:$0xff] %v4051_v32 }
  0xae   : > { %v4043_v3 = vsel %vm551_vm0, %v618_v28, %v620_v19  ;;  %v735_v28 = vrot.slane %v4031_v54, 2 }
  0xaf   : > { %1147 = vmatmul.mubr.f32.gmra.mrb[48].mxu1 %v3975_v47  ;;  %v4033_v47 = vld [vmem:[#allocation2 + $0x158] sm:$0xff]  ;;  %4929 = vst [vmem:[#allocation40_spill] sm:$0xff] %v4043_v3 }
  0xb0   : > { %1372 = vmatmul.mubr.f32.gmra.mrb[48].mxu0 %v4012_v25  ;;  %1151 = vmatprep.mubr.f32.mxu1 %v4015_v27  ;;  %v622_v25 = vrot.slane %v4031_v54, 1  ;;  %v623_v27 = vrot.slane %v4033_v47, 1  ;;  %v736_v19 = vrot.slane %v4033_v47, 2 }
  0xb1   : > { %1376 = vmatprep.mubr.f32.mxu0 %v4005_v11 }
  0xb2   : > { %v4055_v16 = vsel %vm551_vm0, %v622_v25, %v623_v27  ;;  %v4068_v25 = vsel %vm664_vm1, %v735_v28, %v736_v19 }
  0xb3   : > { %1152 = vmatmul.mubr.f32.gmra.mrb[50].mxu1 %v3977_v30  ;;  %4931 = vst [vmem:[#allocation42_spill] sm:$0xff] %v4055_v16  ;;  %4932 = vst [vmem:[#allocation43_spill] sm:$0xff] %v4068_v25  ;;  %v496_v30 = vld [vmem:[#allocation2 + $0x178] sm:$0x3] }
  0xb4   : > { %1377 = vmatmul.mubr.f32.gmra.mrb[50].mxu0 %v4023_v62  ;;  %1156 = vmatprep.mubr.f32.mxu1 %v4027_v15  ;;  %v625_v62 = vrot.slane %v493_v9, 1  ;;  %v4059_v15 = vld [vmem:[#allocation2 + $0x168] sm:$0xff]  ;;  %v4079_v9 = vsel %vm664_vm1, %v736_v19, %v738_v21  ;;  %v743_v21 = vrot.slane %v496_v30, 2 }
  0xb5   : > { %1381 = vmatprep.mubr.f32.mxu0 %v4031_v54  ;;  %4933 = vst [vmem:[#allocation44_spill] sm:$0xff] %v4079_v9 }
  0xb6   : > { %v4071_v57 = vsel %vm551_vm0, %v623_v27, %v625_v62  ;;  %v740_v27 = vrot.slane %v4059_v15, 2 }
  0xb7   : > { %1157 = vmatmul.mubr.f32.gmra.mrb[52].mxu1 %v4003_v53  ;;  %v4061_v53 = vld [vmem:[#allocation2 + $0x170] sm:$0xff] }
  0xb8   : > { %1382 = vmatmul.mubr.f32.gmra.mrb[52].mxu0 %v4040_v48  ;;  %1161 = vmatprep.mubr.f32.mxu1 %v4043_v3  ;;  %v627_v48 = vrot.slane %v4059_v15, 1  ;;  %v628_v3 = vrot.slane %v4061_v53, 1  ;;  %v741_v62 = vrot.slane %v4061_v53, 2 }
  0xb9   : > { %1386 = vmatprep.mubr.f32.mxu0 %v4033_v47 }
  0xba   : > { %v4083_v28 = vsel %vm551_vm0, %v627_v48, %v628_v3  ;;  %v4094_v19 = vsel %vm664_vm1, %v740_v27, %v741_v62  ;;  %v943_v27 = vld [vmem:[%s4815_s3 + $0x420] sm:$0xff] }
  0xbb   : > { %1162 = vmatmul.mubr.f32.gmra.mrb[54].mxu1 %v4005_v11 }
  0xbc   : > { %1387 = vmatmul.mubr.f32.gmra.mrb[54].mxu0 %v4051_v32  ;;  %1166 = vmatprep.mubr.f32.mxu1 %v4055_v16  ;;  %v630_v32 = vrot.slane %v496_v30, 1  ;;  %v4087_v16 = vld [vmem:[#allocation2 + $0x180] sm:$0xff]  ;;  %v941_v30 = vld [vmem:[%s4815_s3 + $0x410] sm:$0xff] }
  0xbd   : > { %1391 = vmatprep.mubr.f32.mxu0 %v4059_v15 }
  0xbe   : > { %v4097_v48 = vsel %vm551_vm0, %v628_v3, %v630_v32  ;;  %v942_v3 = vld [vmem:[%s4815_s3 + $0x418] sm:$0xff] }
  0xbf   : > { %1167 = vmatmul.mubr.f32.gmra.mrb[56].mxu1 %v4031_v54  ;;  %v2689_v32 = vpack.c.bf16 %v942_v3, %v941_v30  ;;  %v4940_v30 = vld [vmem:[#allocation9_spill] sm:$0xff]  ;;  %v4941_v3 = vld [vmem:[#allocation4_spill] sm:$0xff] }
  0xc0   : > { %1392 = vmatmul.mubr.f32.gmra.mrb[56].mxu0 %v4068_v25  ;;  %1171 = vmatprep.mubr.f32.mxu1 %v4071_v57  ;;  %v4099_v25 = vld [vmem:[#allocation2 + $0x188] sm:$0xff] }
  0xc1   : > { %1396 = vmatprep.mubr.f32.mxu0 %v4061_v53 }
  0xc3   : > { %1172 = vmatmul.mubr.f32.gmra.mrb[58].mxu1 %v4033_v47 }
  0xc4   : > { %1397 = vmatmul.mubr.f32.gmra.mrb[58].mxu0 %v4079_v9  ;;  %1176 = vmatprep.mubr.f32.mxu1 %v4083_v28  ;;  %v4106_v9 = vsel %vm664_vm1, %v741_v62, %v743_v21  ;;  %v944_v62 = vld [vmem:[%s4815_s3 + $0x428] sm:$0xff]  ;;  %v954_v21 = vld [vmem:[%s4815_s3 + $0x478] sm:$0xff] }
  0xc5   : > { %1401 = vmatprep.mubr.f32.mxu0 %v4087_v16 }
  0xc7   : > { %1177 = vmatmul.mubr.f32.gmra.mrb[60].mxu1 %v4059_v15 }
  0xc8   : > { %1402 = vmatmul.mubr.f32.gmra.mrb[60].mxu0 %v4094_v19  ;;  %1181 = vmatprep.mubr.f32.mxu1 %v4097_v48 }
  0xc9   : > { %1406 = vmatprep.mubr.f32.mxu0 %v4099_v25 }
  0xcb   : > { %1182 = vmatmul.mubr.f32.gmra.mrb[62].mxu1 %v4061_v53 }
  0xcc   : > { %1407 = vmatmul.mubr.f32.gmra.mrb[62].mxu0 %v4106_v9  ;;  %1741 = vmatprep.mubr.f32.mxu1 %v3748_v14 }
  0xcd   : > { %1476 = vmatprep.mubr.f32.mxu0 %v3445_v8  ;;  %v945_v8 = vld [vmem:[%s4815_s3 + $0x430] sm:$0xff] }
  0xcf   : > { %1742 = vmatmul.mubr.f32.vlgmr.msra.gmra.mrb[64].mxu1 %v3689_v42  ;;  %v948_v42 = vld [vmem:[%s4815_s3 + $0x448] sm:$0xff] }
  0xd0   : > { %1477 = vmatmul.mubr.f32.vlgmr.msra.gmra.mrb[0].mxu0 %v3415_v43  ;;  %1746 = vmatprep.mubr.f32.mxu1 %v3781_v44  ;;  %v2693_v43 = vpack.c.bf16 %v944_v62, %v943_v27  ;;  %v4944_v27 = vld [vmem:[#allocation11_spill] sm:$0xff]  ;;  %v4945_v62 = vld [vmem:[#allocation6_spill] sm:$0xff] }
  0xd1   : > { %2639 = vmatpush1.bf16.msra.mxu0 %v3400_v24  ;;  %1481 = vmatprep.mubr.f32.mxu0 %v3479_v60  ;;  %v946_v24 = vld [vmem:[%s4815_s3 + $0x438] sm:$0xff]  ;;  %v947_v60 = vld [vmem:[%s4815_s3 + $0x440] sm:$0xff] }
  0xd2   : > { %2640 = vmatprep.subr.bf16.mxu0 %v4904_v29  ;;  %2688 = vmatpush3.bf16.msra.mxu1 %v3891_v52  ;;  %v952_v52 = vld [vmem:[%s4815_s3 + $0x468] sm:$0xff] }
  0xd3   : > { %1747 = vmatmul.mubr.f32.gmra.mrb[66].mxu1 %v3691_v51  ;;  %2690 = vmatprep.subr.bf16.mxu1 %v2689_v32  ;;  %v949_v51 = vld [vmem:[%s4815_s3 + $0x450] sm:$0xff] }
  0xd4   : > { %1482 = vmatmul.mubr.f32.gmra.mrb[2].mxu0 %v3448_v49  ;;  %1751 = vmatprep.mubr.f32.mxu1 %v3811_v10  ;;  %v2697_v49 = vpack.c.bf16 %v946_v24, %v945_v8  ;;  %v4947_v8 = vld [vmem:[#allocation33_spill] sm:$0xff] }
  0xd5   : > { %1486 = vmatprep.mubr.f32.mxu0 %v3513_v5  ;;  %2642 = vmatpush1.bf16.msra.mxu0 %v3431_v38  ;;  %v2701_v38 = vpack.c.bf16 %v948_v42, %v947_v60  ;;  %v4948_v24 = vld [vmem:[#allocation13_spill] sm:$0xff]  ;;  %v4951_v60 = vld [vmem:[#allocation36_spill] sm:$0xff]  ;;  %v4952_v42 = vld [vmem:[#allocation15_spill] sm:$0xff] }
  0xd6   : > { %2643 = vmatprep.subr.bf16.mxu0 %v4904_v29  ;;  %2692 = vmatpush3.bf16.msra.mxu1 %v2689_v32  ;;  %v4943_v32 = vld [vmem:[#allocation31_spill] sm:$0xff] }
  0xd7   : > { %1752 = vmatmul.mubr.f32.gmra.mrb[68].mxu1 %v3750_v20  ;;  %2694 = vmatprep.subr.bf16.mxu1 %v2693_v43  ;;  %v950_v20 = vld [vmem:[%s4815_s3 + $0x458] sm:$0xff] }
  0xd8   : > { %1487 = vmatmul.mubr.f32.gmra.mrb[4].mxu0 %v3482_v61  ;;  %1756 = vmatprep.mubr.f32.mxu1 %v3842_v34 }
  0xd9   : > { %1491 = vmatprep.mubr.f32.mxu0 %v3556_v35  ;;  %2645 = vmatpush1.bf16.msra.mxu0 %v3462_v55  ;;  %v2705_v55 = vpack.c.bf16 %v950_v20, %v949_v51  ;;  %v4955_v51 = vld [vmem:[#allocation38_spill] sm:$0xff]  ;;  %v4956_v20 = vld [vmem:[#allocation17_spill] sm:$0xff] }
  0xda   : > { %2646 = vmatprep.subr.bf16.mxu0 %v4904_v29  ;;  %2696 = vmatpush3.bf16.msra.mxu1 %v2693_v43  ;;  %v4946_v43 = vld [vmem:[#allocation23_spill] sm:$0xff] }
  0xdb   : > { %1757 = vmatmul.mubr.f32.gmra.mrb[70].mxu1 %v3753_v26  ;;  %2698 = vmatprep.subr.bf16.mxu1 %v2697_v49  ;;  %v951_v26 = vld [vmem:[%s4815_s3 + $0x460] sm:$0xff] }
  0xdc   : > { %1492 = vmatmul.mubr.f32.gmra.mrb[6].mxu0 %v3525_v18  ;;  %1761 = vmatprep.mubr.f32.mxu1 %v3878_v31 }
  0xdd   : > { %1496 = vmatprep.mubr.f32.mxu0 %v3591_v37  ;;  %2648 = vmatpush1.bf16.msra.mxu0 %v3498_v7  ;;  %v2709_v7 = vpack.c.bf16 %v952_v52, %v951_v26  ;;  %v4959_v26 = vld [vmem:[#allocation40_spill] sm:$0xff]  ;;  %v4960_v52 = vld [vmem:[#allocation18_spill] sm:$0xff] }
  0xde   : > { %2649 = vmatprep.subr.bf16.mxu0 %v4904_v29  ;;  %2700 = vmatpush3.bf16.msra.mxu1 %v2697_v49  ;;  %v4949_v49 = vld [vmem:[#allocation8_spill] sm:$0xff] }
  0xdf   : > { %1762 = vmatmul.mubr.f32.gmra.mrb[72].mxu1 %v3813_v12  ;;  %2702 = vmatprep.subr.bf16.mxu1 %v2701_v38  ;;  %v953_v12 = vld [vmem:[%s4815_s3 + $0x470] sm:$0xff] }
  0xe0   : > { %1497 = vmatmul.mubr.f32.gmra.mrb[8].mxu0 %v3559_v36  ;;  %1766 = vmatprep.mubr.f32.mxu1 %v3900_v45 }
  0xe1   : > { %1501 = vmatprep.mubr.f32.mxu0 %v3619_v2  ;;  %2651 = vmatpush1.bf16.msra.mxu0 %v3535_v41  ;;  %v2713_v41 = vpack.c.bf16 %v954_v21, %v953_v12  ;;  %v4963_v12 = vld [vmem:[#allocation20_spill] sm:$0xff] }
  0xe2   : > { %2652 = vmatprep.subr.bf16.mxu0 %v4904_v29  ;;  %2704 = vmatpush3.bf16.msra.mxu1 %v2701_v38  ;;  %v4953_v38 = vld [vmem:[#allocation10_spill] sm:$0xff]  ;;  %v4964_v21 = vld [vmem:[#allocation16_spill] sm:$0xff] }
  0xe3   : > { %1767 = vmatmul.mubr.f32.gmra.mrb[74].mxu1 %v3815_v22  ;;  %2706 = vmatprep.subr.bf16.mxu1 %v2705_v55  ;;  %v4937_v22 = vld [vmem:[#allocation19_spill] sm:$0xff] }
  0xe4   : > { %1502 = vmatmul.mubr.f32.gmra.mrb[10].mxu0 %v3594_v56  ;;  %1771 = vmatprep.mubr.f32.mxu1 %v3915_v46 }
  0xe5   : > { %1506 = vmatprep.mubr.f32.mxu0 %v3654_v6  ;;  %2654 = vmatpush1.bf16.msra.mxu0 %v3575_v50  ;;  %v4934_v50 = vld [vmem:[#allocation25_spill] sm:$0xff] }
  0xe6   : > { %2655 = vmatprep.subr.bf16.mxu0 %v4904_v29  ;;  %2708 = vmatpush3.bf16.msra.mxu1 %v2705_v55  ;;  %v4957_v55 = vld [vmem:[#allocation12_spill] sm:$0xff] }
  0xe7   : > { %1772 = vmatmul.mubr.f32.gmra.mrb[76].mxu1 %v3881_v33  ;;  %2710 = vmatprep.subr.bf16.mxu1 %v2709_v7  ;;  %v4938_v33 = vld [vmem:[#allocation5_spill] sm:$0xff] }
  0xe8   : > { %1507 = vmatmul.mubr.f32.gmra.mrb[12].mxu0 %v3623_v4  ;;  %1776 = vmatprep.mubr.f32.mxu1 %v3931_v0 }
  0xe9   : > { %1511 = vmatprep.mubr.f32.mxu0 %v3684_v39  ;;  %2657 = vmatpush1.bf16.msra.mxu0 %v3606_v63  ;;  %v4935_v63 = vld [vmem:[#allocation7_spill] sm:$0xff] }
  0xea   : > { %2658 = vmatprep.subr.bf16.mxu0 %v4904_v29  ;;  %2712 = vmatpush3.bf16.msra.mxu1 %v2709_v7  ;;  %v4961_v7 = vld [vmem:[#allocation14_spill] sm:$0xff] }
  0xeb   : > { %1777 = vmatmul.mubr.f32.gmra.mrb[78].mxu1 %v3883_v59  ;;  %2714 = vmatprep.subr.bf16.mxu1 %v2713_v41  ;;  %v4936_v59 = vld [vmem:[#allocation3_spill] sm:$0xff] }
  0xec   : > { %1512 = vmatmul.mubr.f32.gmra.mrb[14].mxu0 %v3657_v23  ;;  %1781 = vmatprep.mubr.f32.mxu1 %v3944_v13 }
  0xed   : > { %1516 = vmatprep.mubr.f32.mxu0 %v3714_v58  ;;  %2660 = vmatpush1.bf16.msra.mxu0 %v3639_v17  ;;  %v4939_v17 = vld [vmem:[#allocation27_spill] sm:$0xff] }
  0xee   : > { %2661 = vmatprep.subr.bf16.mxu0 %v4904_v29  ;;  %2716 = vmatpush3.bf16.msra.mxu1 %v2713_v41  ;;  %v4260_v41 = vld [vmem:[#allocation2 + $0x190] sm:$0x3] }
  0xef   : > { %1782 = vmatmul.mubr.f32.gmra.mrb[80].mxu1 %v3919_v1  ;;  %v4942_v1 = vld [vmem:[#allocation22_spill] sm:$0xff] }
  0xf0   : > { %1517 = vmatmul.mubr.f32.gmra.mrb[16].mxu0 %v3687_v40  ;;  %1786 = vmatprep.mubr.f32.mxu1 %v4934_v50 }
  0xf1   : > { %1521 = vmatprep.mubr.f32.mxu0 %v4935_v63  ;;  %2663 = vmatpush1.bf16.msra.mxu0 %v4936_v59 }
  0xf2   : > { %2664 = vmatprep.subr.bf16.mxu0 %v4904_v29 }
  0xf3   : > { %1787 = vmatmul.mubr.f32.gmra.mrb[82].mxu1 %v4937_v22  ;;  %v4280_v22 = vld [vmem:[#allocation2 + $0x8] sm:$0xff] }
  0xf4   : > { %1522 = vmatmul.mubr.f32.gmra.mrb[18].mxu0 %v4938_v33  ;;  %1791 = vmatprep.mubr.f32.mxu1 %v4939_v17 }
  0xf5   : > { %1526 = vmatprep.mubr.f32.mxu0 %v4940_v30  ;;  %2666 = vmatpush1.bf16.msra.mxu0 %v4941_v3  ;;  %v798_v3 = vrot.slane %v4280_v22, 1 }
  0xf6   : > { %2667 = vmatprep.subr.bf16.mxu0 %v4904_v29 }
  0xf7   : > { %1792 = vmatmul.mubr.f32.gmra.mrb[84].mxu1 %v4942_v1  ;;  %v4283_v1 = vld [vmem:[#allocation2 + $0x1a8] sm:$0x3] }
  0xf8   : > { %1527 = vmatmul.mubr.f32.gmra.mrb[20].mxu0 %v3748_v14  ;;  %1796 = vmatprep.mubr.f32.mxu1 %v4943_v32  ;;  %v4950_v14 = vld [vmem:[#allocation28_spill] sm:$0xff] }
  0xf9   : > { %1531 = vmatprep.mubr.f32.mxu0 %v4944_v27  ;;  %2669 = vmatpush1.bf16.msra.mxu0 %v4945_v62  ;;  %v800_v62 = vrot.slane %v4283_v1, 1 }
  0xfa   : > { %2670 = vmatprep.subr.bf16.mxu0 %v4904_v29 }
  0xfb   : > { %1797 = vmatmul.mubr.f32.gmra.mrb[86].mxu1 %v4946_v43 }
  0xfc   : > { %1532 = vmatmul.mubr.f32.gmra.mrb[22].mxu0 %v3781_v44  ;;  %1801 = vmatprep.mubr.f32.mxu1 %v4947_v8  ;;  %v4954_v44 = vld [vmem:[#allocation29_spill] sm:$0xff] }
  0xfd   : > { %1536 = vmatprep.mubr.f32.mxu0 %v4948_v24  ;;  %2672 = vmatpush1.bf16.msra.mxu0 %v4949_v49 }
  0xfe   : > { %2673 = vmatprep.subr.bf16.mxu0 %v4904_v29 }
  0xff   : > { %1802 = vmatmul.mubr.f32.gmra.mrb[88].mxu1 %v4950_v14  ;;  %v4970_v14 = vld [vmem:[#allocation35_spill] sm:$0xff] }
 0x100   : > { %1537 = vmatmul.mubr.f32.gmra.mrb[24].mxu0 %v3811_v10  ;;  %1806 = vmatprep.mubr.f32.mxu1 %v4951_v60  ;;  %v4958_v10 = vld [vmem:[#allocation34_spill] sm:$0xff] }
 0x101   : > { %1541 = vmatprep.mubr.f32.mxu0 %v4952_v42  ;;  %2675 = vmatpush1.bf16.msra.mxu0 %v4953_v38 }
 0x102   : > { %2676 = vmatprep.subr.bf16.mxu0 %v4904_v29 }
 0x103   : > { %1807 = vmatmul.mubr.f32.gmra.mrb[90].mxu1 %v4954_v44 }
 0x104   : > { %1542 = vmatmul.mubr.f32.gmra.mrb[26].mxu0 %v3842_v34  ;;  %1811 = vmatprep.mubr.f32.mxu1 %v4955_v51  ;;  %v4962_v34 = vld [vmem:[#allocation42_spill] sm:$0xff] }
 0x105   : > { %1546 = vmatprep.mubr.f32.mxu0 %v4956_v20  ;;  %2678 = vmatpush1.bf16.msra.mxu0 %v4957_v55  ;;  %v4971_v55 = vld [vmem:[#allocation37_spill] sm:$0xff] }
 0x106   : > { %2679 = vmatprep.subr.bf16.mxu0 %v4904_v29 }
 0x107   : > { %1812 = vmatmul.mubr.f32.gmra.mrb[92].mxu1 %v4958_v10 }
 0x108   : > { %1547 = vmatmul.mubr.f32.gmra.mrb[28].mxu0 %v3878_v31  ;;  %1816 = vmatprep.mubr.f32.mxu1 %v4959_v26  ;;  %v4965_v31 = vld [vmem:[#allocation21_spill] sm:$0xff] }
 0x109   : > { %1551 = vmatprep.mubr.f32.mxu0 %v4960_v52  ;;  %2681 = vmatpush1.bf16.msra.mxu0 %v4961_v7  ;;  %v4972_v7 = vld [vmem:[#allocation39_spill] sm:$0xff] }
 0x10a   : > { %2682 = vmatprep.subr.bf16.mxu0 %v4904_v29  ;;  %v780_v29 = vrot.slane %v4087_v16, 1 }
 0x10b   : > { %1817 = vmatmul.mubr.f32.gmra.mrb[94].mxu1 %v4005_v11  ;;  %v4966_v11 = vld [vmem:[#allocation24_spill] sm:$0xff] }
 0x10c   : > { %1552 = vmatmul.mubr.f32.gmra.mrb[30].mxu0 %v3900_v45  ;;  %1821 = vmatprep.mubr.f32.mxu1 %v4962_v34  ;;  %v781_v45 = vrot.slane %v4099_v25, 1 }
 0x10d   : > { %1556 = vmatprep.mubr.f32.mxu0 %v4963_v12  ;;  %2684 = vmatpush1.bf16.msra.mxu0 %v4964_v21 }
 0x10f   : > { %1822 = vmatmul.mubr.f32.gmra.mrb[96].mxu1 %v4031_v54  ;;  %v4270_v54 = vld [vmem:[#allocation2 + $0x198] sm:$0xff] }
 0x110   : > { %1557 = vmatmul.mubr.f32.gmra.mrb[32].mxu0 %v3915_v46  ;;  %1826 = vmatprep.mubr.f32.mxu1 %v4071_v57  ;;  %v4967_v46 = vld [vmem:[#allocation26_spill] sm:$0xff]  ;;  %v797_v59 = vrot.slane %v4270_v54, 1 }
 0x111   : > { %1561 = vmatprep.mubr.f32.mxu0 %v4965_v31 }
 0x113   : > { %1827 = vmatmul.mubr.f32.gmra.mrb[98].mxu1 %v4033_v47  ;;  %v4267_v47 = vsel %vm551_vm0, %v780_v29, %v781_v45 }
 0x114   : > { %1562 = vmatmul.mubr.f32.gmra.mrb[34].mxu0 %v3931_v0  ;;  %1831 = vmatprep.mubr.f32.mxu1 %v4083_v28  ;;  %v783_v0 = vrot.slane %v4260_v41, 1 }
 0x115   : > { %1566 = vmatprep.mubr.f32.mxu0 %v4966_v11 }
 0x117   : > { %1832 = vmatmul.mubr.f32.gmra.mrb[100].mxu1 %v4059_v15  ;;  %v4968_v15 = vld [vmem:[#allocation30_spill] sm:$0xff] }
 0x118   : > { %1567 = vmatmul.mubr.f32.gmra.mrb[36].mxu0 %v3944_v13  ;;  %1836 = vmatprep.mubr.f32.mxu1 %v4097_v48  ;;  %v4277_v13 = vsel %vm551_vm0, %v781_v45, %v783_v0 }
 0x119   : > { %1571 = vmatprep.mubr.f32.mxu0 %v4967_v46 }
 0x11b   : > { %1837 = vmatmul.mubr.f32.gmra.mrb[102].mxu1 %v4061_v53  ;;  %v4969_v53 = vld [vmem:[#allocation32_spill] sm:$0xff] }
 0x11c   : > { %1572 = vmatmul.mubr.f32.gmra.mrb[38].mxu0 %v4934_v50  ;;  %1841 = vmatprep.mubr.f32.mxu1 %v4267_v47  ;;  %v799_v50 = vsel %vm551_vm0, %v797_v59, %v798_v3  ;;  %v805_v59 = vrot.slane %v4280_v22, 2 }
 0x11d   : > { %1576 = vmatprep.mubr.f32.mxu0 %v4968_v15 }
 0x11f   : > { %1842 = vmatmul.mubr.f32.gmra.mrb[104].mxu1 %v4087_v16 }
 0x120   : > { %1577 = vmatmul.mubr.f32.gmra.mrb[40].mxu0 %v4939_v17  ;;  %1846 = vmatprep.mubr.f32.mxu1 %v4277_v13  ;;  %v801_v17 = vsel %vm551_vm0, %v798_v3, %v800_v62 }
 0x121   : > { %1581 = vmatprep.mubr.f32.mxu0 %v4969_v53 }
 0x122   : > { %v4291_v43 = vpop.f32.mrb[0].mxu1 }
 0x123   : > { %1847 = vmatmul.mubr.f32.gmra.mrb[106].mxu1 %v4099_v25  ;;  %v1030_v49 = vpop.f32.mrb[1].mxu1 }
 0x124   : > { %1582 = vmatmul.mubr.f32.gmra.mrb[42].mxu0 %v4943_v32  ;;  %1851 = vmatprep.mubr.f32.mxu1 %v799_v50  ;;  %v807_v50 = vrot.slane %v4283_v1, 2  ;;  %v2935_v1 = vld [vmem:[#allocation2 + $0x80] sm:$0xff] }
 0x125   : > { %1586 = vmatprep.mubr.f32.mxu0 %v4970_v14 }
 0x126   : > { %v4297_v38 = vpop.f32.mrb[2].mxu1 }
 0x127   : > { %1852 = vmatmul.mubr.f32.gmra.mrb[108].mxu1 %v4270_v54  ;;  %v1035_v44 = vpop.f32.mrb[3].mxu1 }
 0x128   : > { %1587 = vmatmul.mubr.f32.gmra.mrb[44].mxu0 %v4947_v8  ;;  %1856 = vmatprep.mubr.f32.mxu1 %v801_v17  ;;  %v4973_v8 = vld [vmem:[#allocation41_spill] sm:$0xff] }
 0x129   : > { %1591 = vmatprep.mubr.f32.mxu0 %v4971_v55 }
 0x12a   : > { %v4302_v10 = vpop.f32.mrb[4].mxu1 }
 0x12b   : > { %1857 = vmatmul.mubr.f32.gmra.mrb[110].mxu1 %v4280_v22  ;;  %v1040_v32 = vpop.f32.mrb[5].mxu1  ;;  %v808_v22 = vsel %vm664_vm1, %v805_v59, %v807_v50 }
 0x12c   : > { %1592 = vmatmul.mubr.f32.gmra.mrb[46].mxu0 %v4951_v60  ;;  %2445 = vmatprep.mubr.f32.mxu1 %v3513_v5  ;;  %v4974_v5 = vld [vmem:[#allocation43_spill] sm:$0xff] }
 0x12d   : > { %1596 = vmatprep.mubr.f32.mxu0 %v4972_v7 }
 0x12e   : > { %v4308_v21 = vpop.f32.mrb[6].mxu1 }
 0x12f   : > { %2446 = vmatmul.mubr.f32.vlgmr.msra.gmra.mrb[112].mxu1 %v3556_v35  ;;  %v1045_v29 = vpop.f32.mrb[7].mxu1 }
 0x130   : > { %1597 = vmatmul.mubr.f32.gmra.mrb[48].mxu0 %v4955_v51  ;;  %2448 = vmatprep.mubr.f32.mxu1 %v3591_v37  ;;  %v4975_v37 = vld [vmem:[#allocation44_spill] sm:$0xff] }
 0x131   : > { %1601 = vmatprep.mubr.f32.mxu0 %v4973_v8 }
 0x132   : > { %v4314_v45 = vpop.f32.mrb[8].mxu1 }
 0x133   : > { %2449 = vmatmul.mubr.f32.gmra.mrb[114].mxu1 %v3619_v2  ;;  %v1050_v60 = vpop.f32.mrb[9].mxu1 }
 0x134   : > { %1602 = vmatmul.mubr.f32.gmra.mrb[50].mxu0 %v4959_v26  ;;  %2451 = vmatprep.mubr.f32.mxu1 %v3654_v6  ;;  %v787_v6 = vrot.slane %v4087_v16, 2 }
 0x135   : > { %1606 = vmatprep.mubr.f32.mxu0 %v4974_v5 }
 0x136   : > { %v4320_v0 = vpop.f32.mrb[10].mxu1 }
 0x137   : > { %2452 = vmatmul.mubr.f32.gmra.mrb[116].mxu1 %v3684_v39  ;;  %v1055_v35 = vpop.f32.mrb[11].mxu1  ;;  %v788_v39 = vrot.slane %v4099_v25, 2 }
 0x138   : > { %1607 = vmatmul.mubr.f32.gmra.mrb[52].mxu0 %v4962_v34  ;;  %2454 = vmatprep.mubr.f32.mxu1 %v3714_v58 }
 0x139   : > { %1611 = vmatprep.mubr.f32.mxu0 %v4975_v37 }
 0x13a   : > { %v4326_v51 = vpop.f32.mrb[12].mxu1 }
 0x13b   : > { %2455 = vmatmul.mubr.f32.gmra.mrb[118].mxu1 %v4935_v63  ;;  %v1060_v2 = vpop.f32.mrb[13].mxu1  ;;  %v790_v63 = vrot.slane %v4260_v41, 2  ;;  %v2930_v41 = vld [vmem:[#allocation2 + $0x48] sm:$0xff] }
 0x13c   : > { %1612 = vmatmul.mubr.f32.gmra.mrb[54].mxu0 %v4071_v57  ;;  %2457 = vmatprep.mubr.f32.mxu1 %v4940_v30  ;;  %v789_v57 = vsel %vm664_vm1, %v787_v6, %v788_v39 }
 0x13d   : > { %1616 = vmatprep.mubr.f32.mxu0 %v4094_v19  ;;  %v791_v25 = vsel %vm664_vm1, %v788_v39, %v790_v63 }
 0x13e   : > { %v4334_v26 = vpop.f32.mrb[14].mxu1 }
 0x13f   : > { %2458 = vmatmul.mubr.f32.gmra.mrb[120].mxu1 %v4944_v27  ;;  %v1065_v58 = vpop.f32.mrb[15].mxu1 }
 0x140   : > { %1617 = vmatmul.mubr.f32.gmra.mrb[56].mxu0 %v4083_v28  ;;  %2460 = vmatprep.mubr.f32.mxu1 %v4948_v24 }
 0x141   : > { %1621 = vmatprep.mubr.f32.mxu0 %v4106_v9 }
 0x142   : > { %v4342_v30 = vpop.f32.mrb[16].mxu1 }
 0x143   : > { %2461 = vmatmul.mubr.f32.gmra.mrb[122].mxu1 %v4952_v42  ;;  %v1070_v16 = vpop.f32.mrb[17].mxu1 }
 0x144   : > { %1622 = vmatmul.mubr.f32.gmra.mrb[58].mxu0 %v4097_v48  ;;  %2463 = vmatprep.mubr.f32.mxu1 %v4956_v20 }
 0x145   : > { %1626 = vmatprep.mubr.f32.mxu0 %v789_v57 }
 0x146   : > { %v4348_v28 = vpop.f32.mrb[18].mxu1 }
 0x147   : > { %2464 = vmatmul.mubr.f32.gmra.mrb[124].mxu1 %v4960_v52  ;;  %v1075_v27 = vpop.f32.mrb[19].mxu1  ;;  %v2928_v52 = vld [vmem:[#allocation2 + $0x30] sm:$0xff] }
 0x148   : > { %1627 = vmatmul.mubr.f32.gmra.mrb[60].mxu0 %v4267_v47  ;;  %2466 = vmatprep.mubr.f32.mxu1 %v4963_v12  ;;  %v2931_v47 = vld [vmem:[#allocation2 + $0x50] sm:$0xff] }
 0x149   : > { %1631 = vmatprep.mubr.f32.mxu0 %v791_v25 }
 0x14a   : > { %v4353_v24 = vpop.f32.mrb[20].mxu1 }
 0x14b   : > { %2467 = vmatmul.mubr.f32.gmra.mrb[126].mxu1 %v4965_v31  ;;  %v1080_v48 = vpop.f32.mrb[21].mxu1  ;;  %v2929_v31 = vld [vmem:[#allocation2 + $0x38] sm:$0xff] }
 0x14c   : > { %1632 = vmatmul.mubr.f32.gmra.mrb[62].mxu0 %v4277_v13  ;;  %2469 = vmatprep.mubr.f32.mxu1 %v4966_v11  ;;  %v2932_v13 = vld [vmem:[#allocation2 + $0x60] sm:$0xff] }
 0x14d   : > { %1701 = vmatprep.mubr.f32.mxu0 %v3482_v61 }
 0x14e   : > { %v4359_v42 = vpop.f32.mrb[22].mxu1 }
 0x14f   : > { %2470 = vmatmul.mubr.f32.gmra.mrb[128].mxu1 %v4967_v46  ;;  %v1085_v20 = vpop.f32.mrb[23].mxu1 }
 0x150   : > { %1702 = vmatmul.mubr.f32.vlgmr.msra.gmra.mrb[0].mxu0 %v2928_v52  ;;  %2472 = vmatprep.mubr.f32.mxu1 %v4968_v15 }
 0x151   : > { %1706 = vmatprep.mubr.f32.mxu0 %v3525_v18 }
 0x152   : > { %v4364_v34 = vpop.f32.mrb[24].mxu1 }
 0x153   : > { %2473 = vmatmul.mubr.f32.gmra.mrb[130].mxu1 %v4969_v53  ;;  %v1090_v12 = vpop.f32.mrb[25].mxu1  ;;  %v2933_v53 = vld [vmem:[#allocation2 + $0x68] sm:$0xff] }
 0x154   : > { %1707 = vmatmul.mubr.f32.gmra.mrb[2].mxu0 %v2929_v31  ;;  %2475 = vmatprep.mubr.f32.mxu1 %v4970_v14 }
 0x155   : > { %1711 = vmatprep.mubr.f32.mxu0 %v3559_v36 }
 0x156   : > { %v4369_v61 = vpop.f32.mrb[26].mxu1 }
 0x157   : > { %2476 = vmatmul.mubr.f32.gmra.mrb[132].mxu1 %v4971_v55  ;;  %v1095_v11 = vpop.f32.mrb[27].mxu1 }
 0x158   : > { %1712 = vmatmul.mubr.f32.gmra.mrb[4].mxu0 %v2930_v41  ;;  %2478 = vmatprep.mubr.f32.mxu1 %v4972_v7 }
 0x159   : > { %1716 = vmatprep.mubr.f32.mxu0 %v3594_v56  ;;  %v804_v56 = vrot.slane %v4270_v54, 2  ;;  %v2934_v54 = vld [vmem:[#allocation2 + $0x78] sm:$0xff] }
 0x15a   : > { %v4374_v18 = vpop.f32.mrb[28].mxu1 }
 0x15b   : > { %2479 = vmatmul.mubr.f32.gmra.mrb[134].mxu1 %v4973_v8  ;;  %v1100_v46 = vpop.f32.mrb[29].mxu1 }
 0x15c   : > { %1717 = vmatmul.mubr.f32.gmra.mrb[6].mxu0 %v2931_v47  ;;  %2481 = vmatprep.mubr.f32.mxu1 %v4974_v5 }
 0x15d   : > { %1721 = vmatprep.mubr.f32.mxu0 %v3623_v4 }
 0x15e   : > { %v4379_v36 = vpop.f32.mrb[30].mxu1 }
 0x15f   : > { %2482 = vmatmul.mubr.f32.gmra.mrb[136].mxu1 %v4975_v37  ;;  %v1105_v15 = vpop.f32.mrb[31].mxu1 }
 0x160   : > { %1722 = vmatmul.mubr.f32.gmra.mrb[8].mxu0 %v2932_v13  ;;  %2484 = vmatprep.mubr.f32.mxu1 %v4094_v19  ;;  %v806_v19 = vsel %vm664_vm1, %v804_v56, %v805_v59 }
 0x161   : > { %1726 = vmatprep.mubr.f32.mxu0 %v3657_v23 }
 0x162   : > { %v4386_v3 = vpop.f32.mrb[32].mxu1 }
 0x163   : > { %2485 = vmatmul.mubr.f32.gmra.mrb[138].mxu1 %v4106_v9  ;;  %v1110_v4 = vpop.f32.mrb[33].mxu1 }
 0x164   : > { %1727 = vmatmul.mubr.f32.gmra.mrb[10].mxu0 %v2933_v53  ;;  %2487 = vmatprep.mubr.f32.mxu1 %v789_v57 }
 0x165   : > { %1731 = vmatprep.mubr.f32.mxu0 %v3687_v40 }
 0x166   : > { %v4392_v62 = vpop.f32.mrb[34].mxu1 }
 0x167   : > { %2488 = vmatmul.mubr.f32.gmra.mrb[140].mxu1 %v791_v25  ;;  %v1115_v23 = vpop.f32.mrb[35].mxu1 }
 0x168   : > { %1732 = vmatmul.mubr.f32.gmra.mrb[12].mxu0 %v2934_v54  ;;  %2490 = vmatprep.mubr.f32.mxu1 %v806_v19 }
 0x169   : > { %1736 = vmatprep.mubr.f32.mxu0 %v4938_v33 }
 0x16a   : > { %v4396_v9 = vpop.f32.mrb[36].mxu1 }
 0x16b   : > { %2491 = vmatmul.mubr.f32.gmra.mrb[142].mxu1 %v808_v22  ;;  %v1120_v49 = vpop.f32.mrb[37].mxu1  ;;  %v4427_v22 = vld [vmem:[%s4816_s4] ss:$0 sm:$0xff] }
 0x16c   : > { %1737 = vmatmul.mubr.f32.gmra.mrb[14].mxu0 %v2935_v1  ;;  %v1069_v49 = vadd.f32 %v4427_v22, %v4342_v30 }
 0x16e   : > { %v4398_v40 = vpop.f32.mrb[38].mxu1 }
 0x16f   : > { %v1125_v14 = vpop.f32.mrb[39].mxu1 }
 0x172   : > { %v4400_v17 = vpop.f32.mrb[40].mxu1 }
 0x173   : > { %v1130_v44 = vpop.f32.mrb[41].mxu1 }
 0x176   : > { %v4402_v55 = vpop.f32.mrb[42].mxu1 }
 0x177   : > { %v1135_v32 = vpop.f32.mrb[43].mxu1 }
 0x17a   : > { %v4404_v7 = vpop.f32.mrb[44].mxu1 }
 0x17b   : > { %v1140_v29 = vpop.f32.mrb[45].mxu1 }
 0x17e   : > { %v4406_v8 = vpop.f32.mrb[46].mxu1 }
 0x17f   : > { %v1145_v33 = vpop.f32.mrb[47].mxu1 }
 0x180   : > { %v1074_v33 = vadd.f32 %v4427_v22, %v4348_v28  ;;  %v1084_v28 = vadd.f32 %v4427_v22, %v4359_v42  ;;  %v1094_v42 = vadd.f32 %v4427_v22, %v4369_v61  ;;  %v1104_v61 = vadd.f32 %v4427_v22, %v4379_v36 }
 0x181   : > { %v1114_v36 = vadd.f32 %v4427_v22, %v4392_v62  ;;  %v1124_v62 = vadd.f32 %v4427_v22, %v4398_v40  ;;  %v1134_v40 = vadd.f32 %v4427_v22, %v4402_v55 }
 0x182   : > { %v4408_v60 = vpop.f32.mrb[48].mxu1 }
 0x183   : > { %v1150_v5 = vpop.f32.mrb[49].mxu1 }
 0x186   : > { %v4410_v35 = vpop.f32.mrb[50].mxu1 }
 0x187   : > { %v1155_v37 = vpop.f32.mrb[51].mxu1 }
 0x18a   : > { %v4412_v2 = vpop.f32.mrb[52].mxu1 }
 0x18b   : > { %v1160_v6 = vpop.f32.mrb[53].mxu1 }
 0x18e   : > { %v4414_v39 = vpop.f32.mrb[54].mxu1 }
 0x18f   : > { %v1165_v58 = vpop.f32.mrb[55].mxu1 }
 0x192   : > { %v4416_v57 = vpop.f32.mrb[56].mxu1 }
 0x193   : > { %v1170_v63 = vpop.f32.mrb[57].mxu1 }
 0x196   : > { %v4418_v16 = vpop.f32.mrb[58].mxu1 }
 0x197   : > { %v1175_v25 = vpop.f32.mrb[59].mxu1 }
 0x19a   : > { %v4420_v27 = vpop.f32.mrb[60].mxu1 }
 0x19b   : > { %v1180_v48 = vpop.f32.mrb[61].mxu1 }
 0x19c   : > { %v1079_v48 = vadd.f32 %v4427_v22, %v4353_v24  ;;  %v1089_v24 = vadd.f32 %v4427_v22, %v4364_v34  ;;  %v1099_v34 = vadd.f32 %v4427_v22, %v4374_v18  ;;  %v1109_v18 = vadd.f32 %v4427_v22, %v4386_v3 }
 0x19d   : > { %v1119_v3 = vadd.f32 %v4427_v22, %v4396_v9  ;;  %v1129_v9 = vadd.f32 %v4427_v22, %v4400_v17  ;;  %v1139_v17 = vadd.f32 %v4427_v22, %v4404_v7 }
 0x19e   : > { %v4422_v20 = vpop.f32.mrb[62].mxu1 }
 0x19f   : > { %v1185_v52 = vpop.f32.mrb[63].mxu1 }
 0x1a2   : > { %v1743_v12 = vpop.f32.mrb[64].mxu1 }
 0x1a3   : > { %v1745_v31 = vpop.f32.mrb[65].mxu1 }
 0x1a6   : > { %v1748_v11 = vpop.f32.mrb[66].mxu1 }
 0x1a7   : > { %v1750_v41 = vpop.f32.mrb[67].mxu1 }
 0x1aa   : > { %v1753_v46 = vpop.f32.mrb[68].mxu1 }
 0x1ab   : > { %v1755_v47 = vpop.f32.mrb[69].mxu1 }
 0x1ae   : > { %v1758_v15 = vpop.f32.mrb[70].mxu1 }
 0x1af   : > { %v1760_v13 = vpop.f32.mrb[71].mxu1 }
 0x1b2   : > { %v1763_v56 = vpop.f32.mrb[72].mxu1 }
 0x1b3   : > { %v1765_v59 = vpop.f32.mrb[73].mxu1 }
 0x1b6   : > { %v1768_v4 = vpop.f32.mrb[74].mxu1 }
 0x1b7   : > { %v1770_v53 = vpop.f32.mrb[75].mxu1 }
 0x1ba   : > { %v1773_v50 = vpop.f32.mrb[76].mxu1 }
 0x1bb   : > { %v1775_v19 = vpop.f32.mrb[77].mxu1 }
 0x1be   : > { %v1778_v23 = vpop.f32.mrb[78].mxu1 }
 0x1bf   : > { %v1780_v54 = vpop.f32.mrb[79].mxu1 }
 0x1c2   : > { %v1783_v1 = vpop.f32.mrb[80].mxu1 }
 0x1c3   : > { %v1518_v14 = vpop.f32.mrb[16].mxu0  ;;  %v1785_v44 = vpop.f32.mrb[81].mxu1 }
 0x1c4   : > { %v2766_v32 = vadd.f32 %v1518_v14, %v1069_v49  ;;  %v1520_v29 = vpop.f32.mrb[17].mxu0 }
 0x1c6   : > { %v4433_v5 = vadd.f32 %v2766_v32, %v1743_v12  ;;  %v1788_v37 = vpop.f32.mrb[82].mxu1 }
 0x1c7   : > { %v1523_v6 = vpop.f32.mrb[18].mxu0  ;;  %v1790_v58 = vpop.f32.mrb[83].mxu1 }
 0x1c8   : > { %v2769_v63 = vadd.f32 %v1523_v6, %v1074_v33  ;;  %v1525_v25 = vpop.f32.mrb[19].mxu0 }
 0x1ca   : > { %v4437_v52 = vadd.f32 %v2769_v63, %v1748_v11  ;;  %v1793_v30 = vpop.f32.mrb[84].mxu1 }
 0x1cb   : > { %v1528_v31 = vpop.f32.mrb[20].mxu0  ;;  %v1795_v41 = vpop.f32.mrb[85].mxu1 }
 0x1cc   : > { %v2772_v47 = vadd.f32 %v1528_v31, %v1079_v48  ;;  %v1530_v13 = vpop.f32.mrb[21].mxu0 }
 0x1ce   : > { %v4441_v12 = vadd.f32 %v2772_v47, %v1753_v46  ;;  %v1798_v59 = vpop.f32.mrb[86].mxu1 }
 0x1cf   : > { %v1533_v53 = vpop.f32.mrb[22].mxu0  ;;  %v1800_v19 = vpop.f32.mrb[87].mxu1 }
 0x1d0   : > { %v2775_v54 = vadd.f32 %v1533_v53, %v1084_v28  ;;  %v1535_v49 = vpop.f32.mrb[23].mxu0 }
 0x1d2   : > { %v4445_v11 = vadd.f32 %v2775_v54, %v1758_v15  ;;  %v1803_v14 = vpop.f32.mrb[88].mxu1 }
 0x1d3   : > { %v1538_v44 = vpop.f32.mrb[24].mxu0  ;;  %v1805_v32 = vpop.f32.mrb[89].mxu1 }
 0x1d4   : > { %v2778_v29 = vadd.f32 %v1538_v44, %v1089_v24  ;;  %v1540_v33 = vpop.f32.mrb[25].mxu0 }
 0x1d6   : > { %v4449_v46 = vadd.f32 %v2778_v29, %v1763_v56  ;;  %v4451_v6 = vpop.f32.mrb[90].mxu1 }
 0x1d7   : > { %v1543_v58 = vpop.f32.mrb[26].mxu0  ;;  %v1810_v63 = vpop.f32.mrb[91].mxu1 }
 0x1d8   : > { %v2781_v25 = vadd.f32 %v1543_v58, %v1094_v42  ;;  %v1545_v48 = vpop.f32.mrb[27].mxu0 }
 0x1da   : > { %v4455_v15 = vadd.f32 %v2781_v25, %v1768_v4  ;;  %v4457_v31 = vpop.f32.mrb[92].mxu1 }
 0x1db   : > { %v1548_v41 = vpop.f32.mrb[28].mxu0  ;;  %v1815_v47 = vpop.f32.mrb[93].mxu1 }
 0x1dc   : > { %v2784_v13 = vadd.f32 %v1548_v41, %v1099_v34  ;;  %v1550_v28 = vpop.f32.mrb[29].mxu0 }
 0x1de   : > { %v4461_v56 = vadd.f32 %v2784_v13, %v1773_v50  ;;  %v4463_v53 = vpop.f32.mrb[94].mxu1 }
 0x1df   : > { %v1553_v19 = vpop.f32.mrb[30].mxu0  ;;  %v1820_v54 = vpop.f32.mrb[95].mxu1 }
 0x1e0   : > { %v2787_v49 = vadd.f32 %v1553_v19, %v1104_v61  ;;  %v1555_v24 = vpop.f32.mrb[31].mxu0 }
 0x1e2   : > { %v4467_v4 = vadd.f32 %v2787_v49, %v1778_v23  ;;  %v4469_v44 = vpop.f32.mrb[96].mxu1 }
 0x1e3   : > { %v1558_v32 = vpop.f32.mrb[32].mxu0  ;;  %v1825_v29 = vpop.f32.mrb[97].mxu1 }
 0x1e4   : > { %v2790_v33 = vadd.f32 %v1558_v32, %v1109_v18  ;;  %v1560_v42 = vpop.f32.mrb[33].mxu0 }
 0x1e6   : > { %v4473_v50 = vadd.f32 %v2790_v33, %v1783_v1  ;;  %v4475_v58 = vpop.f32.mrb[98].mxu1 }
 0x1e7   : > { %v1563_v63 = vpop.f32.mrb[34].mxu0  ;;  %v1830_v25 = vpop.f32.mrb[99].mxu1 }
 0x1e8   : > { %v2793_v48 = vadd.f32 %v1563_v63, %v1114_v36  ;;  %v1565_v34 = vpop.f32.mrb[35].mxu0 }
 0x1ea   : > { %v4479_v23 = vadd.f32 %v2793_v48, %v1788_v37  ;;  %v4481_v41 = vpop.f32.mrb[100].mxu1 }
 0x1eb   : > { %v1568_v47 = vpop.f32.mrb[36].mxu0  ;;  %v1835_v13 = vpop.f32.mrb[101].mxu1 }
 0x1ec   : > { %v2796_v28 = vadd.f32 %v1568_v47, %v1119_v3  ;;  %v1570_v61 = vpop.f32.mrb[37].mxu0 }
 0x1ee   : > { %v4485_v1 = vadd.f32 %v2796_v28, %v1793_v30  ;;  %v4487_v19 = vpop.f32.mrb[102].mxu1 }
 0x1ef   : > { %v1573_v54 = vpop.f32.mrb[38].mxu0  ;;  %v1840_v49 = vpop.f32.mrb[103].mxu1 }
 0x1f0   : > { %v2799_v24 = vadd.f32 %v1573_v54, %v1124_v62  ;;  %v1575_v18 = vpop.f32.mrb[39].mxu0 }
 0x1f2   : > { %v4491_v37 = vadd.f32 %v2799_v24, %v1798_v59  ;;  %v4493_v32 = vpop.f32.mrb[104].mxu1 }
 0x1f3   : > { %v1578_v29 = vpop.f32.mrb[40].mxu0  ;;  %v1845_v33 = vpop.f32.mrb[105].mxu1 }
 0x1f4   : > { %v2802_v42 = vadd.f32 %v1578_v29, %v1129_v9  ;;  %v1580_v36 = vpop.f32.mrb[41].mxu0 }
 0x1f6   : > { %v4497_v30 = vadd.f32 %v2802_v42, %v1803_v14  ;;  %v4499_v63 = vpop.f32.mrb[106].mxu1  ;;  %v1144_v14 = vadd.f32 %v4427_v22, %v4406_v8 }
 0x1f7   : > { %v1583_v25 = vpop.f32.mrb[42].mxu0  ;;  %v1850_v48 = vpop.f32.mrb[107].mxu1 }
 0x1f8   : > { %v2805_v34 = vadd.f32 %v1583_v25, %v1134_v40  ;;  %v1585_v3 = vpop.f32.mrb[43].mxu0 }
 0x1fa   : > { %v4503_v59 = vpop.f32.mrb[108].mxu1  ;;  %v4506_v47 = vadd.f32 %v2805_v34, %v4451_v6  ;;  %v1149_v6 = vadd.f32 %v4427_v22, %v4408_v60 }
 0x1fb   : > { %v1588_v13 = vpop.f32.mrb[44].mxu0  ;;  %v1855_v28 = vpop.f32.mrb[109].mxu1 }
 0x1fc   : > { %v2808_v61 = vadd.f32 %v1588_v13, %v1139_v17  ;;  %v1590_v55 = vpop.f32.mrb[45].mxu0 }
 0x1fd   : > { %v1164_v55 = vadd.f32 %v4427_v22, %v4414_v39 }
 0x1fe   : > { %v4510_v62 = vpop.f32.mrb[110].mxu1  ;;  %v4513_v54 = vadd.f32 %v2808_v61, %v4457_v31  ;;  %v1154_v31 = vadd.f32 %v4427_v22, %v4410_v35 }
 0x1ff   : > { %v1593_v49 = vpop.f32.mrb[46].mxu0  ;;  %v1860_v24 = vpop.f32.mrb[111].mxu1 }
 0x200   : > { %v2811_v7 = vadd.f32 %v1593_v49, %v1144_v14  ;;  %v1595_v18 = vpop.f32.mrb[47].mxu0 }
 0x201   : > { %v1169_v18 = vadd.f32 %v4427_v22, %v4416_v57 }
 0x202   : > { %v4517_v9 = vpop.f32.mrb[112].mxu1  ;;  %v4520_v29 = vadd.f32 %v2811_v7, %v4463_v53  ;;  %v1159_v53 = vadd.f32 %v4427_v22, %v4412_v2 }
 0x203   : > { %v1598_v33 = vpop.f32.mrb[48].mxu0  ;;  %v4522_v42 = vpop.f32.mrb[113].mxu1 }
 0x204   : > { %v2814_v8 = vadd.f32 %v1598_v33, %v1149_v6  ;;  %v1600_v36 = vpop.f32.mrb[49].mxu0 }
 0x206   : > { %v4526_v40 = vpop.f32.mrb[114].mxu1  ;;  %v4529_v25 = vadd.f32 %v2814_v8, %v4469_v44 }
 0x207   : > { %v1603_v48 = vpop.f32.mrb[50].mxu0  ;;  %v4531_v60 = vpop.f32.mrb[115].mxu1 }
 0x208   : > { %v2817_v34 = vadd.f32 %v1603_v48, %v1154_v31  ;;  %v1605_v3 = vpop.f32.mrb[51].mxu0 }
 0x20a   : > { %v4535_v17 = vpop.f32.mrb[116].mxu1  ;;  %v4538_v13 = vadd.f32 %v2817_v34, %v4475_v58 }
 0x20b   : > { %v1608_v28 = vpop.f32.mrb[52].mxu0  ;;  %v4540_v35 = vpop.f32.mrb[117].mxu1 }
 0x20c   : > { %v2820_v61 = vadd.f32 %v1608_v28, %v1159_v53  ;;  %v1610_v44 = vpop.f32.mrb[53].mxu0 }
 0x20e   : > { %v4544_v14 = vpop.f32.mrb[118].mxu1  ;;  %v4547_v49 = vadd.f32 %v2820_v61, %v4481_v41 }
 0x20f   : > { %v1613_v2 = vpop.f32.mrb[54].mxu0  ;;  %v4549_v24 = vpop.f32.mrb[119].mxu1 }
 0x210   : > { %v2823_v7 = vadd.f32 %v1613_v2, %v1164_v55  ;;  %v1615_v58 = vpop.f32.mrb[55].mxu0  ;;  %v1179_v2 = vadd.f32 %v4427_v22, %v4420_v27 }
 0x212   : > { %v2459_v6 = vpop.f32.mrb[120].mxu1  ;;  %v4554_v33 = vadd.f32 %v2823_v7, %v4487_v19  ;;  %v1174_v19 = vadd.f32 %v4427_v22, %v4418_v16 }
 0x213   : > { %v1618_v8 = vpop.f32.mrb[56].mxu0  ;;  %v1974_v39 = vadd.f32 %v4437_v52, %v2459_v6  ;;  %v1968_v36 = vpop.f32.mrb[121].mxu1 }
 0x214   : > { %v2826_v31 = vadd.f32 %v1618_v8, %v1169_v18  ;;  %v1620_v41 = vpop.f32.mrb[57].mxu0  ;;  %v1969_v57 = vadd.f32 %v4433_v5, %v1968_v36  ;;  %v1184_v36 = vadd.f32 %v4427_v22, %v4422_v20 }
 0x215   : > { %v4565_v48 = vmax.f32 %v1974_v39, 0.0 }
 0x216   : > { %v4569_v34 = vmax.f32 %v1969_v57, 0.0  ;;  %v2462_v52 = vpop.f32.mrb[122].mxu1  ;;  %v4572_v3 = vadd.f32 %v2826_v31, %v4493_v32 }
 0x217   : > { %2239 = vst [vmem:[%s4562_s9 + $0x48] sm:$0xff] %v4565_v48  ;;  %v1623_v53 = vpop.f32.mrb[58].mxu0  ;;  %v1984_v28 = vadd.f32 %v4445_v11, %v2462_v52  ;;  %v1978_v61 = vpop.f32.mrb[123].mxu1 }
 0x218   : > { %2238 = vst [vmem:[%s4562_s9 + $0x40] sm:$0xff] %v4569_v34  ;;  %v2829_v5 = vadd.f32 %v1623_v53, %v1174_v19  ;;  %v1625_v44 = vpop.f32.mrb[59].mxu0  ;;  %v1979_v16 = vadd.f32 %v4441_v12, %v1978_v61 }
 0x219   : > { %v4580_v55 = vmax.f32 %v1984_v28, 0.0  ;;  %v1029_v28 = vadd.f32 %v4427_v22, %v4291_v43 }
 0x21a   : > { %v4584_v32 = vmax.f32 %v1979_v16, 0.0  ;;  %v2465_v7 = vpop.f32.mrb[124].mxu1  ;;  %v4587_v58 = vadd.f32 %v2829_v5, %v4499_v63 }
 0x21b   : > { %2241 = vst [vmem:[%s4562_s9 + $0x58] sm:$0xff] %v4580_v55  ;;  %v1628_v11 = vpop.f32.mrb[60].mxu0  ;;  %v1994_v18 = vadd.f32 %v4455_v15, %v2465_v7  ;;  %v1988_v6 = vpop.f32.mrb[125].mxu1 }
 0x21c   : > { %2240 = vst [vmem:[%s4562_s9 + $0x50] sm:$0xff] %v4584_v32  ;;  %v2832_v12 = vadd.f32 %v1628_v11, %v1179_v2  ;;  %v1630_v8 = vpop.f32.mrb[61].mxu0  ;;  %v1989_v27 = vadd.f32 %v4449_v46, %v1988_v6 }
 0x21d   : > { %v4595_v39 = vmax.f32 %v1994_v18, 0.0 }
 0x21e   : > { %v4599_v63 = vmax.f32 %v1989_v27, 0.0  ;;  %v2468_v31 = vpop.f32.mrb[126].mxu1  ;;  %v4602_v41 = vadd.f32 %v2832_v12, %v4503_v59 }
 0x21f   : > { %2243 = vst [vmem:[%s4562_s9 + $0x68] sm:$0xff] %v4595_v39  ;;  %v1633_v15 = vpop.f32.mrb[62].mxu0  ;;  %v2004_v57 = vadd.f32 %v4467_v4, %v2468_v31  ;;  %v1998_v19 = vpop.f32.mrb[127].mxu1 }
 0x220   : > { %2242 = vst [vmem:[%s4562_s9 + $0x60] sm:$0xff] %v4599_v63  ;;  %v2835_v46 = vadd.f32 %v1633_v15, %v1184_v36  ;;  %v1635_v52 = vpop.f32.mrb[63].mxu0  ;;  %v1999_v20 = vadd.f32 %v4461_v56, %v1998_v19 }
 0x221   : > { %v4610_v53 = vmax.f32 %v2004_v57, 0.0 }
 0x222   : > { %v4614_v59 = vmax.f32 %v1999_v20, 0.0  ;;  %v2471_v61 = vpop.f32.mrb[128].mxu1  ;;  %v4617_v5 = vadd.f32 %v2835_v46, %v4510_v62  ;;  %v1034_v62 = vadd.f32 %v4427_v22, %v4297_v38 }
 0x223   : > { %2245 = vst [vmem:[%s4562_s9 + $0x78] sm:$0xff] %v4610_v53  ;;  %v1703_v4 = vpop.f32.mrb[0].mxu0  ;;  %v2014_v44 = vadd.f32 %v4479_v23, %v2471_v61  ;;  %v2008_v16 = vpop.f32.mrb[129].mxu1 }
 0x224   : > { %2244 = vst [vmem:[%s4562_s9 + $0x70] sm:$0xff] %v4614_v59  ;;  %v2750_v56 = vadd.f32 %v1703_v4, %v1029_v28  ;;  %v1705_v2 = vpop.f32.mrb[1].mxu0  ;;  %v2009_v43 = vadd.f32 %v4473_v50, %v2008_v16 }
 0x225   : > { %v4625_v7 = vmax.f32 %v2014_v44, 0.0 }
 0x226   : > { %v1929_v11 = vadd.f32 %v2750_v56, %v4522_v42  ;;  %v4630_v18 = vmax.f32 %v2009_v43, 0.0  ;;  %v2474_v6 = vpop.f32.mrb[130].mxu1  ;;  %v1039_v42 = vadd.f32 %v4427_v22, %v4302_v10 }
 0x227   : > { %2247 = vst [vmem:[%s4562_s9 + $0x88] sm:$0xff] %v4625_v7  ;;  %v1708_v23 = vpop.f32.mrb[2].mxu0  ;;  %v2024_v12 = vadd.f32 %v4491_v37, %v2474_v6  ;;  %v2018_v8 = vpop.f32.mrb[131].mxu1 }
 0x228   : > { %v2087_v27 = vmax.f32 %v1929_v11, 0.0  ;;  %2246 = vst [vmem:[%s4562_s9 + $0x80] sm:$0xff] %v4630_v18  ;;  %v2752_v50 = vadd.f32 %v1708_v23, %v1034_v62  ;;  %v1710_v36 = vpop.f32.mrb[3].mxu0  ;;  %v2019_v38 = vadd.f32 %v4485_v1, %v2018_v8  ;;  %v1049_v8 = vadd.f32 %v4427_v22, %v4314_v45 }
 0x229   : > { %v4638_v31 = vmax.f32 %v2024_v12, 0.0 }
 0x22a   : > { %2230 = vst [vmem:[%s4562_s9] sm:$0xff] %v2087_v27  ;;  %v1934_v15 = vadd.f32 %v2752_v50, %v4517_v9  ;;  %v4644_v57 = vmax.f32 %v2019_v38, 0.0  ;;  %v2477_v37 = vpop.f32.mrb[132].mxu1  ;;  %v1044_v9 = vadd.f32 %v4427_v22, %v4308_v21  ;;  %v2156_v61 = vmul.f32 %v2087_v27, %v2087_v27 }
 0x22b   : > { %2249 = vst [vmem:[%s4562_s9 + $0x98] sm:$0xff] %v4638_v31  ;;  %v1713_v19 = vpop.f32.mrb[4].mxu0  ;;  %v2034_v46 = vadd.f32 %v4506_v47, %v2477_v37  ;;  %v2028_v52 = vpop.f32.mrb[133].mxu1 }
 0x22c   : > { %v2088_v1 = vmax.f32 %v1934_v15, 0.0  ;;  %2248 = vst [vmem:[%s4562_s9 + $0x90] sm:$0xff] %v4644_v57  ;;  %v2754_v20 = vadd.f32 %v1713_v19, %v1039_v42  ;;  %v1715_v28 = vpop.f32.mrb[5].mxu0  ;;  %v2029_v10 = vadd.f32 %v4497_v30, %v2028_v52 }
 0x22d   : > { %v4654_v4 = vmax.f32 %v2034_v46, 0.0 }
 0x22e   : > { %v2119_v44 = vadd.f32 %v2088_v1, %v2087_v27  ;;  %v2157_v16 = vmul.f32 %v2088_v1, %v2088_v1  ;;  %2231 = vst [vmem:[%s4562_s9 + $0x8] sm:$0xff] %v2088_v1  ;;  %v1939_v47 = vadd.f32 %v2754_v20, %v4531_v60  ;;  %v4658_v56 = vmax.f32 %v2029_v10, 0.0  ;;  %v2480_v2 = vpop.f32.mrb[134].mxu1 }
 0x22f   : > { %2251 = vst [vmem:[%s4562_s9 + $0xa8] sm:$0xff] %v4654_v4  ;;  %v1718_v43 = vpop.f32.mrb[6].mxu0  ;;  %v2044_v30 = vadd.f32 %v4520_v29, %v2480_v2  ;;  %v2038_v62 = vpop.f32.mrb[135].mxu1 }
 0x230   : > { %v2188_v21 = vadd.f32 %v2157_v16, %v2156_v61  ;;  %v2089_v11 = vmax.f32 %v1939_v47, 0.0  ;;  %2250 = vst [vmem:[%s4562_s9 + $0xa0] sm:$0xff] %v4658_v56  ;;  %v2756_v6 = vadd.f32 %v1718_v43, %v1044_v9  ;;  %v1720_v23 = vpop.f32.mrb[7].mxu0  ;;  %v2039_v60 = vadd.f32 %v4513_v54, %v2038_v62 }
 0x231   : > { %v4665_v12 = vmax.f32 %v2044_v30, 0.0  ;;  %v1059_v30 = vadd.f32 %v4427_v22, %v4326_v51 }
 0x232   : > { %v2120_v27 = vadd.f32 %v2119_v44, %v2089_v11  ;;  %v2158_v50 = vmul.f32 %v2089_v11, %v2089_v11  ;;  %2232 = vst [vmem:[%s4562_s9 + $0x10] sm:$0xff] %v2089_v11  ;;  %v1944_v29 = vadd.f32 %v2756_v6, %v4526_v40  ;;  %v2483_v36 = vpop.f32.mrb[136].mxu1  ;;  %v4674_v38 = vmax.f32 %v2039_v60, 0.0 }
 0x233   : > { %2253 = vst [vmem:[%s4562_s9 + $0xb8] sm:$0xff] %v4665_v12  ;;  %v1723_v42 = vpop.f32.mrb[8].mxu0  ;;  %v2054_v15 = vadd.f32 %v4538_v13, %v2483_v36  ;;  %v2048_v54 = vpop.f32.mrb[137].mxu1  ;;  %v1054_v40 = vadd.f32 %v4427_v22, %v4320_v0 }
 0x234   : > { %v2189_v37 = vadd.f32 %v2188_v21, %v2158_v50  ;;  %v2090_v19 = vmax.f32 %v1944_v29, 0.0  ;;  %v2758_v45 = vadd.f32 %v1723_v42, %v1049_v8  ;;  %v1725_v46 = vpop.f32.mrb[9].mxu0  ;;  %v2049_v52 = vadd.f32 %v4529_v25, %v2048_v54  ;;  %2252 = vst [vmem:[%s4562_s9 + $0xb0] sm:$0xff] %v4674_v38 }
 0x235   : > { %v4682_v1 = vmax.f32 %v2054_v15, 0.0 }
 0x236   : > { %v2121_v20 = vadd.f32 %v2120_v27, %v2090_v19  ;;  %v2159_v28 = vmul.f32 %v2090_v19, %v2090_v19  ;;  %2233 = vst [vmem:[%s4562_s9 + $0x18] sm:$0xff] %v2090_v19  ;;  %v1949_v13 = vadd.f32 %v2758_v45, %v4540_v35  ;;  %v4686_v10 = vmax.f32 %v2049_v52, 0.0  ;;  %v2486_v9 = vpop.f32.mrb[138].mxu1 }
 0x237   : > { %2255 = vst [vmem:[%s4562_s9 + $0xc8] sm:$0xff] %v4682_v1  ;;  %v1728_v25 = vpop.f32.mrb[10].mxu0  ;;  %v2064_v61 = vadd.f32 %v4554_v33, %v2486_v9  ;;  %v2058_v0 = vpop.f32.mrb[139].mxu1 }
 0x238   : > { %v2190_v44 = vadd.f32 %v2189_v37, %v2159_v28  ;;  %v2091_v16 = vmax.f32 %v1949_v13, 0.0  ;;  %2254 = vst [vmem:[%s4562_s9 + $0xc0] sm:$0xff] %v4686_v10  ;;  %v2760_v47 = vadd.f32 %v1728_v25, %v1054_v40  ;;  %v1730_v2 = vpop.f32.mrb[11].mxu0  ;;  %v2059_v35 = vadd.f32 %v4547_v49, %v2058_v0 }
 0x239   : > { %v4693_v43 = vmax.f32 %v2064_v61, 0.0 }
 0x23a   : > { %v2122_v62 = vadd.f32 %v2121_v20, %v2091_v16  ;;  %v2160_v21 = vmul.f32 %v2091_v16, %v2091_v16  ;;  %2234 = vst [vmem:[%s4562_s9 + $0x20] sm:$0xff] %v2091_v16  ;;  %v1954_v33 = vadd.f32 %v2760_v47, %v4535_v17  ;;  %v2489_v11 = vpop.f32.mrb[140].mxu1  ;;  %v4702_v6 = vmax.f32 %v2059_v35, 0.0 }
 0x23b   : > { %2257 = vst [vmem:[%s4562_s9 + $0xd8] sm:$0xff] %v4693_v43  ;;  %v1733_v23 = vpop.f32.mrb[12].mxu0  ;;  %v2074_v60 = vadd.f32 %v4587_v58, %v2489_v11  ;;  %v2068_v49 = vpop.f32.mrb[141].mxu1  ;;  %v1064_v17 = vadd.f32 %v4427_v22, %v4334_v26  ;;  %v2166_v35 = vmul.f32 %v4584_v32, %v4584_v32 }
 0x23c   : > { %v2191_v8 = vadd.f32 %v2190_v44, %v2160_v21  ;;  %v2092_v27 = vmax.f32 %v1954_v33, 0.0  ;;  %v2762_v51 = vadd.f32 %v1733_v23, %v1059_v30  ;;  %v1735_v50 = vpop.f32.mrb[13].mxu0  ;;  %v2069_v29 = vadd.f32 %v4572_v3, %v2068_v49  ;;  %2256 = vst [vmem:[%s4562_s9 + $0xd0] sm:$0xff] %v4702_v6 }
 0x23d   : > { %v4710_v36 = vmax.f32 %v2074_v60, 0.0  ;;  %v2164_v44 = vmul.f32 %v4569_v34, %v4569_v34  ;;  %v2167_v21 = vmul.f32 %v4580_v55, %v4580_v55 }
 0x23e   : > { %v2123_v42 = vadd.f32 %v2122_v62, %v2092_v27  ;;  %v2161_v15 = vmul.f32 %v2092_v27, %v2092_v27  ;;  %2235 = vst [vmem:[%s4562_s9 + $0x28] sm:$0xff] %v2092_v27  ;;  %v1959_v58 = vadd.f32 %v2762_v51, %v4549_v24  ;;  %v4714_v54 = vmax.f32 %v2069_v29, 0.0  ;;  %v2492_v37 = vpop.f32.mrb[142].mxu1 }
 0x23f   : > { %2259 = vst [vmem:[%s4562_s9 + $0xe8] sm:$0xff] %v4710_v36  ;;  %v1738_v3 = vpop.f32.mrb[14].mxu0  ;;  %v2084_v19 = vadd.f32 %v4617_v5, %v2492_v37  ;;  %v2078_v26 = vpop.f32.mrb[143].mxu1 }
 0x240   : > { %v2192_v22 = vadd.f32 %v2191_v8, %v2161_v15  ;;  %v2093_v45 = vmax.f32 %v1959_v58, 0.0  ;;  %2258 = vst [vmem:[%s4562_s9 + $0xe0] sm:$0xff] %v4714_v54  ;;  %v2764_v46 = vadd.f32 %v1738_v3, %v1064_v17  ;;  %v1740_v52 = vpop.f32.mrb[15].mxu0  ;;  %v2079_v40 = vadd.f32 %v4602_v41, %v2078_v26 }
 0x241   : > { %v4721_v24 = vmax.f32 %v2084_v19, 0.0 }
 0x242   : > { %v2124_v20 = vadd.f32 %v2123_v42, %v2093_v45  ;;  %v2162_v28 = vmul.f32 %v2093_v45, %v2093_v45  ;;  %2236 = vst [vmem:[%s4562_s9 + $0x30] sm:$0xff] %v2093_v45  ;;  %v1964_v13 = vadd.f32 %v2764_v46, %v4544_v14  ;;  %v4728_v5 = vmax.f32 %v2079_v40, 0.0 }
 0x243   : > { %2261 = vst [vmem:[%s4562_s9 + $0xf8] sm:$0xff] %v4721_v24  ;;  %v2165_v14 = vmul.f32 %v4565_v48, %v4565_v48 }
 0x244   : > { %v2193_v9 = vadd.f32 %v2192_v22, %v2162_v28  ;;  %v2094_v25 = vmax.f32 %v1964_v13, 0.0  ;;  %2260 = vst [vmem:[%s4562_s9 + $0xf0] sm:$0xff] %v4728_v5 }
 0x246   : > { %v2125_v61 = vadd.f32 %v2124_v20, %v2094_v25  ;;  %v2163_v0 = vmul.f32 %v2094_v25, %v2094_v25  ;;  %2237 = vst [vmem:[%s4562_s9 + $0x38] sm:$0xff] %v2094_v25 }
 0x248   : > { %v2126_v41 = vadd.f32 %v2125_v61, %v4569_v34  ;;  %v2194_v16 = vadd.f32 %v2193_v9, %v2163_v0  ;;  %v2168_v34 = vmul.f32 %v4599_v63, %v4599_v63 }
 0x24a   : > { %v2127_v47 = vadd.f32 %v2126_v41, %v4565_v48  ;;  %v2195_v2 = vadd.f32 %v2194_v16, %v2164_v44  ;;  %v2169_v48 = vmul.f32 %v4595_v39, %v4595_v39 }
 0x24c   : > { %v2128_v30 = vadd.f32 %v2127_v47, %v4584_v32  ;;  %v2196_v62 = vadd.f32 %v2195_v2, %v2165_v14  ;;  %v2170_v32 = vmul.f32 %v4614_v59, %v4614_v59 }
 0x24e   : > { %v2129_v33 = vadd.f32 %v2128_v30, %v4580_v55  ;;  %v2197_v11 = vadd.f32 %v2196_v62, %v2166_v35  ;;  %v2171_v55 = vmul.f32 %v4610_v53, %v4610_v53  ;;  %v2186_v62 = vmul.f32 %v4728_v5, %v4728_v5 }
 0x250   : > { %v2130_v23 = vadd.f32 %v2129_v33, %v4599_v63  ;;  %v2198_v60 = vadd.f32 %v2197_v11, %v2167_v21  ;;  %v2172_v63 = vmul.f32 %v4630_v18, %v4630_v18  ;;  %v2187_v21 = vmul.f32 %v4721_v24, %v4721_v24 }
 0x252   : > { %v2131_v49 = vadd.f32 %v2130_v23, %v4595_v39  ;;  %v2199_v8 = vadd.f32 %v2198_v60, %v2168_v34  ;;  %v2173_v39 = vmul.f32 %v4625_v7, %v4625_v7 }
 0x254   : > { %v2132_v27 = vadd.f32 %v2131_v49, %v4614_v59  ;;  %v2200_v51 = vadd.f32 %v2199_v8, %v2169_v48  ;;  %v2174_v59 = vmul.f32 %v4644_v57, %v4644_v57 }
 0x256   : > { %v2133_v50 = vadd.f32 %v2132_v27, %v4610_v53  ;;  %v2201_v29 = vadd.f32 %v2200_v51, %v2170_v32  ;;  %v2175_v53 = vmul.f32 %v4638_v31, %v4638_v31 }
 0x258   : > { %v2134_v17 = vadd.f32 %v2133_v50, %v4630_v18  ;;  %v2202_v42 = vadd.f32 %v2201_v29, %v2171_v55  ;;  %v2176_v18 = vmul.f32 %v4658_v56, %v4658_v56 }
 0x25a   : > { %v2135_v15 = vadd.f32 %v2134_v17, %v4625_v7  ;;  %v2203_v58 = vadd.f32 %v2202_v42, %v2172_v63  ;;  %v2177_v7 = vmul.f32 %v4654_v4, %v4654_v4 }
 0x25c   : > { %v2204_v37 = vadd.f32 %v2203_v58, %v2173_v39  ;;  %v2136_v3 = vadd.f32 %v2135_v15, %v4644_v57  ;;  %v2178_v57 = vmul.f32 %v4674_v38, %v4674_v38 }
 0x25e   : > { %v2137_v19 = vadd.f32 %v2136_v3, %v4638_v31  ;;  %v2205_v26 = vadd.f32 %v2204_v37, %v2174_v59  ;;  %v2179_v31 = vmul.f32 %v4665_v12, %v4665_v12 }
 0x260   : > { %v2138_v22 = vadd.f32 %v2137_v19, %v4658_v56  ;;  %v2206_v45 = vadd.f32 %v2205_v26, %v2175_v53  ;;  %v2180_v56 = vmul.f32 %v4686_v10, %v4686_v10 }
 0x262   : > { %v2139_v46 = vadd.f32 %v2138_v22, %v4654_v4  ;;  %v2207_v52 = vadd.f32 %v2206_v45, %v2176_v18  ;;  %v2181_v4 = vmul.f32 %v4682_v1, %v4682_v1 }
 0x264   : > { %v2140_v40 = vadd.f32 %v2139_v46, %v4674_v38  ;;  %v2208_v20 = vadd.f32 %v2207_v52, %v2177_v7  ;;  %v2182_v38 = vmul.f32 %v4702_v6, %v4702_v6 }
 0x266   : > { %v2141_v28 = vadd.f32 %v2140_v40, %v4665_v12  ;;  %v2209_v13 = vadd.f32 %v2208_v20, %v2178_v57  ;;  %v2183_v12 = vmul.f32 %v4693_v43, %v4693_v43 }
 0x268   : > { %v2142_v9 = vadd.f32 %v2141_v28, %v4686_v10  ;;  %v2210_v25 = vadd.f32 %v2209_v13, %v2179_v31  ;;  %v2184_v10 = vmul.f32 %v4714_v54, %v4714_v54 }
 0x26a   : > { %v2143_v61 = vadd.f32 %v2142_v9, %v4682_v1  ;;  %v2211_v0 = vadd.f32 %v2210_v25, %v2180_v56  ;;  %v2185_v1 = vmul.f32 %v4710_v36, %v4710_v36 }
 0x26c   : > { %v2144_v44 = vadd.f32 %v2143_v61, %v4702_v6  ;;  %v2212_v41 = vadd.f32 %v2211_v0, %v2181_v4 }
 0x26e   : > { %v2145_v16 = vadd.f32 %v2144_v44, %v4693_v43  ;;  %v2213_v14 = vadd.f32 %v2212_v41, %v2182_v38 }
 0x270   : > { %v2146_v47 = vadd.f32 %v2145_v16, %v4714_v54  ;;  %v2214_v2 = vadd.f32 %v2213_v14, %v2183_v12 }
 0x272   : > { %v2147_v35 = vadd.f32 %v2146_v47, %v4710_v36  ;;  %v2215_v30 = vadd.f32 %v2214_v2, %v2184_v10 }
 0x274   : > { %v2148_v6 = vadd.f32 %v2147_v35, %v4728_v5  ;;  %v2216_v43 = vadd.f32 %v2215_v30, %v2185_v1 }
 0x276   : > { %v2149_v33 = vadd.f32 %v2148_v6, %v4721_v24  ;;  %v2217_v54 = vadd.f32 %v2216_v43, %v2186_v62 }
 0x278   : > { %v2150_v11 = vrot.slane %v2149_v33, 4  ;;  %v2218_v34 = vadd.f32 %v2217_v54, %v2187_v21 }
 0x27a   : > { %v2151_v23 = vadd.f32 %v2150_v11, %v2149_v33  ;;  %v2219_v60 = vrot.slane %v2218_v34, 4 }
 0x27c   : > { %v2152_v48 = vrot.slane %v2151_v23, 2  ;;  %v2220_v36 = vadd.f32 %v2219_v60, %v2218_v34 }
 0x27e   : > { %v2153_v49 = vadd.f32 %v2152_v48, %v2151_v23  ;;  %v2221_v8 = vrot.slane %v2220_v36, 2 }
 0x280   : > { %v2154_v32 = vrot.slane %v2153_v49, 1  ;;  %v2222_v27 = vadd.f32 %v2221_v8, %v2220_v36 }
 0x282   : > { %v2223_v51 = vrot.slane %v2222_v27, 1  ;;  %v2155_v5 = vadd.f32 %v2154_v32, %v2153_v49 }
 0x284   : > { %v2224_v55 = vadd.f32 %v2223_v51, %v2222_v27 }
 0x286   : > { %v2226_v24 = vsel %vm2225_vm2, %v2155_v5, %v2224_v55 }
 0x287   : > { %v2228_v50 = vsel %vm2227_vm3, %v2226_v24, 0.0 }
 0x288   : > { %2229 = vst [vmem:[%s262_s12] sm:$0xff] %v2228_v50 }
 0x289 PF: > { %s17_s21 = sadd.s32 1, %s2942_s21  }
 0x28a   : > { %p14_p4 = scmp.ge.s32.totalorder %s17_s21, 4  }
 0x28c   :  { %16 = sbr.rel (!%p14_p4) target bundleno = 1 (0x1), region = 84 }

</bundles_post_ra>
